<compile_context>
chip_gen: v7x
topology: tpu7x:2x2x1
jax: 0.10.0
libtpu: 0.0.40
codegen_flags: <defaults>
</compile_context>

<pallas_src>
import functools

import jax
import jax.numpy as jnp
from jax.experimental import pallas as pl
from jax.experimental.pallas import tpu as pltpu

_BN_EPS = 1e-5


# ----------------------------- Pallas kernels ------------------------------ #
# Common layout: x_ref is (1, P, L, Cin) -- P phase-split flattened views of
# the zero-padded NHWC image; conv tap t reads the contiguous row window
# [shift_t, shift_t + m_out) of phase p_t.  w_ref is (9, Cin, Cout) with the
# BN scale already folded in; b_ref is the folded BN bias (1, Cout), f32.


def _conv3x3_bias_relu_kernel(x_ref, w_ref, b_ref, o_ref, *, taps, m_out):
    """out = relu(conv3x3_bn(x))   (conv1 of the block)."""
    acc = jnp.zeros((m_out, o_ref.shape[-1]), jnp.float32)
    for t, (phase, shift) in enumerate(taps):
        acc = acc + jnp.dot(x_ref[0, phase, pl.ds(shift, m_out), :], w_ref[t],
                            preferred_element_type=jnp.float32)
    o_ref[0, :, :] = jnp.maximum(acc + b_ref[...], 0.0).astype(o_ref.dtype)


def _conv3x3_bias_idadd_relu_kernel(x_ref, w_ref, b_ref, r_ref, o_ref, *,
                                    taps, m_out):
    """out = relu(conv3x3_bn(x) + residual)   (identity shortcut: plain add)."""
    acc = r_ref[0, :, :] + b_ref[...]
    for t, (phase, shift) in enumerate(taps):
        acc = acc + jnp.dot(x_ref[0, phase, pl.ds(shift, m_out), :], w_ref[t],
                            preferred_element_type=jnp.float32)
    o_ref[0, :, :] = jnp.maximum(acc, 0.0).astype(o_ref.dtype)


def _conv3x3_bias_projadd_relu_kernel(x_ref, w_ref, b_ref, s_ref, ws_ref,
                                      bs_ref, o_ref, *, taps, m_out):
    """out = relu(conv3x3_bn(x) + conv1x1_bn(shortcut))  (projection path)."""
    acc = jnp.dot(s_ref[0, :, :], ws_ref[...], preferred_element_type=jnp.float32)
    acc = acc + b_ref[...] + bs_ref[...]
    for t, (phase, shift) in enumerate(taps):
        acc = acc + jnp.dot(x_ref[0, phase, pl.ds(shift, m_out), :], w_ref[t],
                            preferred_element_type=jnp.float32)
    o_ref[0, :, :] = jnp.maximum(acc, 0.0).astype(o_ref.dtype)


# ------------------------------ pallas_call glue ---------------------------- #

_PARALLEL = pltpu.CompilerParams(dimension_semantics=("parallel",))


def _conv_grid_spec(n, x_stack, extra_in_specs, m_out, cout):
    _, p, l, c = x_stack.shape
    return pltpu.PrefetchScalarGridSpec(
        num_scalar_prefetch=0,
        grid=(n,),
        in_specs=[
            pl.BlockSpec((1, p, l, c), lambda i: (i, 0, 0, 0)),   # activations
            pl.BlockSpec((9, c, cout), lambda i: (0, 0, 0)),      # weights (resident)
            pl.BlockSpec((1, cout), lambda i: (0, 0)),            # folded BN bias
        ] + extra_in_specs,
        out_specs=pl.BlockSpec((1, m_out, cout), lambda i: (i, 0, 0)),
    )


def _conv3x3_bn_relu(x_stack, w, b, *, taps, m_out, out_dtype):
    n = x_stack.shape[0]
    cout = w.shape[-1]
    kern = functools.partial(_conv3x3_bias_relu_kernel, taps=taps, m_out=m_out)
    return pl.pallas_call(
        kern,
        out_shape=jax.ShapeDtypeStruct((n, m_out, cout), out_dtype),
        grid_spec=_conv_grid_spec(n, x_stack, [], m_out, cout),
        compiler_params=_PARALLEL,
    )(x_stack, w, b)


def _conv3x3_bn_idadd_relu(x_stack, w, b, r, *, taps, m_out):
    n = x_stack.shape[0]
    cout = w.shape[-1]
    kern = functools.partial(_conv3x3_bias_idadd_relu_kernel,
                             taps=taps, m_out=m_out)
    extra = [pl.BlockSpec((1, m_out, cout), lambda i: (i, 0, 0))]   # residual
    return pl.pallas_call(
        kern,
        out_shape=jax.ShapeDtypeStruct((n, m_out, cout), jnp.float32),
        grid_spec=_conv_grid_spec(n, x_stack, extra, m_out, cout),
        compiler_params=_PARALLEL,
    )(x_stack, w, b, r)


def _conv3x3_bn_projadd_relu(x_stack, w, b, xs, ws, bs, *, taps, m_out):
    n = x_stack.shape[0]
    cout = w.shape[-1]
    csc = xs.shape[-1]
    kern = functools.partial(_conv3x3_bias_projadd_relu_kernel,
                             taps=taps, m_out=m_out)
    extra = [
        pl.BlockSpec((1, m_out, csc), lambda i: (i, 0, 0)),   # shortcut input
        pl.BlockSpec((csc, cout), lambda i: (0, 0)),          # 1x1 weight
        pl.BlockSpec((1, cout), lambda i: (0, 0)),            # shortcut bias
    ]
    return pl.pallas_call(
        kern,
        out_shape=jax.ShapeDtypeStruct((n, m_out, cout), jnp.float32),
        grid_spec=_conv_grid_spec(n, x_stack, extra, m_out, cout),
        compiler_params=_PARALLEL,
    )(x_stack, w, b, xs, ws, bs)


# ------------------------------ host-side glue ------------------------------ #

def _round_up(v, m):
    return (v + m - 1) // m * m


def _fold_bn(bn):
    gamma, beta, mean, var = bn
    scale = gamma / jnp.sqrt(var + _BN_EPS)
    return scale, beta - mean * scale


def _prep_conv_input(x_nhwc, stride, c_pad):
    """Zero-pad (+ phase-split for stride>1) an NHWC tensor for a 3x3/pad=1
    conv so every tap becomes a contiguous row-shifted window of a flat (L, C)
    matrix (no HBM im2col, no strided in-kernel loads).

    Returns (x_stack, Ho, Wo, Wq, m_out, taps):
      x_stack : (N, stride**2, L, c_pad) bf16
      taps    : 9 static (phase, row_shift) pairs, tap order (ky, kx) row-major
      m_out   : flat output rows computed per image (= Ho * Wq, Wq >= Wo;
                columns [Wo, Wq) are garbage and sliced off afterwards)
    """
    N, H, W, C = x_nhwc.shape
    s = stride
    Ho = (H - 1) // s + 1
    Wo = (W - 1) // s + 1
    q = 2 // s                              # max in-phase tap offset (k=3)
    Wq = Wo + q                             # phase / output-grid width
    rows_p = Ho + q + (1 if q else 0)       # + slack: shifted reads stay in bounds
    bottom = max(0, s * rows_p - (H + 1))
    right = max(0, s * Wq - (W + 1))
    xp = jnp.pad(x_nhwc, ((0, 0), (1, bottom), (1, right), (0, c_pad - C)))
    phases = [xp[:, ry::s, rx::s, :][:, :rows_p, :Wq, :]
              for ry in range(s) for rx in range(s)]
    x_stack = jnp.stack(phases, axis=1).reshape(N, s * s, rows_p * Wq, c_pad)
    taps = tuple(((ky % s) * s + (kx % s), (ky // s) * Wq + (kx // s))
                 for ky in range(3) for kx in range(3))
    return x_stack.astype(jnp.bfloat16), Ho, Wo, Wq, Ho * Wq, taps


def _pack_w3x3(w_oihw, bn_scale, c_in_pad, c_out_pad):
    """(Cout, Cin, 3, 3) -> (9, c_in_pad, c_out_pad) bf16, BN scale folded in."""
    cout, cin, kh, kw = w_oihw.shape
    w = jnp.transpose(w_oihw, (2, 3, 1, 0)).reshape(kh * kw, cin, cout)
    w = w * bn_scale[None, None, :]
    w = jnp.pad(w, ((0, 0), (0, c_in_pad - cin), (0, c_out_pad - cout)))
    return w.astype(jnp.bfloat16)


def _pad_bias(bias, c_out_pad):
    b = jnp.pad(bias, (0, c_out_pad - bias.shape[0]))
    return b.reshape(1, c_out_pad).astype(jnp.float32)


def basic_block_forward(x_nchw, params, stride):
    """Pallas implementation of BasicBlock.forward.  Input/output are NCHW."""
    x = jnp.transpose(x_nchw, (0, 2, 3, 1)).astype(jnp.float32)       # NHWC
    N, H, W, Cin = x.shape
    Cout = params["w1"].shape[0]
    cin_p = _round_up(Cin, 16)        # contraction dim: sublane-friendly
    cout_p = _round_up(Cout, 128)     # output lanes: lane-dense stores

    s1, b1 = _fold_bn(params["bn1"])
    s2, b2 = _fold_bn(params["bn2"])

    # ---- conv1 (3x3, stride) + bn1 + relu -------------------------------- #
    x1, Ho, Wo, Wq1, m1, taps1 = _prep_conv_input(x, stride, cin_p)
    w1 = _pack_w3x3(params["w1"], s1, cin_p, cout_p)
    out1 = _conv3x3_bn_relu(x1, w1, _pad_bias(b1, cout_p),
                            taps=taps1, m_out=m1, out_dtype=jnp.bfloat16)
    # drop the garbage columns; padded output channels are exactly zero
    out1_nhwc = out1.reshape(N, Ho, Wq1, cout_p)[:, :, :Wo, :]

    # ---- conv2 (3x3, stride 1) + bn2, fused with shortcut add + relu ------ #
    x2, _, _, Wq2, m2, taps2 = _prep_conv_input(out1_nhwc, 1, cout_p)
    w2 = _pack_w3x3(params["w2"], s2, cout_p, cout_p)
    b2p = _pad_bias(b2, cout_p)

    if stride != 1 or Cin != Cout:
        # projection shortcut: 1x1 conv (stride) + bn, fused into the kernel
        ssc, bsc = _fold_bn(params["bn_sc"])
        xs = x[:, ::stride, ::stride, :]                              # (N,Ho,Wo,Cin)
        xs = jnp.pad(xs, ((0, 0), (0, 0), (0, Wq2 - Wo), (0, cin_p - Cin)))
        xs = xs.reshape(N, m2, cin_p).astype(jnp.bfloat16)
        wsc = params["w_sc"][:, :, 0, 0].T * ssc[None, :]
        wsc = jnp.pad(wsc, ((0, cin_p - Cin), (0, cout_p - Cout))).astype(jnp.bfloat16)
        out2 = _conv3x3_bn_projadd_relu(x2, w2, b2p, xs, wsc,
                                        _pad_bias(bsc, cout_p),
                                        taps=taps2, m_out=m2)
    else:
        # identity shortcut: plain residual add (kept in f32, no matmul)
        r = jnp.pad(x, ((0, 0), (0, 0), (0, Wq2 - Wo), (0, cout_p - Cout)))
        r = r.reshape(N, m2, cout_p)
        out2 = _conv3x3_bn_idadd_relu(x2, w2, b2p, r, taps=taps2, m_out=m2)

    out = out2.reshape(N, Ho, Wq2, cout_p)[:, :, :Wo, :Cout]
    return jnp.transpose(out, (0, 3, 1, 2))                           # NCHW


# ------------------------------ pure-JAX reference -------------------------- #

def _ref_forward(x, params, stride):
    def conv(a, w, s, pad):
        return jax.lax.conv_general_dilated(
            a, w, (s, s), ((pad, pad), (pad, pad)),
            dimension_numbers=("NCHW", "OIHW", "NCHW"),
            precision=jax.lax.Precision.HIGHEST)

    def bn(a, p):
        gamma, beta, mean, var = p
        sc = gamma / jnp.sqrt(var + _BN_EPS)
        return a * sc[None, :, None, None] + (beta - mean * sc)[None, :, None, None]

    Cin, Cout = params["w1"].shape[1], params["w1"].shape[0]
    out = jax.nn.relu(bn(conv(x, params["w1"], stride, 1), params["bn1"]))
    out = bn(conv(out, params["w2"], 1, 1), params["bn2"])
    if stride != 1 or Cin != Cout:
        sc = bn(conv(x, params["w_sc"], stride, 0), params["bn_sc"])
    else:
        sc = x
    return jax.nn.relu(out + sc)


# ------------------------------------ main ---------------------------------- #

if __name__ == "__main__":
    fwd = jax.jit(basic_block_forward, static_argnums=2)

    def make_params(key, in_planes, out_planes, with_shortcut):
        keys = jax.random.split(key, 6)

        def bn_params(k):
            k1, k2, k3, k4 = jax.random.split(k, 4)
            gamma = (1.0 + 0.1 * jax.random.normal(k1, (out_planes,))).astype(jnp.float32)
            beta = (0.1 * jax.random.normal(k2, (out_planes,))).astype(jnp.float32)
            mean = (0.1 * jax.random.normal(k3, (out_planes,))).astype(jnp.float32)
            var = (jnp.abs(jax.random.normal(k4, (out_planes,))) + 0.5).astype(jnp.float32)
            return (gamma, beta, mean, var)

        params = {
            "w1": 0.1 * jax.random.normal(keys[0], (out_planes, in_planes, 3, 3), jnp.float32),
            "bn1": bn_params(keys[1]),
            "w2": 0.1 * jax.random.normal(keys[2], (out_planes, out_planes, 3, 3), jnp.float32),
            "bn2": bn_params(keys[3]),
        }
        if with_shortcut:
            params["w_sc"] = 0.1 * jax.random.normal(
                keys[4], (out_planes, in_planes, 1, 1), jnp.float32)
            params["bn_sc"] = bn_params(keys[5])
        return params

    def run_case(key, in_planes, out_planes, stride, n=2, h=16, w=16):
        kx, kp = jax.random.split(key)
        with_sc = stride != 1 or in_planes != out_planes
        params = make_params(kp, in_planes, out_planes, with_sc)
        x = jax.random.normal(kx, (n, in_planes, h, w), jnp.float32)
        out = jax.block_until_ready(fwd(x, params, stride))
        ref = _ref_forward(x, params, stride)
        assert out.shape == ref.shape, (out.shape, ref.shape)
        return float(jnp.max(jnp.abs(out - ref)))

    key = jax.random.PRNGKey(0)
    k_id, k_proj = jax.random.split(key)
    err_identity = run_case(k_id, 8, 8, stride=1)      # identity shortcut path
    err_project = run_case(k_proj, 4, 8, stride=2)     # projection shortcut path
    tol = 3e-2   # bf16 operands (f32 accumulation) vs f32 HIGHEST reference
    if err_identity < tol and err_project < tol:
        print("KERNEL_OK")
    else:
        print(f"MISMATCH identity={err_identity:.4g} projection={err_project:.4g}")
</pallas_src>

<mosaic_0001>
module attributes {stable_mosaic.version = 11 : i64} {
  func.func @_conv3x3_bias_relu_kernel(%arg0: i32, %arg1: memref<1x1x342x16xbf16, #tpu.memory_space<vmem>>, %arg2: memref<9x16x128xbf16, #tpu.memory_space<vmem>>, %arg3: memref<1x128xf32, #tpu.memory_space<vmem>>, %arg4: memref<1x288x128xbf16, #tpu.memory_space<vmem>>) attributes {dimension_semantics = [#tpu.dimension_semantics<parallel>], iteration_bounds = array<i64: 2>, scalar_prefetch = 0 : i64, scratch_operands = 0 : i64, tpu.core_type = #tpu.core_type<tc>, window_params = [{transform_indices = @transform_0, window_bounds = array<i64: 1, 1, 342, 16>}, {pipeline_mode = #tpu.pipeline_mode<synchronous>, transform_indices = @transform_1, window_bounds = array<i64: 9, 16, 128>}, {pipeline_mode = #tpu.pipeline_mode<synchronous>, transform_indices = @transform_2, window_bounds = array<i64: 1, 128>}, {transform_indices = @transform_3, window_bounds = array<i64: 1, 288, 128>}]} {
    %cst = arith.constant 0.000000e+00 : f32
    %0 = vector.broadcast %cst : f32 to vector<288x128xf32>
    %c0 = arith.constant 0 : index
    %c0_0 = arith.constant 0 : index
    %c0_1 = arith.constant 0 : index
    %c0_2 = arith.constant 0 : index
    %1 = vector.load %arg1[%c0, %c0_0, %c0_1, %c0_2] : memref<1x1x342x16xbf16, #tpu.memory_space<vmem>>, vector<1x1x288x16xbf16>
    %2 = vector.shape_cast %1 : vector<1x1x288x16xbf16> to vector<288x16xbf16>
    %c0_3 = arith.constant 0 : index
    %c0_4 = arith.constant 0 : index
    %c0_5 = arith.constant 0 : index
    %3 = vector.load %arg2[%c0_3, %c0_4, %c0_5] : memref<9x16x128xbf16, #tpu.memory_space<vmem>>, vector<1x16x128xbf16>
    %4 = vector.shape_cast %3 : vector<1x16x128xbf16> to vector<16x128xbf16>
    %cst_6 = arith.constant dense<0.000000e+00> : vector<288x128xf32>
    %5 = tpu.matmul %2, %4, %cst_6 {dimension_numbers = #tpu.dot_dimension_numbers<[1], [0], [0], [1], [0, 0, 1, 1], [], []>} : vector<288x16xbf16>, vector<16x128xbf16>, vector<288x128xf32> -> vector<288x128xf32>
    %6 = arith.addf %0, %5 : vector<288x128xf32>
    %c0_7 = arith.constant 0 : index
    %c0_8 = arith.constant 0 : index
    %c1 = arith.constant 1 : index
    %c0_9 = arith.constant 0 : index
    %7 = vector.load %arg1[%c0_7, %c0_8, %c1, %c0_9] : memref<1x1x342x16xbf16, #tpu.memory_space<vmem>>, vector<1x1x288x16xbf16>
    %8 = vector.shape_cast %7 : vector<1x1x288x16xbf16> to vector<288x16xbf16>
    %c1_10 = arith.constant 1 : index
    %c0_11 = arith.constant 0 : index
    %c0_12 = arith.constant 0 : index
    %9 = vector.load %arg2[%c1_10, %c0_11, %c0_12] : memref<9x16x128xbf16, #tpu.memory_space<vmem>>, vector<1x16x128xbf16>
    %10 = vector.shape_cast %9 : vector<1x16x128xbf16> to vector<16x128xbf16>
    %cst_13 = arith.constant dense<0.000000e+00> : vector<288x128xf32>
    %11 = tpu.matmul %8, %10, %cst_13 {dimension_numbers = #tpu.dot_dimension_numbers<[1], [0], [0], [1], [0, 0, 1, 1], [], []>} : vector<288x16xbf16>, vector<16x128xbf16>, vector<288x128xf32> -> vector<288x128xf32>
    %12 = arith.addf %6, %11 : vector<288x128xf32>
    %c0_14 = arith.constant 0 : index
    %c0_15 = arith.constant 0 : index
    %c2 = arith.constant 2 : index
    %c0_16 = arith.constant 0 : index
    %13 = vector.load %arg1[%c0_14, %c0_15, %c2, %c0_16] : memref<1x1x342x16xbf16, #tpu.memory_space<vmem>>, vector<1x1x288x16xbf16>
    %14 = vector.shape_cast %13 : vector<1x1x288x16xbf16> to vector<288x16xbf16>
    %c2_17 = arith.constant 2 : index
    %c0_18 = arith.constant 0 : index
    %c0_19 = arith.constant 0 : index
    %15 = vector.load %arg2[%c2_17, %c0_18, %c0_19] : memref<9x16x128xbf16, #tpu.memory_space<vmem>>, vector<1x16x128xbf16>
    %16 = vector.shape_cast %15 : vector<1x16x128xbf16> to vector<16x128xbf16>
    %cst_20 = arith.constant dense<0.000000e+00> : vector<288x128xf32>
    %17 = tpu.matmul %14, %16, %cst_20 {dimension_numbers = #tpu.dot_dimension_numbers<[1], [0], [0], [1], [0, 0, 1, 1], [], []>} : vector<288x16xbf16>, vector<16x128xbf16>, vector<288x128xf32> -> vector<288x128xf32>
    %18 = arith.addf %12, %17 : vector<288x128xf32>
    %c0_21 = arith.constant 0 : index
    %c0_22 = arith.constant 0 : index
    %c18 = arith.constant 18 : index
    %c0_23 = arith.constant 0 : index
    %19 = vector.load %arg1[%c0_21, %c0_22, %c18, %c0_23] : memref<1x1x342x16xbf16, #tpu.memory_space<vmem>>, vector<1x1x288x16xbf16>
    %20 = vector.shape_cast %19 : vector<1x1x288x16xbf16> to vector<288x16xbf16>
    %c3 = arith.constant 3 : index
    %c0_24 = arith.constant 0 : index
    %c0_25 = arith.constant 0 : index
    %21 = vector.load %arg2[%c3, %c0_24, %c0_25] : memref<9x16x128xbf16, #tpu.memory_space<vmem>>, vector<1x16x128xbf16>
    %22 = vector.shape_cast %21 : vector<1x16x128xbf16> to vector<16x128xbf16>
    %cst_26 = arith.constant dense<0.000000e+00> : vector<288x128xf32>
    %23 = tpu.matmul %20, %22, %cst_26 {dimension_numbers = #tpu.dot_dimension_numbers<[1], [0], [0], [1], [0, 0, 1, 1], [], []>} : vector<288x16xbf16>, vector<16x128xbf16>, vector<288x128xf32> -> vector<288x128xf32>
    %24 = arith.addf %18, %23 : vector<288x128xf32>
    %c0_27 = arith.constant 0 : index
    %c0_28 = arith.constant 0 : index
    %c19 = arith.constant 19 : index
    %c0_29 = arith.constant 0 : index
    %25 = vector.load %arg1[%c0_27, %c0_28, %c19, %c0_29] : memref<1x1x342x16xbf16, #tpu.memory_space<vmem>>, vector<1x1x288x16xbf16>
    %26 = vector.shape_cast %25 : vector<1x1x288x16xbf16> to vector<288x16xbf16>
    %c4 = arith.constant 4 : index
    %c0_30 = arith.constant 0 : index
    %c0_31 = arith.constant 0 : index
    %27 = vector.load %arg2[%c4, %c0_30, %c0_31] : memref<9x16x128xbf16, #tpu.memory_space<vmem>>, vector<1x16x128xbf16>
    %28 = vector.shape_cast %27 : vector<1x16x128xbf16> to vector<16x128xbf16>
    %cst_32 = arith.constant dense<0.000000e+00> : vector<288x128xf32>
    %29 = tpu.matmul %26, %28, %cst_32 {dimension_numbers = #tpu.dot_dimension_numbers<[1], [0], [0], [1], [0, 0, 1, 1], [], []>} : vector<288x16xbf16>, vector<16x128xbf16>, vector<288x128xf32> -> vector<288x128xf32>
    %30 = arith.addf %24, %29 : vector<288x128xf32>
    %c0_33 = arith.constant 0 : index
    %c0_34 = arith.constant 0 : index
    %c20 = arith.constant 20 : index
    %c0_35 = arith.constant 0 : index
    %31 = vector.load %arg1[%c0_33, %c0_34, %c20, %c0_35] : memref<1x1x342x16xbf16, #tpu.memory_space<vmem>>, vector<1x1x288x16xbf16>
    %32 = vector.shape_cast %31 : vector<1x1x288x16xbf16> to vector<288x16xbf16>
    %c5 = arith.constant 5 : index
    %c0_36 = arith.constant 0 : index
    %c0_37 = arith.constant 0 : index
    %33 = vector.load %arg2[%c5, %c0_36, %c0_37] : memref<9x16x128xbf16, #tpu.memory_space<vmem>>, vector<1x16x128xbf16>
    %34 = vector.shape_cast %33 : vector<1x16x128xbf16> to vector<16x128xbf16>
    %cst_38 = arith.constant dense<0.000000e+00> : vector<288x128xf32>
    %35 = tpu.matmul %32, %34, %cst_38 {dimension_numbers = #tpu.dot_dimension_numbers<[1], [0], [0], [1], [0, 0, 1, 1], [], []>} : vector<288x16xbf16>, vector<16x128xbf16>, vector<288x128xf32> -> vector<288x128xf32>
    %36 = arith.addf %30, %35 : vector<288x128xf32>
    %c0_39 = arith.constant 0 : index
    %c0_40 = arith.constant 0 : index
    %c36 = arith.constant 36 : index
    %c0_41 = arith.constant 0 : index
    %37 = vector.load %arg1[%c0_39, %c0_40, %c36, %c0_41] : memref<1x1x342x16xbf16, #tpu.memory_space<vmem>>, vector<1x1x288x16xbf16>
    %38 = vector.shape_cast %37 : vector<1x1x288x16xbf16> to vector<288x16xbf16>
    %c6 = arith.constant 6 : index
    %c0_42 = arith.constant 0 : index
    %c0_43 = arith.constant 0 : index
    %39 = vector.load %arg2[%c6, %c0_42, %c0_43] : memref<9x16x128xbf16, #tpu.memory_space<vmem>>, vector<1x16x128xbf16>
    %40 = vector.shape_cast %39 : vector<1x16x128xbf16> to vector<16x128xbf16>
    %cst_44 = arith.constant dense<0.000000e+00> : vector<288x128xf32>
    %41 = tpu.matmul %38, %40, %cst_44 {dimension_numbers = #tpu.dot_dimension_numbers<[1], [0], [0], [1], [0, 0, 1, 1], [], []>} : vector<288x16xbf16>, vector<16x128xbf16>, vector<288x128xf32> -> vector<288x128xf32>
    %42 = arith.addf %36, %41 : vector<288x128xf32>
    %c0_45 = arith.constant 0 : index
    %c0_46 = arith.constant 0 : index
    %c37 = arith.constant 37 : index
    %c0_47 = arith.constant 0 : index
    %43 = vector.load %arg1[%c0_45, %c0_46, %c37, %c0_47] : memref<1x1x342x16xbf16, #tpu.memory_space<vmem>>, vector<1x1x288x16xbf16>
    %44 = vector.shape_cast %43 : vector<1x1x288x16xbf16> to vector<288x16xbf16>
    %c7 = arith.constant 7 : index
    %c0_48 = arith.constant 0 : index
    %c0_49 = arith.constant 0 : index
    %45 = vector.load %arg2[%c7, %c0_48, %c0_49] : memref<9x16x128xbf16, #tpu.memory_space<vmem>>, vector<1x16x128xbf16>
    %46 = vector.shape_cast %45 : vector<1x16x128xbf16> to vector<16x128xbf16>
    %cst_50 = arith.constant dense<0.000000e+00> : vector<288x128xf32>
    %47 = tpu.matmul %44, %46, %cst_50 {dimension_numbers = #tpu.dot_dimension_numbers<[1], [0], [0], [1], [0, 0, 1, 1], [], []>} : vector<288x16xbf16>, vector<16x128xbf16>, vector<288x128xf32> -> vector<288x128xf32>
    %48 = arith.addf %42, %47 : vector<288x128xf32>
    %c0_51 = arith.constant 0 : index
    %c0_52 = arith.constant 0 : index
    %c38 = arith.constant 38 : index
    %c0_53 = arith.constant 0 : index
    %49 = vector.load %arg1[%c0_51, %c0_52, %c38, %c0_53] : memref<1x1x342x16xbf16, #tpu.memory_space<vmem>>, vector<1x1x288x16xbf16>
    %50 = vector.shape_cast %49 : vector<1x1x288x16xbf16> to vector<288x16xbf16>
    %c8 = arith.constant 8 : index
    %c0_54 = arith.constant 0 : index
    %c0_55 = arith.constant 0 : index
    %51 = vector.load %arg2[%c8, %c0_54, %c0_55] : memref<9x16x128xbf16, #tpu.memory_space<vmem>>, vector<1x16x128xbf16>
    %52 = vector.shape_cast %51 : vector<1x16x128xbf16> to vector<16x128xbf16>
    %cst_56 = arith.constant dense<0.000000e+00> : vector<288x128xf32>
    %53 = tpu.matmul %50, %52, %cst_56 {dimension_numbers = #tpu.dot_dimension_numbers<[1], [0], [0], [1], [0, 0, 1, 1], [], []>} : vector<288x16xbf16>, vector<16x128xbf16>, vector<288x128xf32> -> vector<288x128xf32>
    %54 = arith.addf %48, %53 : vector<288x128xf32>
    %c0_57 = arith.constant 0 : index
    %c0_58 = arith.constant 0 : index
    %55 = vector.load %arg3[%c0_57, %c0_58] : memref<1x128xf32, #tpu.memory_space<vmem>>, vector<1x128xf32>
    %56 = vector.broadcast %55 : vector<1x128xf32> to vector<288x128xf32>
    %57 = arith.addf %54, %56 : vector<288x128xf32>
    %cst_59 = arith.constant 0.000000e+00 : f32
    %58 = vector.broadcast %cst_59 : f32 to vector<288x128xf32>
    %59 = arith.maximumf %57, %58 : vector<288x128xf32>
    %60 = arith.truncf %59 : vector<288x128xf32> to vector<288x128xbf16>
    %c0_60 = arith.constant 0 : index
    %c0_61 = arith.constant 0 : index
    %c0_62 = arith.constant 0 : index
    %61 = vector.load %arg4[%c0_60, %c0_61, %c0_62] : memref<1x288x128xbf16, #tpu.memory_space<vmem>>, vector<1x288x128xbf16>
    %62 = vector.shape_cast %61 : vector<1x288x128xbf16> to vector<288x128xbf16>
    %63 = vector.shape_cast %60 : vector<288x128xbf16> to vector<1x288x128xbf16>
    tpu.vector_store %arg4[%c0_60, %c0_61, %c0_62], %63 {strides = array<i32>} : memref<1x288x128xbf16, #tpu.memory_space<vmem>>, vector<1x288x128xbf16>,
    return
  }
  func.func @transform_0(%arg0: i32) -> (i32, i32, i32, i32) {
    %c0_i32 = arith.constant 0 : i32
    %c0_i32_0 = arith.constant 0 : i32
    %c0_i32_1 = arith.constant 0 : i32
    %c0_i32_2 = arith.constant 0 : i32
    return %arg0, %c0_i32, %c0_i32_0, %c0_i32_1 : i32, i32, i32, i32
  }
  func.func @transform_1(%arg0: i32) -> (i32, i32, i32) {
    %c0_i32 = arith.constant 0 : i32
    %c0_i32_0 = arith.constant 0 : i32
    %c0_i32_1 = arith.constant 0 : i32
    %c0_i32_2 = arith.constant 0 : i32
    return %c0_i32, %c0_i32_0, %c0_i32_1 : i32, i32, i32
  }
  func.func @transform_2(%arg0: i32) -> (i32, i32) {
    %c0_i32 = arith.constant 0 : i32
    %c0_i32_0 = arith.constant 0 : i32
    %c0_i32_1 = arith.constant 0 : i32
    return %c0_i32, %c0_i32_0 : i32, i32
  }
  func.func @transform_3(%arg0: i32) -> (i32, i32, i32) {
    %c0_i32 = arith.constant 0 : i32
    %c0_i32_0 = arith.constant 0 : i32
    %c0_i32_1 = arith.constant 0 : i32
    return %arg0, %c0_i32, %c0_i32_0 : i32, i32, i32
  }
}

module attributes {stable_mosaic.version = 11 : i64} {
  func.func @_conv3x3_bias_idadd_relu_kernel(%arg0: i32, %arg1: memref<1x1x342x128xbf16, #tpu.memory_space<vmem>>, %arg2: memref<9x128x128xbf16, #tpu.memory_space<vmem>>, %arg3: memref<1x128xf32, #tpu.memory_space<vmem>>, %arg4: memref<1x288x128xf32, #tpu.memory_space<vmem>>, %arg5: memref<1x288x128xf32, #tpu.memory_space<vmem>>) attributes {dimension_semantics = [#tpu.dimension_semantics<parallel>], iteration_bounds = array<i64: 2>, scalar_prefetch = 0 : i64, scratch_operands = 0 : i64, tpu.core_type = #tpu.core_type<tc>, window_params = [{transform_indices = @transform_0, window_bounds = array<i64: 1, 1, 342, 128>}, {pipeline_mode = #tpu.pipeline_mode<synchronous>, transform_indices = @transform_1, window_bounds = array<i64: 9, 128, 128>}, {pipeline_mode = #tpu.pipeline_mode<synchronous>, transform_indices = @transform_2, window_bounds = array<i64: 1, 128>}, {transform_indices = @transform_3, window_bounds = array<i64: 1, 288, 128>}, {transform_indices = @transform_4, window_bounds = array<i64: 1, 288, 128>}]} {
    %c0 = arith.constant 0 : index
    %c0_0 = arith.constant 0 : index
    %c0_1 = arith.constant 0 : index
    %0 = vector.load %arg4[%c0, %c0_0, %c0_1] : memref<1x288x128xf32, #tpu.memory_space<vmem>>, vector<1x288x128xf32>
    %1 = vector.shape_cast %0 : vector<1x288x128xf32> to vector<288x128xf32>
    %c0_2 = arith.constant 0 : index
    %c0_3 = arith.constant 0 : index
    %2 = vector.load %arg3[%c0_2, %c0_3] : memref<1x128xf32, #tpu.memory_space<vmem>>, vector<1x128xf32>
    %3 = vector.broadcast %2 : vector<1x128xf32> to vector<288x128xf32>
    %4 = arith.addf %1, %3 : vector<288x128xf32>
    %c0_4 = arith.constant 0 : index
    %c0_5 = arith.constant 0 : index
    %c0_6 = arith.constant 0 : index
    %c0_7 = arith.constant 0 : index
    %5 = vector.load %arg1[%c0_4, %c0_5, %c0_6, %c0_7] : memref<1x1x342x128xbf16, #tpu.memory_space<vmem>>, vector<1x1x288x128xbf16>
    %6 = vector.shape_cast %5 : vector<1x1x288x128xbf16> to vector<288x128xbf16>
    %c0_8 = arith.constant 0 : index
    %c0_9 = arith.constant 0 : index
    %c0_10 = arith.constant 0 : index
    %7 = vector.load %arg2[%c0_8, %c0_9, %c0_10] : memref<9x128x128xbf16, #tpu.memory_space<vmem>>, vector<1x128x128xbf16>
    %8 = vector.shape_cast %7 : vector<1x128x128xbf16> to vector<128x128xbf16>
    %cst = arith.constant dense<0.000000e+00> : vector<288x128xf32>
    %9 = tpu.matmul %6, %8, %cst {dimension_numbers = #tpu.dot_dimension_numbers<[1], [0], [0], [1], [0, 0, 1, 1], [], []>} : vector<288x128xbf16>, vector<128x128xbf16>, vector<288x128xf32> -> vector<288x128xf32>
    %10 = arith.addf %4, %9 : vector<288x128xf32>
    %c0_11 = arith.constant 0 : index
    %c0_12 = arith.constant 0 : index
    %c1 = arith.constant 1 : index
    %c0_13 = arith.constant 0 : index
    %11 = vector.load %arg1[%c0_11, %c0_12, %c1, %c0_13] : memref<1x1x342x128xbf16, #tpu.memory_space<vmem>>, vector<1x1x288x128xbf16>
    %12 = vector.shape_cast %11 : vector<1x1x288x128xbf16> to vector<288x128xbf16>
    %c1_14 = arith.constant 1 : index
    %c0_15 = arith.constant 0 : index
    %c0_16 = arith.constant 0 : index
    %13 = vector.load %arg2[%c1_14, %c0_15, %c0_16] : memref<9x128x128xbf16, #tpu.memory_space<vmem>>, vector<1x128x128xbf16>
    %14 = vector.shape_cast %13 : vector<1x128x128xbf16> to vector<128x128xbf16>
    %cst_17 = arith.constant dense<0.000000e+00> : vector<288x128xf32>
    %15 = tpu.matmul %12, %14, %cst_17 {dimension_numbers = #tpu.dot_dimension_numbers<[1], [0], [0], [1], [0, 0, 1, 1], [], []>} : vector<288x128xbf16>, vector<128x128xbf16>, vector<288x128xf32> -> vector<288x128xf32>
    %16 = arith.addf %10, %15 : vector<288x128xf32>
    %c0_18 = arith.constant 0 : index
    %c0_19 = arith.constant 0 : index
    %c2 = arith.constant 2 : index
    %c0_20 = arith.constant 0 : index
    %17 = vector.load %arg1[%c0_18, %c0_19, %c2, %c0_20] : memref<1x1x342x128xbf16, #tpu.memory_space<vmem>>, vector<1x1x288x128xbf16>
    %18 = vector.shape_cast %17 : vector<1x1x288x128xbf16> to vector<288x128xbf16>
    %c2_21 = arith.constant 2 : index
    %c0_22 = arith.constant 0 : index
    %c0_23 = arith.constant 0 : index
    %19 = vector.load %arg2[%c2_21, %c0_22, %c0_23] : memref<9x128x128xbf16, #tpu.memory_space<vmem>>, vector<1x128x128xbf16>
    %20 = vector.shape_cast %19 : vector<1x128x128xbf16> to vector<128x128xbf16>
    %cst_24 = arith.constant dense<0.000000e+00> : vector<288x128xf32>
    %21 = tpu.matmul %18, %20, %cst_24 {dimension_numbers = #tpu.dot_dimension_numbers<[1], [0], [0], [1], [0, 0, 1, 1], [], []>} : vector<288x128xbf16>, vector<128x128xbf16>, vector<288x128xf32> -> vector<288x128xf32>
    %22 = arith.addf %16, %21 : vector<288x128xf32>
    %c0_25 = arith.constant 0 : index
    %c0_26 = arith.constant 0 : index
    %c18 = arith.constant 18 : index
    %c0_27 = arith.constant 0 : index
    %23 = vector.load %arg1[%c0_25, %c0_26, %c18, %c0_27] : memref<1x1x342x128xbf16, #tpu.memory_space<vmem>>, vector<1x1x288x128xbf16>
    %24 = vector.shape_cast %23 : vector<1x1x288x128xbf16> to vector<288x128xbf16>
    %c3 = arith.constant 3 : index
    %c0_28 = arith.constant 0 : index
    %c0_29 = arith.constant 0 : index
    %25 = vector.load %arg2[%c3, %c0_28, %c0_29] : memref<9x128x128xbf16, #tpu.memory_space<vmem>>, vector<1x128x128xbf16>
    %26 = vector.shape_cast %25 : vector<1x128x128xbf16> to vector<128x128xbf16>
    %cst_30 = arith.constant dense<0.000000e+00> : vector<288x128xf32>
    %27 = tpu.matmul %24, %26, %cst_30 {dimension_numbers = #tpu.dot_dimension_numbers<[1], [0], [0], [1], [0, 0, 1, 1], [], []>} : vector<288x128xbf16>, vector<128x128xbf16>, vector<288x128xf32> -> vector<288x128xf32>
    %28 = arith.addf %22, %27 : vector<288x128xf32>
    %c0_31 = arith.constant 0 : index
    %c0_32 = arith.constant 0 : index
    %c19 = arith.constant 19 : index
    %c0_33 = arith.constant 0 : index
    %29 = vector.load %arg1[%c0_31, %c0_32, %c19, %c0_33] : memref<1x1x342x128xbf16, #tpu.memory_space<vmem>>, vector<1x1x288x128xbf16>
    %30 = vector.shape_cast %29 : vector<1x1x288x128xbf16> to vector<288x128xbf16>
    %c4 = arith.constant 4 : index
    %c0_34 = arith.constant 0 : index
    %c0_35 = arith.constant 0 : index
    %31 = vector.load %arg2[%c4, %c0_34, %c0_35] : memref<9x128x128xbf16, #tpu.memory_space<vmem>>, vector<1x128x128xbf16>
    %32 = vector.shape_cast %31 : vector<1x128x128xbf16> to vector<128x128xbf16>
    %cst_36 = arith.constant dense<0.000000e+00> : vector<288x128xf32>
    %33 = tpu.matmul %30, %32, %cst_36 {dimension_numbers = #tpu.dot_dimension_numbers<[1], [0], [0], [1], [0, 0, 1, 1], [], []>} : vector<288x128xbf16>, vector<128x128xbf16>, vector<288x128xf32> -> vector<288x128xf32>
    %34 = arith.addf %28, %33 : vector<288x128xf32>
    %c0_37 = arith.constant 0 : index
    %c0_38 = arith.constant 0 : index
    %c20 = arith.constant 20 : index
    %c0_39 = arith.constant 0 : index
    %35 = vector.load %arg1[%c0_37, %c0_38, %c20, %c0_39] : memref<1x1x342x128xbf16, #tpu.memory_space<vmem>>, vector<1x1x288x128xbf16>
    %36 = vector.shape_cast %35 : vector<1x1x288x128xbf16> to vector<288x128xbf16>
    %c5 = arith.constant 5 : index
    %c0_40 = arith.constant 0 : index
    %c0_41 = arith.constant 0 : index
    %37 = vector.load %arg2[%c5, %c0_40, %c0_41] : memref<9x128x128xbf16, #tpu.memory_space<vmem>>, vector<1x128x128xbf16>
    %38 = vector.shape_cast %37 : vector<1x128x128xbf16> to vector<128x128xbf16>
    %cst_42 = arith.constant dense<0.000000e+00> : vector<288x128xf32>
    %39 = tpu.matmul %36, %38, %cst_42 {dimension_numbers = #tpu.dot_dimension_numbers<[1], [0], [0], [1], [0, 0, 1, 1], [], []>} : vector<288x128xbf16>, vector<128x128xbf16>, vector<288x128xf32> -> vector<288x128xf32>
    %40 = arith.addf %34, %39 : vector<288x128xf32>
    %c0_43 = arith.constant 0 : index
    %c0_44 = arith.constant 0 : index
    %c36 = arith.constant 36 : index
    %c0_45 = arith.constant 0 : index
    %41 = vector.load %arg1[%c0_43, %c0_44, %c36, %c0_45] : memref<1x1x342x128xbf16, #tpu.memory_space<vmem>>, vector<1x1x288x128xbf16>
    %42 = vector.shape_cast %41 : vector<1x1x288x128xbf16> to vector<288x128xbf16>
    %c6 = arith.constant 6 : index
    %c0_46 = arith.constant 0 : index
    %c0_47 = arith.constant 0 : index
    %43 = vector.load %arg2[%c6, %c0_46, %c0_47] : memref<9x128x128xbf16, #tpu.memory_space<vmem>>, vector<1x128x128xbf16>
    %44 = vector.shape_cast %43 : vector<1x128x128xbf16> to vector<128x128xbf16>
    %cst_48 = arith.constant dense<0.000000e+00> : vector<288x128xf32>
    %45 = tpu.matmul %42, %44, %cst_48 {dimension_numbers = #tpu.dot_dimension_numbers<[1], [0], [0], [1], [0, 0, 1, 1], [], []>} : vector<288x128xbf16>, vector<128x128xbf16>, vector<288x128xf32> -> vector<288x128xf32>
    %46 = arith.addf %40, %45 : vector<288x128xf32>
    %c0_49 = arith.constant 0 : index
    %c0_50 = arith.constant 0 : index
    %c37 = arith.constant 37 : index
    %c0_51 = arith.constant 0 : index
    %47 = vector.load %arg1[%c0_49, %c0_50, %c37, %c0_51] : memref<1x1x342x128xbf16, #tpu.memory_space<vmem>>, vector<1x1x288x128xbf16>
    %48 = vector.shape_cast %47 : vector<1x1x288x128xbf16> to vector<288x128xbf16>
    %c7 = arith.constant 7 : index
    %c0_52 = arith.constant 0 : index
    %c0_53 = arith.constant 0 : index
    %49 = vector.load %arg2[%c7, %c0_52, %c0_53] : memref<9x128x128xbf16, #tpu.memory_space<vmem>>, vector<1x128x128xbf16>
    %50 = vector.shape_cast %49 : vector<1x128x128xbf16> to vector<128x128xbf16>
    %cst_54 = arith.constant dense<0.000000e+00> : vector<288x128xf32>
    %51 = tpu.matmul %48, %50, %cst_54 {dimension_numbers = #tpu.dot_dimension_numbers<[1], [0], [0], [1], [0, 0, 1, 1], [], []>} : vector<288x128xbf16>, vector<128x128xbf16>, vector<288x128xf32> -> vector<288x128xf32>
    %52 = arith.addf %46, %51 : vector<288x128xf32>
    %c0_55 = arith.constant 0 : index
    %c0_56 = arith.constant 0 : index
    %c38 = arith.constant 38 : index
    %c0_57 = arith.constant 0 : index
    %53 = vector.load %arg1[%c0_55, %c0_56, %c38, %c0_57] : memref<1x1x342x128xbf16, #tpu.memory_space<vmem>>, vector<1x1x288x128xbf16>
    %54 = vector.shape_cast %53 : vector<1x1x288x128xbf16> to vector<288x128xbf16>
    %c8 = arith.constant 8 : index
    %c0_58 = arith.constant 0 : index
    %c0_59 = arith.constant 0 : index
    %55 = vector.load %arg2[%c8, %c0_58, %c0_59] : memref<9x128x128xbf16, #tpu.memory_space<vmem>>, vector<1x128x128xbf16>
    %56 = vector.shape_cast %55 : vector<1x128x128xbf16> to vector<128x128xbf16>
    %cst_60 = arith.constant dense<0.000000e+00> : vector<288x128xf32>
    %57 = tpu.matmul %54, %56, %cst_60 {dimension_numbers = #tpu.dot_dimension_numbers<[1], [0], [0], [1], [0, 0, 1, 1], [], []>} : vector<288x128xbf16>, vector<128x128xbf16>, vector<288x128xf32> -> vector<288x128xf32>
    %58 = arith.addf %52, %57 : vector<288x128xf32>
    %cst_61 = arith.constant 0.000000e+00 : f32
    %59 = vector.broadcast %cst_61 : f32 to vector<288x128xf32>
    %60 = arith.maximumf %58, %59 : vector<288x128xf32>
    %c0_62 = arith.constant 0 : index
    %c0_63 = arith.constant 0 : index
    %c0_64 = arith.constant 0 : index
    %61 = vector.load %arg5[%c0_62, %c0_63, %c0_64] : memref<1x288x128xf32, #tpu.memory_space<vmem>>, vector<1x288x128xf32>
    %62 = vector.shape_cast %61 : vector<1x288x128xf32> to vector<288x128xf32>
    %63 = vector.shape_cast %60 : vector<288x128xf32> to vector<1x288x128xf32>
    tpu.vector_store %arg5[%c0_62, %c0_63, %c0_64], %63 {strides = array<i32>} : memref<1x288x128xf32, #tpu.memory_space<vmem>>, vector<1x288x128xf32>,
    return
  }
  func.func @transform_0(%arg0: i32) -> (i32, i32, i32, i32) {
    %c0_i32 = arith.constant 0 : i32
    %c0_i32_0 = arith.constant 0 : i32
    %c0_i32_1 = arith.constant 0 : i32
    %c0_i32_2 = arith.constant 0 : i32
    return %arg0, %c0_i32, %c0_i32_0, %c0_i32_1 : i32, i32, i32, i32
  }
  func.func @transform_1(%arg0: i32) -> (i32, i32, i32) {
    %c0_i32 = arith.constant 0 : i32
    %c0_i32_0 = arith.constant 0 : i32
    %c0_i32_1 = arith.constant 0 : i32
    %c0_i32_2 = arith.constant 0 : i32
    return %c0_i32, %c0_i32_0, %c0_i32_1 : i32, i32, i32
  }
  func.func @transform_2(%arg0: i32) -> (i32, i32) {
    %c0_i32 = arith.constant 0 : i32
    %c0_i32_0 = arith.constant 0 : i32
    %c0_i32_1 = arith.constant 0 : i32
    return %c0_i32, %c0_i32_0 : i32, i32
  }
  func.func @transform_3(%arg0: i32) -> (i32, i32, i32) {
    %c0_i32 = arith.constant 0 : i32
    %c0_i32_0 = arith.constant 0 : i32
    %c0_i32_1 = arith.constant 0 : i32
    return %arg0, %c0_i32, %c0_i32_0 : i32, i32, i32
  }
  func.func @transform_4(%arg0: i32) -> (i32, i32, i32) {
    %c0_i32 = arith.constant 0 : i32
    %c0_i32_0 = arith.constant 0 : i32
    %c0_i32_1 = arith.constant 0 : i32
    return %arg0, %c0_i32, %c0_i32_0 : i32, i32, i32
  }
}

</mosaic_0001>

<bundles_post_ra>
// kernel: basic_block_forward.2
= control target key start
LH: loop header
LB: loop body
LE: loop exit
PB: predicated region body
PF: predicated region fallthrough
CT: control target
= control target key end

     0   :  { %s5330_s12 = smov 0   ;;  %s6218_s0 = inlined_call_operand.vmem [shape: bf16[2,1,342,16], index: 0, kind: input, shape index: {}]   ;;  %s6219_s1 = inlined_call_operand.vmem [shape: bf16[9,16,128], index: 1, kind: input, shape index: {}]   ;;  %s6220_s2 = inlined_call_operand.vmem [shape: f32[1,128], index: 2, kind: input, shape index: {}]   ;;  %s6221_s3 = inlined_call_operand.vmem [shape: bf16[2,288,128], index: 3, kind: output, shape index: {}]  }
   0x1 LB: > { %s3969_s13 = sadd.s32 4294967295, %s5308_s12   ;;  %p3973_p0 = scmp.ge.s32.totalorder %s5308_s12, 1  ;;  %s5308_s12 = sphi %s5330_s12, %s13_s12  }
   0x2   : > { %p137_p1 = scmp.lt.s32.totalorder %s5308_s12, 3 }
   0x4   : > { %p138_p2 = pnand %p3973_p0, %p137_p1 }
   0x5   : > { %v5220_v0 = vld [vmem:[%s6219_s1 + $0x20] sm:$0xff] (!%p138_p2)   ;;  %p161_p3 = scmp.lt.s32.totalorder (!%p138_p2), %s3969_s13, 1  ;;  %v5221_v1 = vld [vmem:[%s6219_s1 + $0x8] sm:$0xff] (!%p138_p2)   ;;  %vm307_vm0 = vsmask.f32 (!%p138_p2), 7424  ;;  %vm462_vm1 = vcmask (!%p138_p2), 130048  }
   0x6   : > { %141 = sbr.rel (%p138_p2) target bundleno = 575 (0x23f), region = 32  ;;  %4730 = vmatprep.subr.bf16.mxu0 (!%p138_p2), %v5220_v0  ;;  %v5349_v2 = vld [vmem:[%s6219_s1 + $0x28] sm:$0xff] (!%p138_p2)   ;;  %4578 = vmatprep.subr.bf16.mxu1 (!%p138_p2), %v5221_v1  ;;  %v5230_v3 = vld [vmem:[%s6219_s1] sm:$0xff] (!%p138_p2)   ;;  %vm1681_vm2 = vsmask.f32 (!%p138_p2), 6400  ;;  %v5405_v31 = vld [vmem:[%s6219_s1 + $0x10] sm:$0xff] (!%p138_p2)  }
   0x7   : > { %4731 = vmatpush3.bf16.msra.mxu0 (!%p138_p2), %v5220_v0  ;;  %4579 = vmatpush3.bf16.msra.mxu1 (!%p138_p2), %v5221_v1  ;;  %v5435_v56 = vld [vmem:[%s6219_s1 + $0x30] sm:$0xff] (!%p138_p2)   ;;  %vm2132_vm3 = vcmask (!%p138_p2), 1045504   ;;  %vm920_vm4 = vcmask (!%p138_p2), 1046528   ;;  %vm2893_vm5 = vsmask.f32 (!%p138_p2), 5376  ;;  %vm3344_vm6 = vcmask (!%p138_p2), 1044480  }
   0x8   : > { %4768 = vmatprep.subr.bf16.mxu0 (!%p138_p2), %v5349_v2  ;;  %4616 = vmatprep.subr.bf16.mxu1 (!%p138_p2), %v5230_v3 }
   0xd   : > { %s6223_s13 = smov (!%p161_p3, %s3969_s13), 1 }
   0xe   : > { %s5210_s20 = smul.u32 172, %s6223_s13 }
   0xf   : > { %s5211_s15 = smul.u32 144, %s6223_s13 }
  0x10   : > { %s5359_s25 = scalar_lea.vmem %s6218_s0, %s5210_s20 }
  0x11   : > { %v172_v4 = vld [vmem:[%s5359_s25] sm:$0xf]  ;;  %v5363_v5 = vld [vmem:[%s5359_s25 + $0x4] sm:$0xf]  ;;  %v5369_v7 = vld [vmem:[%s5359_s25 + $0x8] sm:$0xff]   ;;  %s6155_s18 = scalar_lea.vmem %s6221_s3, %s5211_s15 }
  0x12   : > { %v5366_v6 = vcombine.low %v172_v4, %v5363_v5  ;;  %v1231_v8 = vld [vmem:[%s5359_s25 + $0x8] sm:$0xe]  ;;  %v5373_v9 = vld [vmem:[%s5359_s25 + $0xc] sm:$0xf]  ;;  %v316_v12 = vshll.u32 %v5369_v7, 16  ;;  %v320_v13 = vshrl.u32 %v5369_v7, 16 }
  0x13   : > { %v5380_v14 = vld [vmem:[%s5359_s25 + $0x10] sm:$0xff]   ;;  %v5386_v16 = vcombine.low %v1231_v8, %v5373_v9  ;;  %v5394_v24 = vld [vmem:[%s5359_s25 + $0x18] sm:$0xff]   ;;  %v5400_v30 = vld [vmem:[%s5359_s25 + $0x20] sm:$0xff]  }
  0x14   : > { %v309_v10 = vshrl.u32 %v5366_v6, 16  ;;  %v311_v11 = vshll.u32 %v5366_v6, 16  ;;  %v5383_v15 = vld [vmem:[%s5359_s25 + $0x10] sm:$0xff]   ;;  %v318_v18 = vrot.slane %v316_v12, 1  ;;  %v1691_v19 = vshrl.u32 %v5380_v14, 16  ;;  %v5397_v29 = vld [vmem:[%s5359_s25 + $0x18] sm:$0xff]  }
  0x15   : > { %v1694_v20 = vshll.u32 %v5380_v14, 16  ;;  %v1683_v21 = vshrl.u32 %v5386_v16, 16  ;;  %v1686_v22 = vshll.u32 %v5386_v16, 16  ;;  %v324_v23 = vshll.u32 %v5383_v15, 16  ;;  %v5415_v44 = vld [vmem:[%s5359_s25 + $0x20] sm:$0xff]   ;;  %v5418_v45 = vld [vmem:[%s5359_s25 + $0x28] sm:$0xff]  }
  0x16   : > { %v313_v17 = vrot.slane %v311_v11, 1  ;;  %v322_v26 = vor.u32 %v320_v13, %v318_v18  ;;  %v1693_v27 = vrot.slane %v1691_v19, 1  ;;  %v1700_v35 = vshrl.u32 %v5394_v24, 16  ;;  %v5424_v50 = vld [vmem:[%s5359_s25 + $0x28] sm:$0xff]   ;;  %v5430_v55 = vld [vmem:[%s5359_s25 + $0x30] sm:$0xff]  }
  0x17   : > { %v1696_v28 = vrot.slane %v1694_v20, 2  ;;  %v1685_v32 = vrot.slane %v1683_v21, 1  ;;  %v1688_v33 = vrot.slane %v1686_v22, 2  ;;  %v326_v34 = vrot.slane %v324_v23, 1  ;;  %v5440_v61 = vld [vmem:[%s5359_s25 + $0x30] sm:$0xff]  }
  0x18   : > { %v314_v25 = vor.u32 %v313_v17, %v309_v10  ;;  %v1703_v38 = vshll.u32 %v5394_v24, 16  ;;  %v328_v39 = vshrl.u32 %v5383_v15, 16  ;;  %v1702_v42 = vrot.slane %v1700_v35, 1 }
  0x19   : > { %v1697_v37 = vor.u32 %v1696_v28, %v1693_v27  ;;  %v1689_v40 = vor.u32 %v1688_v33, %v1685_v32  ;;  %v327_v41 = vsel %vm307_vm0, %v322_v26, %v326_v34  ;;  %v332_v43 = vshll.u32 %v5397_v29, 16  ;;  %v5462_v28 = vld [vmem:[%s5359_s25 + $0x38] sm:$0xff]  }
  0x1a   : > { %v319_v36 = vsel %vm307_vm0, %v314_v25, %v318_v18  ;;  %v1705_v46 = vrot.slane %v1703_v38, 2  ;;  %v330_v47 = vor.u32 %v328_v39, %v326_v34  ;;  %v1709_v48 = vshrl.u32 %v5400_v30, 16  ;;  %v5453_v18 = vld [vmem:[%s5359_s25 + $0x38] sm:$0xff]   ;;  %v5472_v39 = vld [vmem:[%s5359_s25 + $0x40] sm:$0xff]  }
  0x1b   : > { %4580 = vmatprep.mubr.msk.bf16.mxu1 %vm462_vm1, %v319_v36  ;;  %v1712_v49 = vshll.u32 %v5400_v30, 16  ;;  %v1698_v51 = vsel %vm1681_vm2, %v1689_v40, %v1697_v37  ;;  %v334_v52 = vrot.slane %v332_v43, 1  ;;  %v336_v53 = vshrl.u32 %v5397_v29, 16 }
  0x1c   : > { %4581 = vmatmul.mubr.msk.bf16.vlgmr.msra.gmra.mrb[0].mxu1 %vm462_vm1, %v327_v41  ;;  %v340_v54 = vshll.u32 %v5415_v44, 16  ;;  %4732 = vmatprep.mubr.msk.bf16.mxu0 %vm462_vm1, %v1698_v51  ;;  %v1706_v57 = vor.u32 %v1705_v46, %v1702_v42  ;;  %v1711_v58 = vrot.slane %v1709_v48, 1  ;;  %v1718_v60 = vshrl.u32 %v5418_v45, 16  ;;  %v5477_v46 = vld [vmem:[%s5359_s25 + $0x40] sm:$0xff]  }
  0x1d   : > { %4617 = vmatpush3.bf16.msra.mxu1 %v5230_v3  ;;  %v1714_v59 = vrot.slane %v1712_v49, 2  ;;  %v335_v62 = vsel %vm307_vm0, %v330_v47, %v334_v52  ;;  %v338_v63 = vor.u32 %v336_v53, %v334_v52  ;;  %v1721_v1 = vshll.u32 %v5418_v45, 16 }
  0x1e   : > { %4654 = vmatprep.subr.bf16.mxu1 %v5405_v31  ;;  %v342_v0 = vrot.slane %v340_v54, 1  ;;  %v1707_v3 = vsel %vm1681_vm2, %v1697_v37, %v1706_v57  ;;  %4584 = vmatprep.mubr.msk.bf16.mxu1 %vm462_vm1, %v335_v62  ;;  %v1720_v8 = vrot.slane %v1718_v60, 1  ;;  %v344_v10 = vshrl.u32 %v5415_v44, 16 }
  0x1f   : > { %v1715_v4 = vor.u32 %v1714_v59, %v1711_v58  ;;  %4733 = vmatmul.mubr.msk.bf16.vlgmr.msra.gmra.mrb[0].mxu0 %vm462_vm1, %v1707_v3  ;;  %v1723_v12 = vrot.slane %v1721_v1, 2  ;;  %v348_v13 = vshll.u32 %v5424_v50, 16  ;;  %v1727_v17 = vshrl.u32 %v5430_v55, 16  ;;  %v5485_v58 = vld [vmem:[%s5359_s25 + $0x48] sm:$0xff]  }
  0x20   : > { %v343_v11 = vsel %vm307_vm0, %v338_v63, %v342_v0  ;;  %4769 = vmatpush3.bf16.msra.mxu0 %v5349_v2  ;;  %v346_v20 = vor.u32 %v344_v10, %v342_v0  ;;  %v1730_v21 = vshll.u32 %v5430_v55, 16  ;;  %v352_v22 = vshrl.u32 %v5424_v50, 16  ;;  %v5488_v59 = vld [vmem:[%s5359_s25 + $0x48] sm:$0xff]  }
  0x21   : > { %v1716_v19 = vsel %vm1681_vm2, %v1706_v57, %v1715_v4  ;;  %v1724_v23 = vor.u32 %v1723_v12, %v1720_v8  ;;  %v350_v25 = vrot.slane %v348_v13, 1  ;;  %v1729_v26 = vrot.slane %v1727_v17, 1  ;;  %4806 = vmatprep.subr.bf16.mxu0 %v5435_v56 }
  0x22   : > { %4736 = vmatprep.mubr.msk.bf16.mxu0 %vm462_vm1, %v1716_v19  ;;  %v356_v27 = vshll.u32 %v5440_v61, 16  ;;  %v1732_v2 = vrot.slane %v1730_v21, 2  ;;  %v1736_v32 = vshrl.u32 %v5453_v18, 16  ;;  %v1739_v33 = vshll.u32 %v5453_v18, 16  ;;  %v5505_v19 = vld [vmem:[%s5359_s25 + $0x50] sm:$0xff]  }
  0x23   : > { %v360_v34 = vshrl.u32 %v5440_v61, 16  ;;  %v1725_v35 = vsel %vm1681_vm2, %v1715_v4, %v1724_v23  ;;  %v351_v36 = vsel %vm307_vm0, %v346_v20, %v350_v25  ;;  %v354_v37 = vor.u32 %v352_v22, %v350_v25  ;;  %v5497_v4 = vld [vmem:[%s5359_s25 + $0x50] sm:$0xff]   ;;  %v5510_v22 = vld [vmem:[%s5359_s25 + $0x58] sm:$0xff]  }
  0x24   : > { %4585 = vmatmul.mubr.msk.bf16.gmra.mrb[4].mxu1 %vm462_vm1, %v343_v11  ;;  %v358_v38 = vrot.slane %v356_v27, 1  ;;  %v1733_v40 = vor.u32 %v1732_v2, %v1729_v26  ;;  %v1738_v41 = vrot.slane %v1736_v32, 1  ;;  %v1741_v42 = vrot.slane %v1739_v33, 2 }
  0x25   : > { %4588 = vmatprep.mubr.msk.bf16.mxu1 %vm462_vm1, %v351_v36  ;;  %v364_v43 = vshll.u32 %v5462_v28, 16  ;;  %v1745_v49 = vshrl.u32 %v5472_v39, 16  ;;  %v1748_v51 = vshll.u32 %v5472_v39, 16  ;;  %v368_v57 = vshrl.u32 %v5462_v28, 16 }
  0x26   : > { %v359_v47 = vsel %vm307_vm0, %v354_v37, %v358_v38  ;;  %v362_v48 = vor.u32 %v360_v34, %v358_v38  ;;  %v1734_v52 = vsel %vm1681_vm2, %v1724_v23, %v1733_v40  ;;  %v1742_v53 = vor.u32 %v1741_v42, %v1738_v41 }
  0x27   : > { %v366_v54 = vrot.slane %v364_v43, 1  ;;  %4737 = vmatmul.mubr.msk.bf16.gmra.mrb[4].mxu0 %vm462_vm1, %v1725_v35  ;;  %v1747_v60 = vrot.slane %v1745_v49, 1  ;;  %v1750_v62 = vrot.slane %v1748_v51, 2  ;;  %v372_v63 = vshll.u32 %v5477_v46, 16  ;;  %v5515_v35 = vld [vmem:[%s5359_s25 + $0x58] sm:$0xff]  }
  0x28   : > { %v376_v0 = vshrl.u32 %v5477_v46, 16  ;;  %4740 = vmatprep.mubr.msk.bf16.mxu0 %vm462_vm1, %v1734_v52  ;;  %v1754_v3 = vshrl.u32 %v5485_v58, 16  ;;  %v1757_v10 = vshll.u32 %v5485_v58, 16  ;;  %v380_v11 = vshll.u32 %v5488_v59, 16  ;;  %v2125_v51 = vld [vmem:[%s5359_s25 + $0x8] sm:$0xc] }
  0x29   : > { %v367_v1 = vsel %vm307_vm0, %v362_v48, %v366_v54  ;;  %v1751_v8 = vor.u32 %v1750_v62, %v1747_v60  ;;  %v374_v12 = vrot.slane %v372_v63, 1  ;;  %v1763_v13 = vshrl.u32 %v5497_v4, 16  ;;  %v5529_v52 = vld [vmem:[%s5359_s25 + $0x60] sm:$0xff]  }
  0x2a   : > { %v1766_v17 = vshll.u32 %v5497_v4, 16  ;;  %v1743_v20 = vsel %vm1681_vm2, %v1733_v40, %v1742_v53  ;;  %v370_v21 = vor.u32 %v368_v57, %v366_v54  ;;  %v1756_v23 = vrot.slane %v1754_v3, 1 }
  0x2b   : > { %v1759_v25 = vrot.slane %v1757_v10, 2  ;;  %v378_v26 = vor.u32 %v376_v0, %v374_v12  ;;  %v382_v27 = vrot.slane %v380_v11, 1  ;;  %v1752_v2 = vsel %vm1681_vm2, %v1742_v53, %v1751_v8  ;;  %v5534_v0 = vld [vmem:[%s5359_s25 + $0x68] sm:$0xff]  }
  0x2c   : > { %4589 = vmatmul.mubr.msk.bf16.gmra.mrb[8].mxu1 %vm462_vm1, %v359_v47  ;;  %v1765_v32 = vrot.slane %v1763_v13, 1  ;;  %v1768_v33 = vrot.slane %v1766_v17, 2  ;;  %v388_v34 = vshll.u32 %v5505_v19, 16  ;;  %v375_v36 = vsel %vm307_vm0, %v370_v21, %v374_v12 }
  0x2d   : > { %4592 = vmatprep.mubr.msk.bf16.mxu1 %vm462_vm1, %v367_v1  ;;  %v384_v37 = vshrl.u32 %v5488_v59, 16  ;;  %v1772_v38 = vshrl.u32 %v5510_v22, 16  ;;  %v1775_v40 = vshll.u32 %v5510_v22, 16  ;;  %v1760_v41 = vor.u32 %v1759_v25, %v1756_v23  ;;  %v5551_v25 = vld [vmem:[%s5359_s25 + $0x70] sm:$0xff]  }
  0x2e   : > { %v383_v42 = vsel %vm307_vm0, %v378_v26, %v382_v27  ;;  %v392_v43 = vshrl.u32 %v5505_v19, 16  ;;  %v396_v47 = vshll.u32 %v5515_v35, 16  ;;  %v1769_v48 = vor.u32 %v1768_v33, %v1765_v32  ;;  %v5557_v33 = vld [vmem:[%s5359_s25 + $0x78] sm:$0xff]  }
  0x2f   : > { %4741 = vmatmul.mubr.msk.bf16.gmra.mrb[8].mxu0 %vm462_vm1, %v1743_v20  ;;  %v390_v49 = vrot.slane %v388_v34, 1  ;;  %v386_v53 = vor.u32 %v384_v37, %v382_v27  ;;  %v1774_v54 = vrot.slane %v1772_v38, 1  ;;  %v1777_v57 = vrot.slane %v1775_v40, 2 }
  0x30   : > { %4744 = vmatprep.mubr.msk.bf16.mxu0 %vm462_vm1, %v1752_v2  ;;  %v1761_v60 = vsel %vm1681_vm2, %v1751_v8, %v1760_v41  ;;  %v398_v63 = vrot.slane %v396_v47, 1  ;;  %v1770_v1 = vsel %vm1681_vm2, %v1760_v41, %v1769_v48  ;;  %v4121_v3 = vcombine.low %v2125_v51, %v5373_v9 }
  0x31   : > { %v394_v62 = vor.u32 %v392_v43, %v390_v49  ;;  %v404_v10 = vshll.u32 %v5529_v52, 16  ;;  %v391_v11 = vsel %vm307_vm0, %v386_v53, %v390_v49  ;;  %v400_v12 = vshrl.u32 %v5515_v35, 16 }
  0x32   : > { %v5543_v8 = vor.u32 %v1777_v57, %v1774_v54  ;;  %v408_v17 = vshrl.u32 %v5529_v52, 16  ;;  %v412_v20 = vshll.u32 %v5534_v0, 16  ;;  %v2133_v9 = vrot.slane %v4121_v3, 2  ;;  %v5577_v54 = vld [vmem:[%s5359_s25 + $0x88] sm:$0xff]  }
  0x33   : > { %v399_v13 = vsel %vm307_vm0, %v394_v62, %v398_v63  ;;  %v2134_v21 = vrot.slane %v5380_v14, 2  ;;  %v406_v23 = vrot.slane %v404_v10, 1  ;;  %v402_v26 = vor.u32 %v400_v12, %v398_v63 }
  0x34   : > { %4593 = vmatmul.mubr.msk.bf16.gmra.mrb[12].mxu1 %vm462_vm1, %v375_v36  ;;  %v1779_v27 = vsel %vm1681_vm2, %v1769_v48, %v5543_v8  ;;  %v414_v32 = vrot.slane %v412_v20, 1  ;;  %v420_v14 = vshll.u32 %v5551_v25, 16  ;;  %v2136_v37 = vrot.slane %v5394_v24, 2  ;;  %v5572_v48 = vld [vmem:[%s5359_s25 + $0x80] sm:$0xff]  }
  0x35   : > { %4596 = vmatprep.mubr.msk.bf16.mxu1 %vm462_vm1, %v383_v42  ;;  %v410_v2 = vor.u32 %v408_v17, %v406_v23  ;;  %v2135_v34 = vsel %vm2132_vm3, %v2133_v9, %v2134_v21  ;;  %v407_v36 = vsel %vm307_vm0, %v402_v26, %v406_v23  ;;  %v416_v38 = vshrl.u32 %v5534_v0, 16  ;;  %v5600_v17 = vld [vmem:[%s5359_s25 + $0x90] ss:$0 sps:$4 sm:$0x11]  }
  0x36   : > { %v424_v41 = vshrl.u32 %v5551_v25, 16  ;;  %v428_v42 = vshll.u32 %v5557_v33, 16  ;;  %v2138_v43 = vrot.slane %v5400_v30, 2  ;;  %v422_v47 = vrot.slane %v420_v14, 1  ;;  %v5583_v30 = vld [vmem:[%s6219_s1 + $0x38] sm:$0xff]  }
  0x37   : > { %4745 = vmatmul.mubr.msk.bf16.gmra.mrb[12].mxu0 %vm462_vm1, %v1761_v60  ;;  %v415_v40 = vsel %vm307_vm0, %v410_v2, %v414_v32  ;;  %v418_v24 = vor.u32 %v416_v38, %v414_v32  ;;  %v2137_v49 = vsel %vm2132_vm3, %v2134_v21, %v2136_v37  ;;  %v436_v60 = vshll.u32 %v5572_v48, 16 }
  0x38   : > { %4748 = vmatprep.mubr.msk.bf16.mxu0 %vm462_vm1, %v1770_v1  ;;  %v426_v51 = vor.u32 %v424_v41, %v422_v47  ;;  %v430_v53 = vrot.slane %v428_v42, 1  ;;  %v2139_v57 = vsel %vm2132_vm3, %v2136_v37, %v2138_v43  ;;  %v2140_v63 = vrot.slane %v5418_v45, 2  ;;  %v5627_v42 = vld [vmem:[%s5359_s25 + $0x60] sm:$0xff]  }
  0x39   : > { %v423_v62 = vsel %vm307_vm0, %v418_v24, %v422_v47  ;;  %v432_v1 = vshrl.u32 %v5557_v33, 16  ;;  %v440_v10 = vshrl.u32 %v5572_v48, 16  ;;  %v2142_v12 = vrot.slane %v5430_v55, 2  ;;  %v5650_v24 = vld [vmem:[%s5359_s25 + $0x70] sm:$0xff]  }
  0x3a   : > { %v431_v3 = vsel %vm307_vm0, %v426_v51, %v430_v53  ;;  %v448_v23 = vshrl.u32 %v5577_v54, 16  ;;  %v452_v26 = vshll.u32 %v5600_v17, 16  ;;  %v2146_v32 = vrot.slane %v5472_v39, 2 }
  0x3b   : > { %v434_v45 = vor.u32 %v432_v1, %v430_v53  ;;  %v2143_v21 = vsel %vm2132_vm3, %v2140_v63, %v2142_v12  ;;  %v2150_v39 = vrot.slane %v5497_v4, 2  ;;  %v5635_v4 = vld [vmem:[%s6219_s1 + $0x18] sm:$0xff]   ;;  %v2158_v51 = vrot.slane %v5650_v24, 2 }
  0x3c   : > { %4597 = vmatmul.mubr.msk.bf16.gmra.mrb[16].mxu1 %vm462_vm1, %v391_v11  ;;  %v444_v11 = vshll.u32 %v5577_v54, 16  ;;  %v454_v14 = vrot.slane %v452_v26, 1  ;;  %v5662_v53 = vld [vmem:[%s5359_s25 + $0x78] sm:$0xff]  }
  0x3d   : > { %4600 = vmatprep.mubr.msk.bf16.mxu1 %vm462_vm1, %v399_v13  ;;  %v438_v13 = vrot.slane %v436_v60, 1  ;;  %v5666_v60 = vld [vmem:[%s5359_s25 + $0x80] sm:$0xff]  }
  0x3e   : > { %v446_v9 = vrot.slane %v444_v11, 1  ;;  %v5682_v11 = vld [vmem:[%s5359_s25 + $0x90] sm:$0xff]  }
  0x3f   : > { %4749 = vmatmul.mubr.msk.bf16.gmra.mrb[16].mxu0 %vm462_vm1, %v1779_v27  ;;  %v442_v20 = vor.u32 %v440_v10, %v438_v13  ;;  %v439_v55 = vsel %vm307_vm0, %v434_v45, %v438_v13  ;;  %v2144_v27 = vrot.slane %v5453_v18, 2  ;;  %v2148_v18 = vrot.slane %v5485_v58, 2  ;;  %v2443_v45 = vld [vmem:[%s5359_s25 + $0x10] sm:$0xc] }
  0x40   : > { %4770 = vmatprep.mubr.msk.bf16.mxu0 %vm462_vm1, %v2135_v34  ;;  %v450_v34 = vor.u32 %v448_v23, %v446_v9  ;;  %v2152_v58 = vrot.slane %v5510_v22, 2  ;;  %v5645_v22 = vld [vmem:[%s5359_s25 + $0x68] sm:$0xff]   ;;  %v2166_v13 = vrot.slane %v5682_v11, 2  ;;  %v5705_v23 = vld [vmem:[%s5359_s25 + $0x18] sm:$0xff]  }
  0x41   : > { %v447_v2 = vsel %vm307_vm0, %v442_v20, %v446_v9  ;;  %v2147_v37 = vsel %vm2132_vm3, %v2144_v27, %v2146_v32  ;;  %v2151_v41 = vsel %vm2132_vm3, %v2148_v18, %v2150_v39  ;;  %v5698_v9 = vld [vmem:[%s5359_s25 + $0x98] ss:$0 sps:$4 sm:$0x33]  }
  0x42   : > { %v455_v38 = vsel %vm307_vm0, %v450_v34, %v454_v14  ;;  %v2168_v26 = vrot.slane %v5698_v9, 2  ;;  %v5718_v34 = vld [vmem:[%s5359_s25 + $0x20] sm:$0xff]  }
  0x44   : > { %4601 = vmatmul.mubr.msk.bf16.gmra.mrb[20].mxu1 %vm462_vm1, %v407_v36  ;;  %v2145_v36 = vsel %vm2132_vm3, %v2142_v12, %v2144_v27 }
  0x45   : > { %4604 = vmatprep.mubr.msk.bf16.mxu1 %vm462_vm1, %v415_v40  ;;  %v2149_v40 = vsel %vm2132_vm3, %v2146_v32, %v2148_v18  ;;  %v2169_v32 = vsel %vm2132_vm3, %v2166_v13, %v2168_v26 }
  0x47   : > { %4771 = vmatmul.mubr.msk.bf16.vlgmr.msra.gmra.mrb[0].mxu0 %vm462_vm1, %v2137_v49  ;;  %v2156_v49 = vrot.slane %v5645_v22, 2 }
  0x48   : > { %4807 = vmatpush3.bf16.msra.mxu0 %v5435_v56  ;;  %4774 = vmatprep.mubr.msk.bf16.mxu0 %vm462_vm1, %v2139_v57  ;;  %v2141_v56 = vsel %vm2132_vm3, %v2138_v43, %v2140_v63  ;;  %v2153_v43 = vsel %vm2132_vm3, %v2150_v39, %v2152_v58  ;;  %v2162_v63 = vrot.slane %v5666_v60, 2  ;;  %v5734_v39 = vld [vmem:[%s5359_s25 + $0x30] sm:$0xff]  }
  0x49   : > { %4844 = vmatprep.subr.bf16.mxu0 %v5583_v30  ;;  %v2159_v57 = vsel %vm2132_vm3, %v2156_v49, %v2158_v51 }
  0x4c   : > { %4605 = vmatmul.mubr.msk.bf16.gmra.mrb[24].mxu1 %vm462_vm1, %v423_v62  ;;  %v2160_v62 = vrot.slane %v5662_v53, 2 }
  0x4d   : > { %4608 = vmatprep.mubr.msk.bf16.mxu1 %vm462_vm1, %v431_v3  ;;  %v5678_v3 = vld [vmem:[%s5359_s25 + $0x88] sm:$0xff]  }
  0x4e   : > { %v2161_v1 = vsel %vm2132_vm3, %v2158_v51, %v2160_v62  ;;  %v2163_v10 = vsel %vm2132_vm3, %v2160_v62, %v2162_v63  ;;  %v2164_v12 = vrot.slane %v5678_v3, 2  ;;  %v5761_v51 = vld [vmem:[%s5359_s25 + $0x48] sm:$0xff]  }
  0x4f   : > { %4775 = vmatmul.mubr.msk.bf16.gmra.mrb[4].mxu0 %vm462_vm1, %v2141_v56  ;;  %v5692_v56 = vld [vmem:[%s5359_s25 + $0x14] sm:$0xf] }
  0x50   : > { %4778 = vmatprep.mubr.msk.bf16.mxu0 %vm462_vm1, %v2143_v21  ;;  %v2165_v20 = vsel %vm2132_vm3, %v2162_v63, %v2164_v12  ;;  %v2167_v21 = vsel %vm2132_vm3, %v2164_v12, %v2166_v13  ;;  %v2589_v63 = vrot.slane %v5761_v51, 2  ;;  %v922_v13 = vrot.slane %v5369_v7, 1 }
  0x54   : > { %4609 = vmatmul.mubr.msk.bf16.gmra.mrb[28].mxu1 %vm462_vm1, %v439_v55  ;;  %v5702_v55 = vcombine.low %v2443_v45, %v5692_v56 }
  0x55   : > { %4612 = vmatprep.mubr.msk.bf16.mxu1 %vm462_vm1, %v447_v2  ;;  %v2577_v2 = vrot.slane %v5705_v23, 2 }
  0x56   : > { %v2576_v27 = vrot.slane %v5702_v55, 2 }
  0x57   : > { %4779 = vmatmul.mubr.msk.bf16.gmra.mrb[8].mxu0 %vm462_vm1, %v2145_v36  ;;  %v5722_v36 = vld [vmem:[%s5359_s25 + $0x28] sm:$0xff]  }
  0x58   : > { %4782 = vmatprep.mubr.msk.bf16.mxu0 %vm462_vm1, %v2147_v37  ;;  %v2578_v14 = vsel %vm2132_vm3, %v2576_v27, %v2577_v2  ;;  %v2579_v37 = vrot.slane %v5718_v34, 2 }
  0x5a   : > { %v2580_v18 = vsel %vm2132_vm3, %v2577_v2, %v2579_v37  ;;  %v5793_v2 = vld [vmem:[%s5359_s25 + $0x60] sm:$0xff]  }
  0x5c   : > { %4613 = vmatmul.mubr.msk.bf16.gmra.mrb[32].mxu1 %vm462_vm1, %v455_v38  ;;  %v2581_v38 = vrot.slane %v5722_v36, 2 }
  0x5d   : > { %4618 = vmatprep.mubr.msk.bf16.mxu1 %vm462_vm1, %v5366_v6  ;;  %v2154_v6 = vrot.slane %v5627_v42, 2 }
  0x5f   : > { %4783 = vmatmul.mubr.msk.bf16.gmra.mrb[12].mxu0 %vm462_vm1, %v2149_v40  ;;  %v2155_v47 = vsel %vm2132_vm3, %v2152_v58, %v2154_v6  ;;  %v2582_v40 = vsel %vm2132_vm3, %v2579_v37, %v2581_v38  ;;  %v5743_v58 = vld [vmem:[%s6219_s1 + $0x40] sm:$0xff]   ;;  %v5798_v37 = vld [vmem:[%s5359_s25 + $0x68] sm:$0xff]  }
  0x60   : > { %4786 = vmatprep.mubr.msk.bf16.mxu0 %vm462_vm1, %v2151_v41  ;;  %v5738_v41 = vld [vmem:[%s5359_s25 + $0x38] sm:$0xff]  }
  0x64   : > { %4619 = vmatmul.mubr.msk.bf16.vlgmr.msra.gmra.mrb[0].mxu1 %vm462_vm1, %v5369_v7  ;;  %v924_v7 = vrot.slane %v5383_v15, 1 }
  0x65   : > { %4622 = vmatprep.mubr.msk.bf16.mxu1 %vm462_vm1, %v5383_v15  ;;  %4655 = vmatpush3.bf16.msra.mxu1 %v5405_v31  ;;  %v2157_v31 = vsel %vm2132_vm3, %v2154_v6, %v2156_v49  ;;  %v2583_v6 = vrot.slane %v5734_v39, 2  ;;  %v5757_v49 = vld [vmem:[%s5359_s25 + $0x40] sm:$0xff]   ;;  %v2595_v15 = vrot.slane %v5793_v2, 2 }
  0x66   : > { %4692 = vmatprep.subr.bf16.mxu1 %v5635_v4 }
  0x67   : > { %4787 = vmatmul.mubr.msk.bf16.gmra.mrb[16].mxu0 %vm462_vm1, %v2153_v43  ;;  %v2585_v43 = vrot.slane %v5738_v41, 2 }
  0x68   : > { %4790 = vmatprep.mubr.msk.bf16.mxu0 %vm462_vm1, %v2155_v47  ;;  %v2584_v47 = vsel %vm2132_vm3, %v2581_v38, %v2583_v6  ;;  %v925_v38 = vsel %vm920_vm4, %v922_v13, %v924_v7 }
  0x6c   : > { %4623 = vmatmul.mubr.msk.bf16.gmra.mrb[4].mxu1 %vm462_vm1, %v5397_v29 }
  0x6d   : > { %4626 = vmatprep.mubr.msk.bf16.mxu1 %vm462_vm1, %v5415_v44 }
  0x6f   : > { %4791 = vmatmul.mubr.msk.bf16.gmra.mrb[20].mxu0 %vm462_vm1, %v2157_v31  ;;  %v913_v31 = vld [vmem:[%s5359_s25] sm:$0xe] }
  0x70   : > { %4794 = vmatprep.mubr.msk.bf16.mxu0 %vm462_vm1, %v2159_v57  ;;  %v2587_v57 = vrot.slane %v5757_v49, 2  ;;  %v4037_v62 = vcombine.low %v913_v31, %v5363_v5  ;;  %v5780_v5 = vld [vmem:[%s5359_s25 + $0x58] sm:$0xff]  }
  0x71   : > { %v2593_v26 = vrot.slane %v5780_v5, 2 }
  0x72   : > { %v921_v12 = vrot.slane %v4037_v62, 1  ;;  %v2590_v45 = vsel %vm2132_vm3, %v2587_v57, %v2589_v63 }
  0x74   : > { %4627 = vmatmul.mubr.msk.bf16.gmra.mrb[8].mxu1 %vm462_vm1, %v5424_v50 }
  0x75   : > { %4630 = vmatprep.mubr.msk.bf16.mxu1 %vm462_vm1, %v5440_v61 }
  0x77   : > { %4795 = vmatmul.mubr.msk.bf16.gmra.mrb[24].mxu0 %vm462_vm1, %v2161_v1  ;;  %v2588_v1 = vsel %vm2132_vm3, %v2585_v43, %v2587_v57 }
  0x78   : > { %4798 = vmatprep.mubr.msk.bf16.mxu0 %vm462_vm1, %v2163_v10  ;;  %v5775_v10 = vld [vmem:[%s5359_s25 + $0x50] sm:$0xff]  }
  0x7c   : > { %4631 = vmatmul.mubr.msk.bf16.gmra.mrb[12].mxu1 %vm462_vm1, %v5462_v28 }
  0x7d   : > { %4634 = vmatprep.mubr.msk.bf16.mxu1 %vm462_vm1, %v5477_v46 }
  0x7f   : > { %4799 = vmatmul.mubr.msk.bf16.gmra.mrb[28].mxu0 %vm462_vm1, %v2165_v20  ;;  %v2591_v20 = vrot.slane %v5775_v10, 2 }
  0x80   : > { %4802 = vmatprep.mubr.msk.bf16.mxu0 %vm462_vm1, %v2167_v21  ;;  %v923_v21 = vsel %vm920_vm4, %v921_v12, %v922_v13  ;;  %v5836_v12 = vld [vmem:[%s5359_s25 + $0x80] sm:$0xff]   ;;  %v934_v13 = vrot.slane %v5462_v28, 1  ;;  %v936_v28 = vrot.slane %v5477_v46, 1 }
  0x81   : > { %v2592_v27 = vsel %vm2132_vm3, %v2589_v63, %v2591_v20  ;;  %v932_v63 = vrot.slane %v5440_v61, 1  ;;  %v2603_v61 = vrot.slane %v5836_v12, 2 }
  0x84   : > { %4635 = vmatmul.mubr.msk.bf16.gmra.mrb[16].mxu1 %vm462_vm1, %v5488_v59 }
  0x85   : > { %4638 = vmatprep.mubr.msk.bf16.mxu1 %vm462_vm1, %v5505_v19 }
  0x87   : > { %4803 = vmatmul.mubr.msk.bf16.gmra.mrb[32].mxu0 %vm462_vm1, %v2169_v32  ;;  %v926_v32 = vrot.slane %v5397_v29, 1  ;;  %v928_v29 = vrot.slane %v5415_v44, 1  ;;  %v5823_v44 = vld [vmem:[%s5359_s25 + $0x78] sm:$0xff]  }
  0x88   : > { %4808 = vmatprep.mubr.msk.bf16.mxu0 %vm462_vm1, %v2578_v14  ;;  %v2594_v14 = vsel %vm2132_vm3, %v2591_v20, %v2593_v26  ;;  %v2601_v62 = vrot.slane %v5823_v44, 2  ;;  %v5841_v20 = vld [vmem:[%s5359_s25 + $0x88] sm:$0xff]  }
  0x8c   : > { %4639 = vmatmul.mubr.msk.bf16.gmra.mrb[20].mxu1 %vm462_vm1, %v5515_v35 }
  0x8d   : > { %4642 = vmatprep.mubr.msk.bf16.mxu1 %vm462_vm1, %v5529_v52 }
  0x8f   : > { %4809 = vmatmul.mubr.msk.bf16.vlgmr.msra.gmra.mrb[0].mxu0 %vm462_vm1, %v2580_v18  ;;  %v927_v18 = vsel %vm920_vm4, %v924_v7, %v926_v32  ;;  %v2605_v7 = vrot.slane %v5841_v20, 2 }
  0x90   : > { %4845 = vmatpush3.bf16.msra.mxu0 %v5583_v30  ;;  %4812 = vmatprep.mubr.msk.bf16.mxu0 %vm462_vm1, %v2582_v40  ;;  %v2586_v30 = vsel %vm2132_vm3, %v2583_v6, %v2585_v43  ;;  %v2597_v40 = vrot.slane %v5798_v37, 2  ;;  %v2596_v6 = vsel %vm2132_vm3, %v2593_v26, %v2595_v15  ;;  %v5812_v43 = vld [vmem:[%s5359_s25 + $0x70] sm:$0xff]   ;;  %v935_v26 = vsel %vm920_vm4, %v932_v63, %v934_v13 }
  0x91   : > { %4882 = vmatprep.subr.bf16.mxu0 %v5743_v58 }
  0x92   : > { %v2598_v31 = vsel %vm2132_vm3, %v2595_v15, %v2597_v40  ;;  %v2606_v15 = vsel %vm2132_vm3, %v2603_v61, %v2605_v7 }
  0x94   : > { %4643 = vmatmul.mubr.msk.bf16.gmra.mrb[24].mxu1 %vm462_vm1, %v5534_v0 }
  0x95   : > { %4646 = vmatprep.mubr.msk.bf16.mxu1 %vm462_vm1, %v5551_v25 }
  0x97   : > { %4813 = vmatmul.mubr.msk.bf16.gmra.mrb[4].mxu0 %vm462_vm1, %v2584_v47  ;;  %v930_v47 = vrot.slane %v5424_v50, 1  ;;  %v2599_v50 = vrot.slane %v5812_v43, 2 }
  0x98   : > { %4816 = vmatprep.mubr.msk.bf16.mxu0 %vm462_vm1, %v2586_v30  ;;  %v5818_v30 = vld [vmem:[%s6219_s1 + $0x20] sm:$0xff]  }
  0x99   : > { %v931_v57 = vsel %vm920_vm4, %v928_v29, %v930_v47 }
  0x9c   : > { %4647 = vmatmul.mubr.msk.bf16.gmra.mrb[28].mxu1 %vm462_vm1, %v5557_v33 }
  0x9d   : > { %4650 = vmatprep.mubr.msk.bf16.mxu1 %vm462_vm1, %v5572_v48 }
  0x9f   : > { %4817 = vmatmul.mubr.msk.bf16.gmra.mrb[8].mxu0 %vm462_vm1, %v2588_v1  ;;  %v2600_v1 = vsel %vm2132_vm3, %v2597_v40, %v2599_v50 }
  0xa0   : > { %4820 = vmatprep.mubr.msk.bf16.mxu0 %vm462_vm1, %v2590_v45  ;;  %v2602_v45 = vsel %vm2132_vm3, %v2599_v50, %v2601_v62 }
  0xa4   : > { %4651 = vmatmul.mubr.msk.bf16.gmra.mrb[32].mxu1 %vm462_vm1, %v5577_v54 }
  0xa5   : > { %4656 = vmatprep.mubr.msk.bf16.mxu1 %vm462_vm1, %v923_v21  ;;  %v933_v21 = vsel %vm920_vm4, %v930_v47, %v932_v63  ;;  %v2903_v47 = vshrl.u32 %v5705_v23, 16  ;;  %v942_v63 = vrot.slane %v5515_v35, 1  ;;  %v2921_v35 = vshrl.u32 %v5722_v36, 16 }
  0xa7   : > { %4821 = vmatmul.mubr.msk.bf16.gmra.mrb[12].mxu0 %vm462_vm1, %v2592_v27  ;;  %v2604_v27 = vsel %vm2132_vm3, %v2601_v62, %v2603_v61  ;;  %v5286_v62 = vld [vmem:[%s5359_s25 + $0xa0] ss:$0 sps:$4 sm:$0x33]  }
  0xa8   : > { %4824 = vmatprep.mubr.msk.bf16.mxu0 %vm462_vm1, %v2594_v14  ;;  %v938_v14 = vrot.slane %v5488_v59, 1  ;;  %v2898_v59 = vshll.u32 %v5702_v55, 16  ;;  %v2611_v61 = vrot.slane %v5286_v62, 2 }
  0xaa   : > { %v939_v46 = vsel %vm920_vm4, %v936_v28, %v938_v14 }
  0xac   : > { %4657 = vmatmul.mubr.msk.bf16.vlgmr.msra.gmra.mrb[0].mxu1 %vm462_vm1, %v925_v38  ;;  %v5858_v38 = vld [vmem:[%s5359_s25 + $0x98] sm:$0xff]  }
  0xad   : > { %4660 = vmatprep.mubr.msk.bf16.mxu1 %vm462_vm1, %v927_v18  ;;  %4693 = vmatpush3.bf16.msra.mxu1 %v5635_v4  ;;  %v929_v4 = vsel %vm920_vm4, %v926_v32, %v928_v29  ;;  %v5854_v32 = vld [vmem:[%s5359_s25 + $0x90] sm:$0xff]   ;;  %v937_v18 = vsel %vm920_vm4, %v934_v13, %v936_v28  ;;  %v2609_v29 = vrot.slane %v5858_v38, 2  ;;  %v2900_v13 = vrot.slane %v2898_v59, 3 }
  0xae   : > { %4920 = vmatprep.subr.bf16.mxu1 %v5818_v30  ;;  %v2607_v40 = vrot.slane %v5854_v32, 2 }
  0xaf   : > { %4825 = vmatmul.mubr.msk.bf16.gmra.mrb[16].mxu0 %vm462_vm1, %v2596_v6  ;;  %v2895_v6 = vshrl.u32 %v5702_v55, 16  ;;  %v2905_v55 = vrot.slane %v2903_v47, 2  ;;  %v2923_v47 = vrot.slane %v2921_v35, 2  ;;  %v2951_v35 = vshll.u32 %v5757_v49, 16 }
  0xb0   : > { %4828 = vmatprep.mubr.msk.bf16.mxu0 %vm462_vm1, %v2598_v31  ;;  %v2906_v31 = vshll.u32 %v5705_v23, 16  ;;  %v2608_v50 = vsel %vm2132_vm3, %v2605_v7, %v2607_v40  ;;  %v2915_v7 = vshll.u32 %v5718_v34, 16 }
  0xb4   : > { %4661 = vmatmul.mubr.msk.bf16.gmra.mrb[4].mxu1 %vm462_vm1, %v929_v4  ;;  %v940_v4 = vrot.slane %v5505_v19, 1 }
  0xb5   : > { %4664 = vmatprep.mubr.msk.bf16.mxu1 %vm462_vm1, %v931_v57  ;;  %v2610_v57 = vsel %vm2132_vm3, %v2607_v40, %v2609_v29 }
  0xb6   : > { %v943_v19 = vsel %vm920_vm4, %v940_v4, %v942_v63 }
  0xb7   : > { %4829 = vmatmul.mubr.msk.bf16.gmra.mrb[20].mxu0 %vm462_vm1, %v2600_v1  ;;  %v2897_v1 = vrot.slane %v2895_v6, 2  ;;  %v946_v6 = vrot.slane %v5534_v0, 1  ;;  %v2939_v0 = vshrl.u32 %v5738_v41, 16 }
  0xb8   : > { %4832 = vmatprep.mubr.msk.bf16.mxu0 %vm462_vm1, %v2602_v45  ;;  %v2908_v45 = vrot.slane %v2906_v31, 3 }
  0xb9   : > { %v2901_v28 = vor.u32 %v2900_v13, %v2897_v1  ;;  %v2942_v1 = vshll.u32 %v5738_v41, 16 }
  0xbc   : > { %4665 = vmatmul.mubr.msk.bf16.gmra.mrb[8].mxu1 %vm462_vm1, %v933_v21  ;;  %v941_v21 = vsel %vm920_vm4, %v938_v14, %v940_v4  ;;  %v944_v14 = vrot.slane %v5529_v52, 1  ;;  %v2930_v52 = vshrl.u32 %v5734_v39, 16 }
  0xbd   : > { %4668 = vmatprep.mubr.msk.bf16.mxu1 %vm462_vm1, %v935_v26  ;;  %v2912_v26 = vshrl.u32 %v5718_v34, 16 }
  0xbe   : > { %v945_v4 = vsel %vm920_vm4, %v942_v63, %v944_v14  ;;  %v948_v63 = vrot.slane %v5551_v25, 1 }
  0xbf   : > { %4833 = vmatmul.mubr.msk.bf16.gmra.mrb[24].mxu0 %vm462_vm1, %v2604_v27  ;;  %v2909_v27 = vor.u32 %v2908_v45, %v2905_v55  ;;  %v2914_v40 = vrot.slane %v2912_v26, 2  ;;  %v2932_v55 = vrot.slane %v2930_v52, 2  ;;  %v2944_v26 = vrot.slane %v2942_v1, 3 }
  0xc0   : > { %4836 = vmatprep.mubr.msk.bf16.mxu0 %vm462_vm1, %v2606_v15  ;;  %v2924_v15 = vshll.u32 %v5722_v36, 16  ;;  %v2969_v52 = vshll.u32 %v5775_v10, 16 }
  0xc1   : > { %v2910_v59 = vsel %vm2893_vm5, %v2901_v28, %v2909_v27 }
  0xc2   : > { %v2926_v31 = vrot.slane %v2924_v15, 3  ;;  %v2957_v15 = vshrl.u32 %v5761_v51, 16 }
  0xc4   : > { %4669 = vmatmul.mubr.msk.bf16.gmra.mrb[12].mxu1 %vm462_vm1, %v937_v18  ;;  %v2612_v18 = vsel %vm2132_vm3, %v2609_v29, %v2611_v61  ;;  %v2933_v29 = vshll.u32 %v5734_v39, 16  ;;  %v2927_v62 = vor.u32 %v2926_v31, %v2923_v47  ;;  %v2959_v47 = vrot.slane %v2957_v15, 2  ;;  %v5293_v15 = vld [vmem:[%s5359_s25 + $0x18] sm:$0xff]  }
  0xc5   : > { %4672 = vmatprep.mubr.msk.bf16.mxu1 %vm462_vm1, %v939_v46  ;;  %v2917_v46 = vrot.slane %v2915_v7, 3  ;;  %v949_v7 = vsel %vm920_vm4, %v946_v6, %v948_v63 }
  0xc6   : > { %v2935_v45 = vrot.slane %v2933_v29, 3 }
  0xc7   : > { %4837 = vmatmul.mubr.msk.bf16.gmra.mrb[28].mxu0 %vm462_vm1, %v2608_v50  ;;  %v2918_v50 = vor.u32 %v2917_v46, %v2914_v40  ;;  %v2953_v46 = vrot.slane %v2951_v35, 3  ;;  %v2993_v35 = vshrl.u32 %v5798_v37, 16 }
  0xc8   : > { %4840 = vmatprep.mubr.msk.bf16.mxu0 %vm462_vm1, %v2610_v57  ;;  %v947_v57 = vsel %vm920_vm4, %v944_v14, %v946_v6  ;;  %v2936_v28 = vor.u32 %v2935_v45, %v2932_v55  ;;  %v2960_v14 = vshll.u32 %v5761_v51, 16  ;;  %v954_v6 = vrot.slane %v5577_v54, 1  ;;  %v5292_v45 = vld [vmem:[%s5359_s25 + $0x10] sm:$0xff]  }
  0xc9   : > { %v2919_v13 = vsel %vm2893_vm5, %v2909_v27, %v2918_v50  ;;  %v2928_v61 = vsel %vm2893_vm5, %v2918_v50, %v2927_v62  ;;  %v2948_v27 = vshrl.u32 %v5757_v49, 16  ;;  %v2966_v50 = vshrl.u32 %v5775_v10, 16 }
  0xca   : > { %v2962_v31 = vrot.slane %v2960_v14, 3  ;;  %v2975_v54 = vshrl.u32 %v5780_v5, 16  ;;  %v1364_v55 = vrot.slane %v5386_v16, 1  ;;  %v2987_v16 = vshll.u32 %v5793_v2, 16 }
  0xcb   : > { %v2950_v40 = vrot.slane %v2948_v27, 2  ;;  %v2968_v1 = vrot.slane %v2966_v50, 2  ;;  %v1367_v14 = vrot.slane %v5293_v15, 1 }
  0xcc   : > { %4673 = vmatmul.mubr.msk.bf16.gmra.mrb[16].mxu1 %vm462_vm1, %v941_v21  ;;  %v950_v21 = vrot.slane %v5557_v33, 1  ;;  %v2963_v29 = vor.u32 %v2962_v31, %v2959_v47  ;;  %v2995_v47 = vrot.slane %v2993_v35, 2  ;;  %v3032_v35 = vshll.u32 %v5841_v20, 16 }
  0xcd   : > { %4676 = vmatprep.mubr.msk.bf16.mxu1 %vm462_vm1, %v943_v19  ;;  %v2941_v19 = vrot.slane %v2939_v0, 2  ;;  %v956_v0 = vrot.slane %v5600_v17, 1 }
  0xce   : > { %v951_v25 = vsel %vm920_vm4, %v948_v63, %v950_v21 }
  0xcf   : > { %4841 = vmatmul.mubr.msk.bf16.gmra.mrb[32].mxu0 %vm462_vm1, %v2612_v18  ;;  %v2945_v33 = vor.u32 %v2944_v26, %v2941_v19  ;;  %v2937_v18 = vsel %vm2893_vm5, %v2927_v62, %v2936_v28  ;;  %v2978_v62 = vshll.u32 %v5780_v5, 16  ;;  %v2977_v19 = vrot.slane %v2975_v54, 2 }
  0xd0   : > { %4846 = vmatprep.mubr.msk.bf16.mxu0 %vm462_vm1, %v2910_v59  ;;  %v3011_v54 = vshrl.u32 %v5823_v44, 16 }
  0xd1   : > { %v2946_v59 = vsel %vm2893_vm5, %v2936_v28, %v2945_v33  ;;  %v2980_v26 = vrot.slane %v2978_v62, 3  ;;  %v3014_v62 = vshll.u32 %v5823_v44, 16 }
  0xd3   : > { %v2981_v27 = vor.u32 %v2980_v26, %v2977_v19  ;;  %v3013_v19 = vrot.slane %v3011_v54, 2  ;;  %v3016_v26 = vrot.slane %v3014_v62, 3  ;;  %v3050_v54 = vshll.u32 %v5858_v38, 16  ;;  %v5299_v62 = vld [vmem:[%s5359_s25 + $0x48] sm:$0xff]  }
  0xd4   : > { %4677 = vmatmul.mubr.msk.bf16.gmra.mrb[20].mxu1 %vm462_vm1, %v945_v4 }
  0xd5   : > { %4680 = vmatprep.mubr.msk.bf16.mxu1 %vm462_vm1, %v947_v57 }
  0xd7   : > { %4847 = vmatmul.mubr.msk.bf16.vlgmr.msra.gmra.mrb[0].mxu0 %vm462_vm1, %v2919_v13  ;;  %v2971_v13 = vrot.slane %v2969_v52, 3  ;;  %v3005_v52 = vshll.u32 %v5812_v43, 16 }
  0xd8   : > { %4883 = vmatpush3.bf16.msra.mxu0 %v5743_v58  ;;  %4850 = vmatprep.mubr.msk.bf16.mxu0 %vm462_vm1, %v2928_v61  ;;  %v952_v58 = vrot.slane %v5572_v48, 1  ;;  %v2954_v48 = vor.u32 %v2953_v46, %v2950_v40  ;;  %v2989_v40 = vrot.slane %v2987_v16, 3  ;;  %v5294_v46 = vld [vmem:[%s5359_s25 + $0x20] sm:$0xff]   ;;  %v3017_v16 = vor.u32 %v3016_v26, %v3013_v19 }
  0xd9   : > { %v2972_v17 = vor.u32 %v2971_v13, %v2968_v1  ;;  %v3052_v26 = vrot.slane %v3050_v54, 3  ;;  %v3350_v54 = vrot.slane %v5722_v36, 3  ;;  %v3352_v36 = vrot.slane %v5734_v39, 3 }
  0xda   : > { %v953_v4 = vsel %vm920_vm4, %v950_v21, %v952_v58  ;;  %v955_v57 = vsel %vm920_vm4, %v952_v58, %v954_v6  ;;  %v2955_v63 = vsel %vm2893_vm5, %v2945_v33, %v2954_v48  ;;  %v1365_v21 = vrot.slane %v5292_v45, 1  ;;  %v5296_v45 = vld [vmem:[%s5359_s25 + $0x30] sm:$0xff]  }
  0xdb   : > { %v2964_v61 = vsel %vm2893_vm5, %v2954_v48, %v2963_v29  ;;  %v2996_v33 = vshll.u32 %v5798_v37, 16  ;;  %v2973_v58 = vsel %vm2893_vm5, %v2963_v29, %v2972_v17 }
  0xdc   : > { %4681 = vmatmul.mubr.msk.bf16.gmra.mrb[24].mxu1 %vm462_vm1, %v949_v7  ;;  %v957_v7 = vsel %vm920_vm4, %v954_v6, %v956_v0  ;;  %v1366_v28 = vsel %vm920_vm4, %v1364_v55, %v1365_v21  ;;  %v1369_v6 = vrot.slane %v5294_v46, 1  ;;  %v5295_v0 = vld [vmem:[%s5359_s25 + $0x28] sm:$0xff]   ;;  %v3007_v55 = vrot.slane %v3005_v52, 3 }
  0xdd   : > { %4684 = vmatprep.mubr.msk.bf16.mxu1 %vm462_vm1, %v951_v25  ;;  %v2984_v25 = vshrl.u32 %v5793_v2, 16  ;;  %v2998_v31 = vrot.slane %v2996_v33, 3  ;;  %v1371_v1 = vrot.slane %v5295_v0, 1  ;;  %v5297_v33 = vld [vmem:[%s5359_s25 + $0x38] sm:$0xff]   ;;  %v1379_v0 = vrot.slane %v5299_v62, 1 }
  0xde   : > { %v1370_v48 = vsel %vm920_vm4, %v1367_v14, %v1369_v6  ;;  %v1375_v15 = vrot.slane %v5297_v33, 1  ;;  %v1391_v62 = vrot.slane %v5662_v53, 1 }
  0xdf   : > { %4851 = vmatmul.mubr.msk.bf16.gmra.mrb[4].mxu0 %vm462_vm1, %v2937_v18  ;;  %v2986_v18 = vrot.slane %v2984_v25, 2  ;;  %v2999_v29 = vor.u32 %v2998_v31, %v2995_v47  ;;  %v3023_v25 = vshll.u32 %v5836_v12, 16  ;;  %v3034_v47 = vrot.slane %v3032_v35, 3  ;;  %v5301_v35 = vld [vmem:[%s5359_s25 + $0x58] sm:$0xff]  }
  0xe0   : > { %4854 = vmatprep.mubr.msk.bf16.mxu0 %vm462_vm1, %v2946_v59  ;;  %v2982_v59 = vsel %vm2893_vm5, %v2972_v17, %v2981_v27  ;;  %v1383_v33 = vrot.slane %v5301_v35, 1  ;;  %v1790_v35 = vshrl.u32 %v5645_v22, 16 }
  0xe1   : > { %v2990_v50 = vor.u32 %v2989_v40, %v2986_v18  ;;  %v3025_v18 = vrot.slane %v3023_v25, 3  ;;  %v5298_v40 = vld [vmem:[%s5359_s25 + $0x40] sm:$0xff]  }
  0xe2   : > { %v1377_v46 = vrot.slane %v5298_v40, 1 }
  0xe4   : > { %4685 = vmatmul.mubr.msk.bf16.gmra.mrb[28].mxu1 %vm462_vm1, %v953_v4  ;;  %v1368_v4 = vsel %vm920_vm4, %v1365_v21, %v1367_v14  ;;  %v1373_v21 = vrot.slane %v5296_v45, 1 }
  0xe5   : > { %4688 = vmatprep.mubr.msk.bf16.mxu1 %vm462_vm1, %v955_v57  ;;  %v3002_v57 = vshrl.u32 %v5812_v43, 16 }
  0xe6   : > { %v1376_v31 = vsel %vm920_vm4, %v1373_v21, %v1375_v15 }
  0xe7   : > { %4855 = vmatmul.mubr.msk.bf16.gmra.mrb[8].mxu0 %vm462_vm1, %v2955_v63  ;;  %v2991_v63 = vsel %vm2893_vm5, %v2981_v27, %v2990_v50  ;;  %v3004_v13 = vrot.slane %v3002_v57, 2  ;;  %v3029_v27 = vshrl.u32 %v5841_v20, 16  ;;  %v3041_v57 = vshll.u32 %v5854_v32, 16 }
  0xe8   : > { %4858 = vmatprep.mubr.msk.bf16.mxu0 %vm462_vm1, %v2964_v61  ;;  %v3000_v61 = vsel %vm2893_vm5, %v2990_v50, %v2999_v29  ;;  %v1378_v50 = vsel %vm920_vm4, %v1375_v15, %v1377_v46 }
  0xe9   : > { %v3008_v17 = vor.u32 %v3007_v55, %v3004_v13  ;;  %v3043_v13 = vrot.slane %v3041_v57, 3  ;;  %v5300_v55 = vld [vmem:[%s5359_s25 + $0x50] sm:$0xff]  }
  0xea   : > { %v1381_v45 = vrot.slane %v5300_v55, 1  ;;  %v3354_v55 = vrot.slane %v5738_v41, 3 }
  0xeb   : > { %v3009_v14 = vsel %vm2893_vm5, %v2999_v29, %v3008_v17  ;;  %v3047_v29 = vshrl.u32 %v5858_v38, 16 }
  0xec   : > { %4689 = vmatmul.mubr.msk.bf16.gmra.mrb[32].mxu1 %vm462_vm1, %v957_v7  ;;  %v1372_v7 = vsel %vm920_vm4, %v1369_v6, %v1371_v1  ;;  %v3018_v6 = vsel %vm2893_vm5, %v3008_v17, %v3017_v16  ;;  %v3355_v39 = vsel %vm3344_vm6, %v3352_v36, %v3354_v55 }
  0xed   : > { %4694 = vmatprep.mubr.msk.bf16.mxu1 %vm462_vm1, %v1366_v28  ;;  %v3020_v28 = vshrl.u32 %v5836_v12, 16  ;;  %v3049_v19 = vrot.slane %v3047_v29, 2 }
  0xef   : > { %4859 = vmatmul.mubr.msk.bf16.gmra.mrb[12].mxu0 %vm462_vm1, %v2973_v58  ;;  %v3022_v58 = vrot.slane %v3020_v28, 2 }
  0xf0   : > { %4862 = vmatprep.mubr.msk.bf16.mxu0 %vm462_vm1, %v2982_v59  ;;  %v3031_v59 = vrot.slane %v3029_v27, 2  ;;  %v3337_v27 = vld [vmem:[%s5359_s25 + $0x10] sm:$0x8] }
  0xf2   : > { %v3035_v52 = vor.u32 %v3034_v47, %v3031_v59 }
  0xf4   : > { %4695 = vmatmul.mubr.msk.bf16.vlgmr.msra.gmra.mrb[0].mxu1 %vm462_vm1, %v1368_v4  ;;  %v3026_v4 = vor.u32 %v3025_v18, %v3022_v58  ;;  %v1385_v18 = vrot.slane %v5627_v42, 1 }
  0xf5   : > { %4698 = vmatprep.mubr.msk.bf16.mxu1 %vm462_vm1, %v1370_v48  ;;  %4921 = vmatpush3.bf16.msra.mxu1 %v5818_v30  ;;  %v1374_v30 = vsel %vm920_vm4, %v1371_v1, %v1373_v21  ;;  %v3038_v48 = vshrl.u32 %v5854_v32, 16  ;;  %v5993_v21 = vld [vmem:[%s5359_s25 + $0xa0] ss:$0 sps:$4 sm:$0x77]  }
  0xf6   : > { %v3027_v1 = vsel %vm2893_vm5, %v3017_v16, %v3026_v4  ;;  %v3056_v28 = vshrl.u32 %v5993_v21, 16  ;;  %v3059_v25 = vshll.u32 %v5993_v21, 16  ;;  %v3053_v16 = vor.u32 %v3052_v26, %v3049_v19 }
  0xf7   : > { %4863 = vmatmul.mubr.msk.bf16.gmra.mrb[16].mxu0 %vm462_vm1, %v2991_v63  ;;  %v3040_v63 = vrot.slane %v3038_v48, 2  ;;  %v1386_v47 = vsel %vm920_vm4, %v1383_v33, %v1385_v18  ;;  %v1389_v48 = vrot.slane %v5650_v24, 1  ;;  %v1397_v19 = vrot.slane %v5682_v11, 1 }
  0xf8   : > { %4866 = vmatprep.mubr.msk.bf16.mxu0 %vm462_vm1, %v3000_v61  ;;  %v3036_v61 = vsel %vm2893_vm5, %v3026_v4, %v3035_v52  ;;  %v3061_v58 = vrot.slane %v3059_v25, 3  ;;  %v3346_v4 = vrot.slane %v5705_v23, 3  ;;  %v3348_v23 = vrot.slane %v5718_v34, 3 }
  0xf9   : > { %v3044_v17 = vor.u32 %v3043_v13, %v3040_v63  ;;  %v1392_v34 = vsel %vm920_vm4, %v1389_v48, %v1391_v62  ;;  %v1781_v26 = vshrl.u32 %v5627_v42, 16 }
  0xfa   : > { %v3351_v63 = vsel %vm3344_vm6, %v3348_v23, %v3350_v54 }
  0xfb   : > { %v3045_v15 = vsel %vm2893_vm5, %v3035_v52, %v3044_v17  ;;  %v3054_v40 = vsel %vm2893_vm5, %v3044_v17, %v3053_v16  ;;  %v5290_v17 = vld [vmem:[%s5359_s25 + $0x98] ss:$0 sps:$4 sm:$0x11]   ;;  %v1783_v25 = vrot.slane %v1781_v26, 1 }
  0xfc   : > { %4699 = vmatmul.mubr.msk.bf16.gmra.mrb[4].mxu1 %vm462_vm1, %v1372_v7  ;;  %v1380_v7 = vsel %vm920_vm4, %v1377_v46, %v1379_v0  ;;  %v4205_v46 = vcombine.low %v3337_v27, %v5692_v56  ;;  %v3358_v27 = vrot.slane %v5761_v51, 3 }
  0xfd   : > { %4702 = vmatprep.mubr.msk.bf16.mxu1 %vm462_vm1, %v1374_v30  ;;  %v1382_v30 = vsel %vm920_vm4, %v1379_v0, %v1381_v45  ;;  %v3349_v0 = vsel %vm3344_vm6, %v3346_v4, %v3348_v23 }
  0xff   : > { %4867 = vmatmul.mubr.msk.bf16.gmra.mrb[20].mxu0 %vm462_vm1, %v3009_v14  ;;  %v3058_v14 = vrot.slane %v3056_v28, 2 }
 0x100   : > { %4870 = vmatprep.mubr.msk.bf16.mxu0 %vm462_vm1, %v3018_v6  ;;  %v1384_v6 = vsel %vm920_vm4, %v1381_v45, %v1383_v33  ;;  %v1395_v45 = vrot.slane %v5678_v3, 1  ;;  %v1793_v33 = vshll.u32 %v5645_v22, 16 }
 0x101   : > { %v3062_v59 = vor.u32 %v3061_v58, %v3058_v14  ;;  %v1802_v58 = vshll.u32 %v5650_v24, 16 }
 0x102   : > { %v1398_v28 = vsel %vm920_vm4, %v1395_v45, %v1397_v19 }
 0x103   : > { %v3063_v56 = vsel %vm2893_vm5, %v3053_v16, %v3062_v59 }
 0x104   : > { %4703 = vmatmul.mubr.msk.bf16.gmra.mrb[8].mxu1 %vm462_vm1, %v1376_v31  ;;  %v3345_v31 = vrot.slane %v4205_v46, 3  ;;  %v1795_v46 = vrot.slane %v1793_v33, 2 }
 0x105   : > { %4706 = vmatprep.mubr.msk.bf16.mxu1 %vm462_vm1, %v1378_v50  ;;  %v1387_v50 = vrot.slane %v5645_v22, 1 }
 0x106   : > { %v3347_v57 = vsel %vm3344_vm6, %v3345_v31, %v3346_v4  ;;  %v3362_v31 = vrot.slane %v5780_v5, 3  ;;  %v1808_v4 = vshrl.u32 %v5662_v53, 16 }
 0x107   : > { %4871 = vmatmul.mubr.msk.bf16.gmra.mrb[24].mxu0 %vm462_vm1, %v3027_v1  ;;  %v1388_v52 = vsel %vm920_vm4, %v1385_v18, %v1387_v50  ;;  %v1390_v29 = vsel %vm920_vm4, %v1387_v50, %v1389_v48  ;;  %v1393_v1 = vrot.slane %v5666_v60, 1  ;;  %v1811_v50 = vshll.u32 %v5662_v53, 16 }
 0x108   : > { %4874 = vmatprep.mubr.msk.bf16.mxu0 %vm462_vm1, %v3036_v61  ;;  %v3353_v61 = vsel %vm3344_vm6, %v3350_v54, %v3352_v36 }
 0x109   : > { %v1394_v13 = vsel %vm920_vm4, %v1391_v62, %v1393_v1  ;;  %v1396_v41 = vsel %vm920_vm4, %v1393_v1, %v1395_v45  ;;  %v1813_v23 = vrot.slane %v1811_v50, 2  ;;  %v1826_v1 = vshrl.u32 %v5678_v3, 16 }
 0x10b   : > { %v1828_v45 = vrot.slane %v1826_v1, 1 }
 0x10c   : > { %4707 = vmatmul.mubr.msk.bf16.gmra.mrb[12].mxu1 %vm462_vm1, %v1380_v7  ;;  %v1784_v7 = vshll.u32 %v5627_v42, 16  ;;  %v1399_v42 = vrot.slane %v5290_v17, 1  ;;  %v1847_v17 = vshll.u32 %v5698_v9, 16 }
 0x10d   : > { %4710 = vmatprep.mubr.msk.bf16.mxu1 %vm462_vm1, %v1382_v30  ;;  %v3356_v30 = vrot.slane %v5757_v49, 3  ;;  %v1799_v49 = vshrl.u32 %v5650_v24, 16 }
 0x10e   : > { %v1786_v16 = vrot.slane %v1784_v7, 2  ;;  %v1400_v51 = vsel %vm920_vm4, %v1397_v19, %v1399_v42  ;;  %v3368_v19 = vrot.slane %v5812_v43, 3 }
 0x10f   : > { %4875 = vmatmul.mubr.msk.bf16.gmra.mrb[28].mxu0 %vm462_vm1, %v3045_v15  ;;  %v3357_v15 = vsel %vm3344_vm6, %v3354_v55, %v3356_v30  ;;  %v3359_v18 = vsel %vm3344_vm6, %v3356_v30, %v3358_v27  ;;  %v1801_v59 = vrot.slane %v1799_v49, 1  ;;  %v3378_v49 = vrot.slane %v5858_v38, 3 }
 0x110   : > { %4878 = vmatprep.mubr.msk.bf16.mxu0 %vm462_vm1, %v3054_v40  ;;  %v1787_v14 = vor.u32 %v1786_v16, %v1783_v25  ;;  %v1792_v40 = vrot.slane %v1790_v35, 1  ;;  %v3374_v35 = vrot.slane %v5841_v20, 3 }
 0x112   : > { %v1788_v22 = vsel %vm1681_vm2, %v5543_v8, %v1787_v14  ;;  %v1796_v24 = vor.u32 %v1795_v46, %v1792_v40  ;;  %v1820_v8 = vshll.u32 %v5666_v60, 16 }
 0x114   : > { %4711 = vmatmul.mubr.msk.bf16.gmra.mrb[16].mxu1 %vm462_vm1, %v1384_v6  ;;  %v3360_v6 = vrot.slane %v5775_v10, 3  ;;  %v1817_v10 = vshrl.u32 %v5666_v60, 16  ;;  %v1797_v5 = vsel %vm1681_vm2, %v1787_v14, %v1796_v24  ;;  %v1822_v62 = vrot.slane %v1820_v8, 2 }
 0x115   : > { %4714 = vmatprep.mubr.msk.bf16.mxu1 %vm462_vm1, %v1386_v47  ;;  %v1804_v47 = vrot.slane %v1802_v58, 2 }
 0x116   : > { %v1819_v54 = vrot.slane %v1817_v10, 1 }
 0x117   : > { %4879 = vmatmul.mubr.msk.bf16.gmra.mrb[32].mxu0 %vm462_vm1, %v3063_v56  ;;  %v3361_v56 = vsel %vm3344_vm6, %v3358_v27, %v3360_v6  ;;  %v1805_v48 = vor.u32 %v1804_v47, %v1801_v59  ;;  %v3372_v27 = vrot.slane %v5836_v12, 3  ;;  %v3376_v12 = vrot.slane %v5854_v32, 3 }
 0x118   : > { %4884 = vmatprep.mubr.msk.bf16.mxu0 %vm462_vm1, %v3347_v57  ;;  %v3363_v57 = vsel %vm3344_vm6, %v3360_v6, %v3362_v31  ;;  %v1823_v36 = vor.u32 %v1822_v62, %v1819_v54 }
 0x119   : > { %v1806_v53 = vsel %vm1681_vm2, %v1796_v24, %v1805_v48  ;;  %v3377_v20 = vsel %vm3344_vm6, %v3374_v35, %v3376_v12  ;;  %v3379_v58 = vsel %vm3344_vm6, %v3376_v12, %v3378_v49 }
 0x11c   : > { %4715 = vmatmul.mubr.msk.bf16.gmra.mrb[20].mxu1 %vm462_vm1, %v1388_v52  ;;  %v1810_v52 = vrot.slane %v1808_v4, 1 }
 0x11d   : > { %4718 = vmatprep.mubr.msk.bf16.mxu1 %vm462_vm1, %v1390_v29  ;;  %v3364_v29 = vrot.slane %v5793_v2, 3  ;;  %v1835_v2 = vshrl.u32 %v5682_v11, 16 }
 0x11e   : > { %v1814_v60 = vor.u32 %v1813_v23, %v1810_v52 }
 0x11f   : > { %4885 = vmatmul.mubr.msk.bf16.vlgmr.msra.gmra.mrb[0].mxu0 %vm462_vm1, %v3349_v0  ;;  %v3366_v0 = vrot.slane %v5798_v37, 3  ;;  %v1837_v26 = vrot.slane %v1835_v2, 1 }
 0x120   : > { %4888 = vmatprep.mubr.msk.bf16.mxu0 %vm462_vm1, %v3351_v63  ;;  %v1829_v63 = vshll.u32 %v5678_v3, 16  ;;  %v1815_v37 = vsel %vm1681_vm2, %v1805_v48, %v1814_v60  ;;  %v1824_v3 = vsel %vm1681_vm2, %v1814_v60, %v1823_v36 }
 0x121   : > { %v3367_v55 = vsel %vm3344_vm6, %v3364_v29, %v3366_v0  ;;  %v3369_v30 = vsel %vm3344_vm6, %v3366_v0, %v3368_v19 }
 0x124   : > { %4719 = vmatmul.mubr.msk.bf16.gmra.mrb[24].mxu1 %vm462_vm1, %v1392_v34  ;;  %v3365_v34 = vsel %vm3344_vm6, %v3362_v31, %v3364_v29  ;;  %v6145_v29 = vld [vmem:[%s6220_s2] ss:$0 sm:$0xff] }
 0x125   : > { %4722 = vmatprep.mubr.msk.bf16.mxu1 %vm462_vm1, %v1394_v13  ;;  %v1838_v13 = vshll.u32 %v5682_v11, 16 }
 0x127   : > { %4889 = vmatmul.mubr.msk.bf16.gmra.mrb[4].mxu0 %vm462_vm1, %v3353_v61  ;;  %v1831_v61 = vrot.slane %v1829_v63, 2  ;;  %v1840_v7 = vrot.slane %v1838_v13, 2 }
 0x128   : > { %4892 = vmatprep.mubr.msk.bf16.mxu0 %vm462_vm1, %v3355_v39  ;;  %v3370_v39 = vrot.slane %v5823_v44, 3  ;;  %v1849_v44 = vrot.slane %v1847_v17, 2 }
 0x129   : > { %v1832_v11 = vor.u32 %v1831_v61, %v1828_v45 }
 0x12a   : > { %v3371_v43 = vsel %vm3344_vm6, %v3368_v19, %v3370_v39  ;;  %v3373_v33 = vsel %vm3344_vm6, %v3370_v39, %v3372_v27 }
 0x12b   : > { %v1833_v25 = vsel %vm1681_vm2, %v1823_v36, %v1832_v11 }
 0x12c   : > { %4723 = vmatmul.mubr.msk.bf16.gmra.mrb[28].mxu1 %vm462_vm1, %v1396_v41  ;;  %v1844_v41 = vshrl.u32 %v5698_v9, 16 }
 0x12d   : > { %4726 = vmatprep.mubr.msk.bf16.mxu1 %vm462_vm1, %v1398_v28  ;;  %v1841_v28 = vor.u32 %v1840_v7, %v1837_v26 }
 0x12e   : > { %v1846_v16 = vrot.slane %v1844_v41, 1 }
 0x12f   : > { %4893 = vmatmul.mubr.msk.bf16.gmra.mrb[8].mxu0 %vm462_vm1, %v3357_v15  ;;  %v1842_v42 = vsel %vm1681_vm2, %v1832_v11, %v1841_v28  ;;  %v3375_v15 = vsel %vm3344_vm6, %v3372_v27, %v3374_v35 }
 0x130   : > { %4896 = vmatprep.mubr.msk.bf16.mxu0 %vm462_vm1, %v3359_v18  ;;  %v1850_v9 = vor.u32 %v1849_v44, %v1846_v16  ;;  %v3380_v18 = vrot.slane %v5993_v21, 3 }
 0x132   : > { %v1851_v14 = vsel %vm1681_vm2, %v1841_v28, %v1850_v9 }
 0x134   : > { %4727 = vmatmul.mubr.msk.bf16.gmra.mrb[32].mxu1 %vm462_vm1, %v1400_v51  ;;  %v3381_v51 = vsel %vm3344_vm6, %v3378_v49, %v3380_v18 }
 0x135   : > { %4752 = vmatprep.mubr.msk.bf16.mxu1 %vm462_vm1, %v1788_v22 }
 0x137   : > { %4897 = vmatmul.mubr.msk.bf16.gmra.mrb[12].mxu0 %vm462_vm1, %v3361_v56 }
 0x138   : > { %4900 = vmatprep.mubr.msk.bf16.mxu0 %vm462_vm1, %v3363_v57 }
 0x13c   : > { %4753 = vmatmul.mubr.msk.bf16.vlgmr.msra.gmra.mrb[20].mxu1 %vm462_vm1, %v1797_v5 }
 0x13d   : > { %4756 = vmatprep.mubr.msk.bf16.mxu1 %vm462_vm1, %v1806_v53 }
 0x13f   : > { %4901 = vmatmul.mubr.msk.bf16.gmra.mrb[16].mxu0 %vm462_vm1, %v3365_v34 }
 0x140   : > { %4904 = vmatprep.mubr.msk.bf16.mxu0 %vm462_vm1, %v3367_v55 }
 0x144   : > { %4757 = vmatmul.mubr.msk.bf16.gmra.mrb[24].mxu1 %vm462_vm1, %v1815_v37 }
 0x145   : > { %4760 = vmatprep.mubr.msk.bf16.mxu1 %vm462_vm1, %v1824_v3 }
 0x147   : > { %4905 = vmatmul.mubr.msk.bf16.gmra.mrb[20].mxu0 %vm462_vm1, %v3369_v30 }
 0x148   : > { %4908 = vmatprep.mubr.msk.bf16.mxu0 %vm462_vm1, %v3371_v43 }
 0x14c   : > { %4761 = vmatmul.mubr.msk.bf16.gmra.mrb[28].mxu1 %vm462_vm1, %v1833_v25 }
 0x14d   : > { %4764 = vmatprep.mubr.msk.bf16.mxu1 %vm462_vm1, %v1842_v42 }
 0x14f   : > { %4909 = vmatmul.mubr.msk.bf16.gmra.mrb[24].mxu0 %vm462_vm1, %v3373_v33 }
 0x150   : > { %4912 = vmatprep.mubr.msk.bf16.mxu0 %vm462_vm1, %v3375_v15 }
 0x154   : > { %4765 = vmatmul.mubr.msk.bf16.gmra.mrb[32].mxu1 %vm462_vm1, %v1851_v14 }
 0x157   : > { %4913 = vmatmul.mubr.msk.bf16.gmra.mrb[28].mxu0 %vm462_vm1, %v3377_v20 }
 0x158   : > { %4916 = vmatprep.mubr.msk.bf16.mxu0 %vm462_vm1, %v3379_v58 }
 0x15f   : > { %4917 = vmatmul.mubr.msk.bf16.gmra.mrb[32].mxu0 %vm462_vm1, %v3381_v51 }
 0x1c7   : > { %v4696_v40 = vpop.f32.mrb[0].mxu1 }
 0x1c8   : > { %v1495_v32 = vpop.f32.mrb[1].mxu1 }
 0x1c9   : > { %v4697_v46 = vpop.f32.mrb[2].mxu1 }
 0x1ca   : > { %v1498_v38 = vpop.f32.mrb[3].mxu1 }
 0x1cf   : > { %v4700_v6 = vpop.f32.mrb[4].mxu1 }
 0x1d0   : > { %v1511_v22 = vpop.f32.mrb[5].mxu1 }
 0x1d1   : > { %v4701_v59 = vpop.f32.mrb[6].mxu1 }
 0x1d2   : > { %v1514_v47 = vpop.f32.mrb[7].mxu1 }
 0x1d7   : > { %v4704_v31 = vpop.f32.mrb[8].mxu1 }
 0x1d8   : > { %v1527_v24 = vpop.f32.mrb[9].mxu1 }
 0x1d9   : > { %v4705_v4 = vpop.f32.mrb[10].mxu1 }
 0x1da   : > { %v1530_v50 = vpop.f32.mrb[11].mxu1 }
 0x1df   : > { %v6126_v56 = vpop.f32.mrb[12].mxu1 }
 0x1e0   : > { %v6128_v48 = vpop.f32.mrb[13].mxu1 }
 0x1e1   : > { %v6130_v21 = vpop.f32.mrb[14].mxu1 }
 0x1e2   : > { %v6132_v10 = vpop.f32.mrb[15].mxu1 }
 0x1e7   : > { %v6134_v8 = vpop.f32.mrb[16].mxu1 }
 0x1e8   : > { %v6136_v57 = vpop.f32.mrb[17].mxu1 }
 0x1e9   : > { %v6138_v5 = vpop.f32.mrb[18].mxu1 }
 0x1ea   : > { %v6140_v52 = vpop.f32.mrb[19].mxu1 }
 0x1f2   : > { %v4886_v23 = vpop.f32.mrb[0].mxu0 }
 0x1f3   : > { %v4922_v53 = vadd.f32 %v4886_v23, %v4696_v40  ;;  %v3476_v54 = vpop.f32.mrb[1].mxu0 }
 0x1f4   : > { %v4923_v62 = vadd.f32 %v3476_v54, %v1495_v32  ;;  %v4887_v0 = vpop.f32.mrb[2].mxu0 }
 0x1f5   : > { %v3664_v60 = vadd.f32 %v4922_v53, %v6145_v29  ;;  %v4924_v1 = vadd.f32 %v4887_v0, %v4697_v46  ;;  %v3479_v63 = vpop.f32.mrb[3].mxu0 }
 0x1f6   : > { %v3662_v34 = vadd.f32 %v4923_v62, %v6145_v29  ;;  %v4925_v36 = vadd.f32 %v3479_v63, %v1498_v38 }
 0x1f7   : > { %v3665_v2 = vadd.f32 %v4924_v1, %v6145_v29  ;;  %v3700_v55 = vmax.f32 %v3664_v60, 0.0 }
 0x1f8   : > { %v3663_v13 = vadd.f32 %v4925_v36, %v6145_v29  ;;  %v3698_v45 = vmax.f32 %v3662_v34, 0.0 }
 0x1f9   : > { %v3701_v37 = vmax.f32 %v3665_v2, 0.0 }
 0x1fa   : > { %v3699_v61 = vmax.f32 %v3663_v13, 0.0  ;;  %v4890_v19 = vpop.f32.mrb[4].mxu0 }
 0x1fb   : > { %v4308_v3 = vpack.c.bf16 %v3701_v37, %v3700_v55  ;;  %v4926_v26 = vadd.f32 %v4890_v19, %v4700_v6  ;;  %v3492_v7 = vpop.f32.mrb[5].mxu0 }
 0x1fc   : > { %v4303_v39 = vpack.c.bf16 %v3699_v61, %v3698_v45  ;;  %v4927_v11 = vadd.f32 %v3492_v7, %v1511_v22  ;;  %v4891_v41 = vpop.f32.mrb[6].mxu0 }
 0x1fd   : > { %4390 = vst [vmem:[%s6155_s18 + $0x8] sm:$0xff] %v4308_v3   ;;  %v3668_v17 = vadd.f32 %v4926_v26, %v6145_v29  ;;  %v4928_v30 = vadd.f32 %v4891_v41, %v4701_v59  ;;  %v3495_v28 = vpop.f32.mrb[7].mxu0 }
 0x1fe   : > { %4304 = vst [vmem:[%s6155_s18] sm:$0xff] %v4303_v39   ;;  %v3666_v43 = vadd.f32 %v4927_v11, %v6145_v29  ;;  %v4929_v25 = vadd.f32 %v3495_v28, %v1514_v47 }
 0x1ff   : > { %v3669_v16 = vadd.f32 %v4928_v30, %v6145_v29  ;;  %v3704_v27 = vmax.f32 %v3668_v17, 0.0 }
 0x200   : > { %v3667_v44 = vadd.f32 %v4929_v25, %v6145_v29  ;;  %v3702_v35 = vmax.f32 %v3666_v43, 0.0 }
 0x201   : > { %v3705_v42 = vmax.f32 %v3669_v16, 0.0 }
 0x202   : > { %v3703_v9 = vmax.f32 %v3667_v44, 0.0  ;;  %v4894_v33 = vpop.f32.mrb[8].mxu0 }
 0x203   : > { %v4318_v15 = vpack.c.bf16 %v3705_v42, %v3704_v27  ;;  %v4930_v14 = vadd.f32 %v4894_v33, %v4704_v31  ;;  %v3508_v12 = vpop.f32.mrb[9].mxu0 }
 0x204   : > { %v4313_v49 = vpack.c.bf16 %v3703_v9, %v3702_v35  ;;  %v4931_v20 = vadd.f32 %v3508_v12, %v1527_v24  ;;  %v4895_v58 = vpop.f32.mrb[10].mxu0 }
 0x205   : > { %4392 = vst [vmem:[%s6155_s18 + $0x18] sm:$0xff] %v4318_v15   ;;  %v3672_v18 = vadd.f32 %v4930_v14, %v6145_v29  ;;  %v4932_v51 = vadd.f32 %v4895_v58, %v4705_v4  ;;  %v3511_v40 = vpop.f32.mrb[11].mxu0 }
 0x206   : > { %4391 = vst [vmem:[%s6155_s18 + $0x10] sm:$0xff] %v4313_v49   ;;  %v3670_v32 = vadd.f32 %v4931_v20, %v6145_v29  ;;  %v4933_v46 = vadd.f32 %v3511_v40, %v1530_v50 }
 0x207   : > { %v3673_v38 = vadd.f32 %v4932_v51, %v6145_v29  ;;  %v3708_v22 = vmax.f32 %v3672_v18, 0.0 }
 0x208   : > { %v3671_v6 = vadd.f32 %v4933_v46, %v6145_v29  ;;  %v3706_v47 = vmax.f32 %v3670_v32, 0.0 }
 0x209   : > { %v3709_v59 = vmax.f32 %v3673_v38, 0.0 }
 0x20a   : > { %v3707_v31 = vmax.f32 %v3671_v6, 0.0  ;;  %v4898_v24 = vpop.f32.mrb[12].mxu0 }
 0x20b   : > { %v4328_v23 = vpack.c.bf16 %v3709_v59, %v3708_v22  ;;  %v4934_v53 = vadd.f32 %v4898_v24, %v6126_v56  ;;  %v3524_v4 = vpop.f32.mrb[13].mxu0 }
 0x20c   : > { %v4323_v54 = vpack.c.bf16 %v3707_v31, %v3706_v47  ;;  %v4935_v62 = vadd.f32 %v3524_v4, %v6128_v48  ;;  %v4899_v0 = vpop.f32.mrb[14].mxu0 }
 0x20d   : > { %4394 = vst [vmem:[%s6155_s18 + $0x28] sm:$0xff] %v4328_v23   ;;  %v3676_v50 = vadd.f32 %v4934_v53, %v6145_v29  ;;  %v4936_v60 = vadd.f32 %v4899_v0, %v6130_v21  ;;  %v3527_v1 = vpop.f32.mrb[15].mxu0 }
 0x20e   : > { %4393 = vst [vmem:[%s6155_s18 + $0x20] sm:$0xff] %v4323_v54   ;;  %v3674_v34 = vadd.f32 %v4935_v62, %v6145_v29  ;;  %v4937_v36 = vadd.f32 %v3527_v1, %v6132_v10 }
 0x20f   : > { %v4754_v63 = vpop.f32.mrb[20].mxu1  ;;  %v3677_v56 = vadd.f32 %v4936_v60, %v6145_v29  ;;  %v3712_v37 = vmax.f32 %v3676_v50, 0.0 }
 0x210   : > { %v2026_v2 = vpop.f32.mrb[21].mxu1  ;;  %v3675_v48 = vadd.f32 %v4937_v36, %v6145_v29  ;;  %v3710_v61 = vmax.f32 %v3674_v34, 0.0 }
 0x211   : > { %v4755_v13 = vpop.f32.mrb[22].mxu1  ;;  %v3713_v45 = vmax.f32 %v3677_v56, 0.0 }
 0x212   : > { %v2029_v55 = vpop.f32.mrb[23].mxu1  ;;  %v3711_v21 = vmax.f32 %v3675_v48, 0.0  ;;  %v4902_v19 = vpop.f32.mrb[16].mxu0 }
 0x213   : > { %v4338_v3 = vpack.c.bf16 %v3713_v45, %v3712_v37  ;;  %v4938_v26 = vadd.f32 %v4902_v19, %v6134_v8  ;;  %v3540_v7 = vpop.f32.mrb[17].mxu0 }
 0x214   : > { %v4333_v39 = vpack.c.bf16 %v3711_v21, %v3710_v61  ;;  %v4939_v10 = vadd.f32 %v3540_v7, %v6136_v57  ;;  %v4903_v11 = vpop.f32.mrb[18].mxu0 }
 0x215   : > { %4396 = vst [vmem:[%s6155_s18 + $0x38] sm:$0xff] %v4338_v3   ;;  %v3680_v41 = vadd.f32 %v4938_v26, %v6145_v29  ;;  %v4940_v17 = vadd.f32 %v4903_v11, %v6138_v5  ;;  %v3543_v30 = vpop.f32.mrb[19].mxu0 }
 0x216   : > { %4395 = vst [vmem:[%s6155_s18 + $0x30] sm:$0xff] %v4333_v39   ;;  %v3678_v43 = vadd.f32 %v4939_v10, %v6145_v29  ;;  %v4941_v25 = vadd.f32 %v3543_v30, %v6140_v52 }
 0x217   : > { %v4758_v28 = vpop.f32.mrb[24].mxu1  ;;  %v3681_v8 = vadd.f32 %v4940_v17, %v6145_v29  ;;  %v3716_v42 = vmax.f32 %v3680_v41, 0.0 }
 0x218   : > { %v2042_v16 = vpop.f32.mrb[25].mxu1  ;;  %v3679_v57 = vadd.f32 %v4941_v25, %v6145_v29  ;;  %v3714_v9 = vmax.f32 %v3678_v43, 0.0 }
 0x219   : > { %v4759_v44 = vpop.f32.mrb[26].mxu1  ;;  %v3717_v35 = vmax.f32 %v3681_v8, 0.0 }
 0x21a   : > { %v2045_v27 = vpop.f32.mrb[27].mxu1  ;;  %v3715_v5 = vmax.f32 %v3679_v57, 0.0  ;;  %v4906_v33 = vpop.f32.mrb[20].mxu0 }
 0x21b   : > { %v4348_v15 = vpack.c.bf16 %v3717_v35, %v3716_v42  ;;  %v4942_v14 = vadd.f32 %v4906_v33, %v4754_v63  ;;  %v3556_v12 = vpop.f32.mrb[21].mxu0 }
 0x21c   : > { %v4343_v49 = vpack.c.bf16 %v3715_v5, %v3714_v9  ;;  %v4943_v20 = vadd.f32 %v3556_v12, %v2026_v2  ;;  %v4907_v52 = vpop.f32.mrb[22].mxu0 }
 0x21d   : > { %4398 = vst [vmem:[%s6155_s18 + $0x48] sm:$0xff] %v4348_v15   ;;  %v3684_v58 = vadd.f32 %v4942_v14, %v6145_v29  ;;  %v4944_v18 = vadd.f32 %v4907_v52, %v4755_v13  ;;  %v3559_v51 = vpop.f32.mrb[23].mxu0 }
 0x21e   : > { %4397 = vst [vmem:[%s6155_s18 + $0x40] sm:$0xff] %v4343_v49   ;;  %v3682_v32 = vadd.f32 %v4943_v20, %v6145_v29  ;;  %v4945_v46 = vadd.f32 %v3559_v51, %v2029_v55 }
 0x21f   : > { %v4762_v40 = vpop.f32.mrb[28].mxu1  ;;  %v3685_v6 = vadd.f32 %v4944_v18, %v6145_v29  ;;  %v3720_v31 = vmax.f32 %v3684_v58, 0.0 }
 0x220   : > { %v2058_v38 = vpop.f32.mrb[29].mxu1  ;;  %v3683_v59 = vadd.f32 %v4945_v46, %v6145_v29  ;;  %v3718_v23 = vmax.f32 %v3682_v32, 0.0 }
 0x221   : > { %v4763_v22 = vpop.f32.mrb[30].mxu1  ;;  %v3721_v24 = vmax.f32 %v3685_v6, 0.0 }
 0x222   : > { %v2061_v47 = vpop.f32.mrb[31].mxu1  ;;  %v3719_v53 = vmax.f32 %v3683_v59, 0.0  ;;  %v4910_v4 = vpop.f32.mrb[24].mxu0 }
 0x223   : > { %v4358_v54 = vpack.c.bf16 %v3721_v24, %v3720_v31  ;;  %v4946_v62 = vadd.f32 %v4910_v4, %v4758_v28  ;;  %v3572_v0 = vpop.f32.mrb[25].mxu0 }
 0x224   : > { %v4353_v50 = vpack.c.bf16 %v3719_v53, %v3718_v23  ;;  %v4947_v60 = vadd.f32 %v3572_v0, %v2042_v16  ;;  %v4911_v1 = vpop.f32.mrb[26].mxu0 }
 0x225   : > { %4400 = vst [vmem:[%s6155_s18 + $0x58] sm:$0xff] %v4358_v54   ;;  %v3688_v63 = vadd.f32 %v4946_v62, %v6145_v29  ;;  %v4948_v34 = vadd.f32 %v4911_v1, %v4759_v44  ;;  %v3575_v36 = vpop.f32.mrb[27].mxu0 }
 0x226   : > { %4399 = vst [vmem:[%s6155_s18 + $0x50] sm:$0xff] %v4353_v50   ;;  %v3686_v56 = vadd.f32 %v4947_v60, %v6145_v29  ;;  %v4949_v13 = vadd.f32 %v3575_v36, %v2045_v27 }
 0x227   : > { %v4766_v2 = vpop.f32.mrb[32].mxu1  ;;  %v3689_v55 = vadd.f32 %v4948_v34, %v6145_v29  ;;  %v3724_v21 = vmax.f32 %v3688_v63, 0.0 }
 0x228   : > { %v2074_v48 = vpop.f32.mrb[33].mxu1  ;;  %v3687_v45 = vadd.f32 %v4949_v13, %v6145_v29  ;;  %v3722_v3 = vmax.f32 %v3686_v56, 0.0 }
 0x229   : > { %v4767_v37 = vpop.f32.mrb[34].mxu1  ;;  %v3725_v19 = vmax.f32 %v3689_v55, 0.0 }
 0x22a   : > { %v2077_v61 = vpop.f32.mrb[35].mxu1  ;;  %v3723_v26 = vmax.f32 %v3687_v45, 0.0  ;;  %v4914_v7 = vpop.f32.mrb[28].mxu0 }
 0x22b   : > { %v4368_v39 = vpack.c.bf16 %v3725_v19, %v3724_v21  ;;  %v4950_v10 = vadd.f32 %v4914_v7, %v4762_v40  ;;  %v3588_v11 = vpop.f32.mrb[29].mxu0 }
 0x22c   : > { %v4363_v41 = vpack.c.bf16 %v3723_v26, %v3722_v3  ;;  %v4951_v17 = vadd.f32 %v3588_v11, %v2058_v38  ;;  %v4915_v30 = vpop.f32.mrb[30].mxu0 }
 0x22d   : > { %4402 = vst [vmem:[%s6155_s18 + $0x68] sm:$0xff] %v4368_v39   ;;  %v3692_v28 = vadd.f32 %v4950_v10, %v6145_v29  ;;  %v4952_v43 = vadd.f32 %v4915_v30, %v4763_v22  ;;  %v3591_v25 = vpop.f32.mrb[31].mxu0 }
 0x22e   : > { %4401 = vst [vmem:[%s6155_s18 + $0x60] sm:$0xff] %v4363_v41   ;;  %v3690_v16 = vadd.f32 %v4951_v17, %v6145_v29  ;;  %v4953_v8 = vadd.f32 %v3591_v25, %v2061_v47 }
 0x22f   : > { %v3693_v44 = vadd.f32 %v4952_v43, %v6145_v29  ;;  %v3728_v27 = vmax.f32 %v3692_v28, 0.0 }
 0x230   : > { %v3691_v57 = vadd.f32 %v4953_v8, %v6145_v29  ;;  %v3726_v35 = vmax.f32 %v3690_v16, 0.0 }
 0x231   : > { %v3729_v42 = vmax.f32 %v3693_v44, 0.0 }
 0x232   : > { %v3727_v9 = vmax.f32 %v3691_v57, 0.0  ;;  %v4918_v5 = vpop.f32.mrb[32].mxu0 }
 0x233   : > { %v4378_v33 = vpack.c.bf16 %v3729_v42, %v3728_v27  ;;  %v4954_v15 = vadd.f32 %v4918_v5, %v4766_v2  ;;  %v3604_v14 = vpop.f32.mrb[33].mxu0 }
 0x234   : > { %v4373_v12 = vpack.c.bf16 %v3727_v9, %v3726_v35  ;;  %v4955_v49 = vadd.f32 %v3604_v14, %v2074_v48  ;;  %v4919_v20 = vpop.f32.mrb[34].mxu0 }
 0x235   : > { %4404 = vst [vmem:[%s6155_s18 + $0x78] sm:$0xff] %v4378_v33   ;;  %v3696_v52 = vadd.f32 %v4954_v15, %v6145_v29  ;;  %v4956_v58 = vadd.f32 %v4919_v20, %v4767_v37  ;;  %v3607_v18 = vpop.f32.mrb[35].mxu0 }
 0x236   : > { %4403 = vst [vmem:[%s6155_s18 + $0x70] sm:$0xff] %v4373_v12   ;;  %v3694_v51 = vadd.f32 %v4955_v49, %v6145_v29  ;;  %v4957_v40 = vadd.f32 %v3607_v18, %v2077_v61 }
 0x237   : > { %v3697_v32 = vadd.f32 %v4956_v58, %v6145_v29  ;;  %v3732_v38 = vmax.f32 %v3696_v52, 0.0 }
 0x238   : > { %v3695_v46 = vadd.f32 %v4957_v40, %v6145_v29  ;;  %v3730_v22 = vmax.f32 %v3694_v51, 0.0 }
 0x239   : > { %v3733_v6 = vmax.f32 %v3697_v32, 0.0 }
 0x23a   : > { %v3731_v59 = vmax.f32 %v3695_v46, 0.0 }
 0x23b   : > { %v4388_v47 = vpack.c.bf16 %v3733_v6, %v3732_v38 }
 0x23c   : > { %v4383_v31 = vpack.c.bf16 %v3731_v59, %v3730_v22 }
 0x23d   : > { %4406 = vst [vmem:[%s6155_s18 + $0x88] sm:$0xff] %v4388_v47  }
 0x23e   : > { %4405 = vst [vmem:[%s6155_s18 + $0x80] sm:$0xff] %v4383_v31  }
 0x23f PF: > { %s13_s12 = sadd.s32 1, %s5308_s12  }
 0x240   : > { %p10_p4 = scmp.ge.s32.totalorder %s13_s12, 4  }
 0x242   :  { %12 = sbr.rel (!%p10_p4) target bundleno = 1 (0x1), region = 70 }

// kernel: basic_block_forward.3
= control target key start
LH: loop header
LB: loop body
LE: loop exit
PB: predicated region body
PF: predicated region fallthrough
CT: control target
= control target key end

     0   :  { %s5872_s15 = smov 0   ;;  %s6940_s0 = inlined_call_operand.vmem [shape: bf16[2,1,342,128], index: 0, kind: input, shape index: {}]   ;;  %s6941_s1 = inlined_call_operand.vmem [shape: bf16[9,128,128], index: 1, kind: input, shape index: {}]   ;;  %s6942_s2 = inlined_call_operand.vmem [shape: f32[1,128], index: 2, kind: input, shape index: {}]   ;;  %s6943_s3 = inlined_call_operand.vmem [shape: f32[2,288,128], index: 3, kind: input, shape index: {}]   ;;  %s6944_s4 = inlined_call_operand.vmem [shape: f32[2,288,128], index: 4, kind: output, shape index: {}]  }
   0x1 LB: > { %s4315_s16 = sadd.s32 4294967295, %s5845_s15   ;;  %p4319_p0 = scmp.ge.s32.totalorder %s5845_s15, 1  ;;  %s5845_s15 = sphi %s5872_s15, %s14_s15  }
   0x2   : > { %p172_p1 = scmp.lt.s32.totalorder %s5845_s15, 3 }
   0x4   : > { %p173_p2 = pnand %p4319_p0, %p172_p1 }
   0x5   : > { %v5658_v0 = vld [vmem:[%s6941_s1] sm:$0xff] (!%p173_p2)   ;;  %v5660_v2 = vld [vmem:[%s6941_s1 + $0x8] sm:$0xff] (!%p173_p2)   ;;  %p203_p3 = scmp.lt.s32.totalorder (!%p173_p2), %s4315_s16, 1  ;;  %v5662_v4 = vld [vmem:[%s6941_s1 + $0x10] sm:$0xff] (!%p173_p2)   ;;  %vm2116_vm0 = vsmask.f32 (!%p173_p2), 6400 }
   0x6   : > { %176 = sbr.rel (%p173_p2) target bundleno = 580 (0x244), region = 36  ;;  %v5659_v1 = vld [vmem:[%s6941_s1 + $0x100] sm:$0xff] (!%p173_p2)   ;;  %4840 = vmatprep.subr.bf16.mxu1 (!%p173_p2), %v5658_v0  ;;  %v5661_v3 = vld [vmem:[%s6941_s1 + $0x108] sm:$0xff] (!%p173_p2)   ;;  %v5663_v5 = vld [vmem:[%s6941_s1 + $0x110] sm:$0xff] (!%p173_p2)   ;;  %vm2587_vm1 = vcmask (!%p173_p2), 1045504   ;;  %vm1315_vm2 = vcmask (!%p173_p2), 1046528  }
   0x7   : > { %5048 = vmatprep.subr.bf16.mxu0 (!%p173_p2), %v5659_v1  ;;  %4841 = vmatpush3.bf16.msra.mxu1 (!%p173_p2), %v5658_v0  ;;  %v5664_v6 = vld [vmem:[%s6941_s1 + $0x18] sm:$0xff] (!%p173_p2)   ;;  %v5666_v8 = vld [vmem:[%s6941_s1 + $0x20] sm:$0xff] (!%p173_p2)   ;;  %v5668_v10 = vld [vmem:[%s6941_s1 + $0x28] sm:$0xff] (!%p173_p2)   ;;  %vm866_vm3 = vsmask.f32 (!%p173_p2), 7424  ;;  %vm3859_vm5 = vcmask (!%p173_p2), 1044480  }
   0x8   : > { %5049 = vmatpush3.bf16.msra.mxu0 (!%p173_p2), %v5659_v1  ;;  %4842 = vmatprep.subr.bf16.mxu1 (!%p173_p2), %v5660_v2  ;;  %v5665_v7 = vld [vmem:[%s6941_s1 + $0x118] sm:$0xff] (!%p173_p2)   ;;  %v5667_v9 = vld [vmem:[%s6941_s1 + $0x120] sm:$0xff] (!%p173_p2)   ;;  %v5669_v11 = vld [vmem:[%s6941_s1 + $0x128] sm:$0xff] (!%p173_p2)   ;;  %vm3388_vm4 = vsmask.f32 (!%p173_p2), 5376 }
   0x9   : > { %5050 = vmatprep.subr.bf16.mxu0 (!%p173_p2), %v5661_v3  ;;  %v5670_v15 = vld [vmem:[%s6941_s1 + $0x30] sm:$0xff] (!%p173_p2)   ;;  %v5672_v28 = vld [vmem:[%s6941_s1 + $0x38] sm:$0xff] (!%p173_p2)   ;;  %v5678_v35 = vld [vmem:[%s6941_s1 + $0x40] sm:$0xff] (!%p173_p2)  }
   0xa   : > { %v5671_v18 = vld [vmem:[%s6941_s1 + $0x130] sm:$0xff] (!%p173_p2)   ;;  %v5673_v29 = vld [vmem:[%s6941_s1 + $0x138] sm:$0xff] (!%p173_p2)   ;;  %v5680_v40 = vld [vmem:[%s6941_s1 + $0x140] sm:$0xff] (!%p173_p2)  }
   0xb   : > { %4843 = vmatpush3.bf16.msra.mxu1 (!%p173_p2), %v5660_v2  ;;  %v5681_v48 = vld [vmem:[%s6941_s1 + $0x148] sm:$0xff] (!%p173_p2)   ;;  %v5686_v63 = vld [vmem:[%s6941_s1 + $0x150] sm:$0xff] (!%p173_p2)  }
   0xc   : > { %5051 = vmatpush3.bf16.msra.mxu0 (!%p173_p2), %v5661_v3  ;;  %4844 = vmatprep.subr.bf16.mxu1 (!%p173_p2), %v5662_v4  ;;  %v5687_v57 = vld [vmem:[%s6941_s1 + $0x48] sm:$0xff] (!%p173_p2)   ;;  %v5694_v2 = vld [vmem:[%s6941_s1 + $0x50] sm:$0xff] (!%p173_p2)  }
   0xd   : > { %s6946_s16 = smov (!%p203_p3, %s4315_s16), 1  ;;  %5052 = vmatprep.subr.bf16.mxu0 %v5663_v5 }
   0xe   : > { %s5648_s7 = smul.u32 172, %s6946_s16 }
   0xf   : > { %4845 = vmatpush3.bf16.msra.mxu1 %v5662_v4 }
  0x10   : > { %5053 = vmatpush3.bf16.msra.mxu0 %v5663_v5  ;;  %4846 = vmatprep.subr.bf16.mxu1 %v5664_v6  ;;  %s5919_s18 = scalar_lea.vmem %s6940_s0, %s5648_s7 }
  0x11   : > { %5054 = vmatprep.subr.bf16.mxu0 %v5665_v7  ;;  %v5674_v12 = vld [vmem:[%s5919_s18] sm:$0xff]   ;;  %v1632_v13 = vld [vmem:[%s5919_s18 + $0x8] sm:$0xe]  ;;  %v5927_v14 = vld [vmem:[%s5919_s18 + $0xc] sm:$0xf] }
  0x12   : > { %4856 = vmatprep.mubr.bf16.mxu1 %v5674_v12  ;;  %v5933_v16 = vcombine.low %v1632_v13, %v5927_v14  ;;  %v5936_v17 = vld [vmem:[%s5919_s18 + $0x10] sm:$0xff]   ;;  %v5946_v27 = vld [vmem:[%s5919_s18 + $0x18] sm:$0xff]   ;;  %v5961_v38 = vld [vmem:[%s5919_s18 + $0x20] sm:$0xff]  }
  0x13   : > { %4847 = vmatpush3.bf16.msra.mxu1 %v5664_v6  ;;  %v2126_v21 = vshrl.u32 %v5936_v17, 16  ;;  %v2129_v22 = vshll.u32 %v5936_v17, 16  ;;  %v2135_v32 = vshrl.u32 %v5946_v27, 16  ;;  %v2138_v33 = vshll.u32 %v5946_v27, 16  ;;  %v5969_v43 = vld [vmem:[%s5919_s18 + $0x28] sm:$0xff]   ;;  %v5682_v51 = vld [vmem:[%s5919_s18 + $0x10] sm:$0xff]  }
  0x14   : > { %5055 = vmatpush3.bf16.msra.mxu0 %v5665_v7  ;;  %4848 = vmatprep.subr.bf16.mxu1 %v5666_v8  ;;  %v2118_v19 = vshrl.u32 %v5933_v16, 16  ;;  %v2121_v20 = vshll.u32 %v5933_v16, 16  ;;  %v2144_v41 = vshrl.u32 %v5961_v38, 16  ;;  %v2147_v42 = vshll.u32 %v5961_v38, 16  ;;  %v5677_v44 = vld [vmem:[%s5919_s18 + $0x8] sm:$0xff]   ;;  %v5980_v55 = vld [vmem:[%s5919_s18 + $0x30] sm:$0xff]  }
  0x15   : > { %5056 = vmatprep.subr.bf16.mxu0 %v5667_v9  ;;  %v2128_v25 = vrot.slane %v2126_v21, 1  ;;  %v2131_v26 = vrot.slane %v2129_v22, 2  ;;  %v2137_v36 = vrot.slane %v2135_v32, 1  ;;  %v2140_v37 = vrot.slane %v2138_v33, 2  ;;  %v5684_v60 = vld [vmem:[%s5919_s18 + $0x18] sm:$0xff]   ;;  %v5689_v5 = vld [vmem:[%s5919_s18 + $0x20] sm:$0xff]  }
  0x16   : > { %v2120_v23 = vrot.slane %v2118_v19, 1  ;;  %v2123_v24 = vrot.slane %v2121_v20, 2  ;;  %v2146_v45 = vrot.slane %v2144_v41, 1  ;;  %v2149_v46 = vrot.slane %v2147_v42, 2  ;;  %v5990_v62 = vld [vmem:[%s5919_s18 + $0x38] sm:$0xff]   ;;  %v5691_v19 = vld [vmem:[%s5919_s18 + $0x28] sm:$0xff]  }
  0x17   : > { %4849 = vmatpush3.bf16.msra.mxu1 %v5666_v8  ;;  %v2132_v31 = vor.u32 %v2131_v26, %v2128_v25  ;;  %v2141_v39 = vor.u32 %v2140_v37, %v2137_v36  ;;  %v2153_v47 = vshrl.u32 %v5969_v43, 16  ;;  %v2156_v49 = vshll.u32 %v5969_v43, 16  ;;  %v5688_v8 = vld [vmem:[%s6941_s1 + $0x158] sm:$0xff]   ;;  %v5693_v21 = vld [vmem:[%s6941_s1 + $0x160] sm:$0xff]   ;;  %v2566_v33 = vld [vmem:[%s5919_s18 + $0x8] sm:$0xc] }
  0x18   : > { %5057 = vmatpush3.bf16.msra.mxu0 %v5667_v9  ;;  %4850 = vmatprep.subr.bf16.mxu1 %v5668_v10  ;;  %v2124_v30 = vor.u32 %v2123_v24, %v2120_v23  ;;  %v2150_v52 = vor.u32 %v2149_v46, %v2146_v45  ;;  %v2162_v58 = vshrl.u32 %v5980_v55, 16  ;;  %v2165_v59 = vshll.u32 %v5980_v55, 16  ;;  %v5701_v26 = vld [vmem:[%s6941_s1 + $0x58] sm:$0xff]   ;;  %v5706_v37 = vld [vmem:[%s6941_s1 + $0x60] sm:$0xff]  }
  0x19   : > { %5058 = vmatprep.subr.bf16.mxu0 %v5669_v11  ;;  %v2142_v50 = vsel %vm2116_vm0, %v2132_v31, %v2141_v39  ;;  %v2155_v53 = vrot.slane %v2153_v47, 1  ;;  %v2158_v54 = vrot.slane %v2156_v49, 2  ;;  %v2171_v3 = vshrl.u32 %v5990_v62, 16  ;;  %v5703_v45 = vld [vmem:[%s5919_s18 + $0x40] sm:$0xff]   ;;  %v5705_v49 = vld [vmem:[%s5919_s18 + $0x48] sm:$0xff]  }
  0x1a   : > { %v2133_v34 = vsel %vm2116_vm0, %v2124_v30, %v2132_v31  ;;  %v2151_v56 = vsel %vm2116_vm0, %v2141_v39, %v2150_v52  ;;  %v2164_v0 = vrot.slane %v2162_v58, 1  ;;  %v2167_v1 = vrot.slane %v2165_v59, 2  ;;  %v5698_v39 = vld [vmem:[%s5919_s18 + $0x38] sm:$0xff]   ;;  %v5717_v59 = vld [vmem:[%s6941_s1 + $0x190] sm:$0xff]  }
  0x1b   : > { %4851 = vmatpush3.bf16.msra.mxu1 %v5668_v10  ;;  %5064 = vmatprep.mubr.bf16.mxu0 %v2133_v34  ;;  %v2159_v61 = vor.u32 %v2158_v54, %v2155_v53  ;;  %v2174_v4 = vshll.u32 %v5990_v62, 16  ;;  %v2173_v9 = vrot.slane %v2171_v3, 1  ;;  %v5695_v34 = vld [vmem:[%s6941_s1 + $0x168] sm:$0xff]   ;;  %v4502_v36 = vcombine.low %v2566_v33, %v5927_v14  ;;  %v5700_v14 = vld [vmem:[%s6941_s1 + $0x170] sm:$0xff]   ;;  %v5719_v54 = vld [vmem:[%s6941_s1 + $0x78] sm:$0xff]  }
  0x1c   : > { %5059 = vmatpush3.bf16.msra.mxu0 %v5669_v11  ;;  %4852 = vmatprep.subr.bf16.mxu1 %v5670_v15  ;;  %v2168_v6 = vor.u32 %v2167_v1, %v2164_v0  ;;  %v6006_v11 = vld [vmem:[%s5919_s18 + $0x40] sm:$0xff]   ;;  %v2589_v41 = vrot.slane %v5936_v17, 2  ;;  %v5702_v17 = vld [vmem:[%s6941_s1 + $0x178] sm:$0xff]   ;;  %v5707_v53 = vld [vmem:[%s5919_s18 + $0x50] sm:$0xff]   ;;  %v2597_v58 = vrot.slane %v5980_v55, 2  ;;  %v2599_v1 = vrot.slane %v5990_v62, 2 }
  0x1d   : > { %5060 = vmatprep.subr.bf16.mxu0 %v5671_v18  ;;  %v2160_v7 = vsel %vm2116_vm0, %v2150_v52, %v2159_v61  ;;  %v2176_v10 = vrot.slane %v2174_v4, 2  ;;  %v2180_v13 = vshrl.u32 %v6006_v11, 16  ;;  %v2588_v42 = vrot.slane %v4502_v36, 2  ;;  %v5709_v52 = vld [vmem:[%s6941_s1 + $0x180] sm:$0xff]   ;;  %v5723_v0 = vld [vmem:[%s6941_s1 + $0x198] sm:$0xff]  }
  0x1e   : > { %v2169_v12 = vsel %vm2116_vm0, %v2159_v61, %v2168_v6  ;;  %v5711_v61 = vld [vmem:[%s5919_s18 + $0x60] sm:$0xff]   ;;  %v2601_v3 = vrot.slane %v6006_v11, 2 }
  0x1f   : > { %4853 = vmatpush3.bf16.msra.mxu1 %v5670_v15  ;;  %v2183_v15 = vshll.u32 %v6006_v11, 16  ;;  %v2177_v20 = vor.u32 %v2176_v10, %v2173_v9  ;;  %v2182_v22 = vrot.slane %v2180_v13, 1  ;;  %v2590_v47 = vsel %vm2587_vm1, %v2588_v42, %v2589_v41  ;;  %v719_v4 = vld [vmem:[%s5919_s18] sm:$0xf]  ;;  %v5712_v9 = vld [vmem:[%s5919_s18 + $0x68] sm:$0xff]   ;;  %v5715_v10 = vld [vmem:[%s5919_s18 + $0x70] sm:$0xff]  }
  0x20   : > { %5061 = vmatpush3.bf16.msra.mxu0 %v5671_v18  ;;  %4854 = vmatprep.subr.bf16.mxu1 %v5672_v28  ;;  %v6012_v18 = vld [vmem:[%s5919_s18 + $0x48] sm:$0xff]   ;;  %v5726_v33 = vld [vmem:[%s5919_s18 + $0x60] sm:$0xff]  }
  0x21   : > { %5062 = vmatprep.subr.bf16.mxu0 %v5673_v29  ;;  %v2185_v23 = vrot.slane %v2183_v15, 2  ;;  %v2189_v24 = vshrl.u32 %v6012_v18, 16  ;;  %v2192_v25 = vshll.u32 %v6012_v18, 16  ;;  %v2178_v32 = vsel %vm2116_vm0, %v2168_v6, %v2177_v20  ;;  %v6097_v6 = vld [vmem:[%s5919_s18 + $0x10] sm:$0xff]  }
  0x22   : > { %v2602_v15 = vsel %vm2587_vm1, %v2599_v1, %v2601_v3 }
  0x23   : > { %4855 = vmatpush3.bf16.msra.mxu1 %v5672_v28  ;;  %v5696_v28 = vld [vmem:[%s5919_s18 + $0x30] sm:$0xff]   ;;  %v2191_v30 = vrot.slane %v2189_v24, 1  ;;  %v2194_v31 = vrot.slane %v2192_v25, 2  ;;  %v5718_v25 = vld [vmem:[%s5919_s18 + $0x80] sm:$0xff]  }
  0x24   : > { %5063 = vmatpush3.bf16.msra.mxu0 %v5673_v29  ;;  %4892 = vmatprep.subr.bf16.mxu1 %v5678_v35  ;;  %v2186_v29 = vor.u32 %v2185_v23, %v2182_v22  ;;  %v5716_v23 = vld [vmem:[%s5919_s18 + $0x78] sm:$0xff]  }
  0x25   : > { %5100 = vmatprep.subr.bf16.mxu0 %v5680_v40 }
  0x26   : > { %4857 = vmatmul.mubr.bf16.vlgmr.msra.gmra.mrb[0].mxu1 %v5677_v44  ;;  %v5710_v44 = vld [vmem:[%s6941_s1 + $0x68] sm:$0xff]  }
  0x27   : > { %5065 = vmatmul.mubr.bf16.vlgmr.msra.gmra.mrb[0].mxu0 %v2142_v50  ;;  %4893 = vmatpush3.bf16.msra.mxu1 %v5678_v35  ;;  %v2187_v35 = vsel %vm2116_vm0, %v2177_v20, %v2186_v29  ;;  %v2591_v50 = vrot.slane %v5946_v27, 2  ;;  %v5738_v20 = vld [vmem:[%s6941_s1 + $0x1a8] sm:$0xff]  }
  0x28   : > { %5101 = vmatpush3.bf16.msra.mxu0 %v5680_v40  ;;  %4860 = vmatprep.mubr.bf16.mxu1 %v5682_v51  ;;  %v6035_v40 = vor.u32 %v2194_v31, %v2191_v30  ;;  %v2593_v51 = vrot.slane %v5961_v38, 2  ;;  %v5713_v38 = vld [vmem:[%s6941_s1 + $0x188] sm:$0xff]  }
  0x29   : > { %5102 = vmatprep.subr.bf16.mxu0 %v5681_v48  ;;  %5068 = vmatprep.mubr.bf16.mxu0 %v2151_v56  ;;  %v2592_v56 = vsel %vm2587_vm1, %v2589_v41, %v2591_v50  ;;  %v5748_v41 = vld [vmem:[%s6941_s1 + $0x1b8] sm:$0xff]  }
  0x2a   : > { %4894 = vmatprep.subr.bf16.mxu1 %v5687_v57  ;;  %v2196_v46 = vsel %vm2116_vm0, %v2186_v29, %v6035_v40  ;;  %v2594_v27 = vsel %vm2587_vm1, %v2591_v50, %v2593_v51 }
  0x2b   : > { %4895 = vmatpush3.bf16.msra.mxu1 %v5687_v57  ;;  %v2595_v57 = vrot.slane %v5969_v43, 2  ;;  %v6080_v43 = vld [vmem:[%s6941_s1 + $0x80] sm:$0xff]  }
  0x2c   : > { %5103 = vmatpush3.bf16.msra.mxu0 %v5681_v48  ;;  %4896 = vmatprep.subr.bf16.mxu1 %v5694_v2  ;;  %v5714_v48 = vld [vmem:[%s6941_s1 + $0x70] sm:$0xff]  }
  0x2d   : > { %5104 = vmatprep.subr.bf16.mxu0 %v5686_v63  ;;  %v2598_v55 = vsel %vm2587_vm1, %v2595_v57, %v2597_v58 }
  0x2e   : > { %4861 = vmatmul.mubr.bf16.gmra.mrb[4].mxu1 %v5684_v60  ;;  %v5708_v60 = vld [vmem:[%s5919_s18 + $0x58] sm:$0xff]  }
  0x2f   : > { %5069 = vmatmul.mubr.bf16.gmra.mrb[4].mxu0 %v2160_v7  ;;  %4864 = vmatprep.mubr.bf16.mxu1 %v5689_v5  ;;  %v6094_v5 = vld [vmem:[%s5919_s18 + $0x4] sm:$0xf] }
  0x30   : > { %5105 = vmatpush3.bf16.msra.mxu0 %v5686_v63  ;;  %5072 = vmatprep.mubr.bf16.mxu0 %v2169_v12  ;;  %v2596_v63 = vsel %vm2587_vm1, %v2593_v51, %v2595_v57  ;;  %v5730_v7 = vld [vmem:[%s6941_s1 + $0x1a0] sm:$0xff]   ;;  %v2600_v12 = vsel %vm2587_vm1, %v2597_v58, %v2599_v1  ;;  %v4366_v13 = vcombine.low %v719_v4, %v6094_v5 }
  0x31   : > { %5106 = vmatprep.subr.bf16.mxu0 %v5688_v8  ;;  %4897 = vmatpush3.bf16.msra.mxu1 %v5694_v2  ;;  %v6088_v2 = vld [vmem:[%s5919_s18 + $0x8] sm:$0xff]   ;;  %v6148_v51 = vld [vmem:[%s5919_s18 + $0x20] sm:$0xff]  }
  0x32   : > { %4898 = vmatprep.subr.bf16.mxu1 %v5701_v26  ;;  %v1317_v62 = vrot.slane %v6088_v2, 1  ;;  %v870_v22 = vshll.u32 %v4366_v13, 16  ;;  %v875_v31 = vshll.u32 %v6088_v2, 16  ;;  %v879_v42 = vshrl.u32 %v6088_v2, 16 }
  0x33   : > { %v899_v58 = vshll.u32 %v6148_v51, 16 }
  0x34   : > { %5107 = vmatpush3.bf16.msra.mxu0 %v5688_v8  ;;  %v1319_v8 = vrot.slane %v6097_v6, 1  ;;  %v872_v30 = vrot.slane %v870_v22, 1  ;;  %v877_v36 = vrot.slane %v875_v31, 1  ;;  %v5741_v22 = vld [vmem:[%s6941_s1 + $0x90] sm:$0xff]  }
  0x35   : > { %5108 = vmatprep.subr.bf16.mxu0 %v5693_v21  ;;  %4899 = vmatpush3.bf16.msra.mxu1 %v5701_v26  ;;  %v5722_v26 = vld [vmem:[%s5919_s18 + $0x58] sm:$0xff]  }
  0x36   : > { %4865 = vmatmul.mubr.bf16.gmra.mrb[8].mxu1 %v5691_v19  ;;  %4900 = vmatprep.subr.bf16.mxu1 %v5706_v37  ;;  %v6111_v11 = vsel %vm1315_vm2, %v1317_v62, %v1319_v8  ;;  %v5720_v19 = vld [vmem:[%s5919_s18 + $0x50] sm:$0xff]  }
  0x37   : > { %5073 = vmatmul.mubr.bf16.gmra.mrb[8].mxu0 %v2178_v32  ;;  %4868 = vmatprep.mubr.bf16.mxu1 %v5696_v28  ;;  %v2605_v24 = vrot.slane %v5720_v19, 2  ;;  %v868_v28 = vshrl.u32 %v4366_v13, 16  ;;  %v6177_v19 = vld [vmem:[%s5919_s18 + $0x38] sm:$0xff]  }
  0x38   : > { %5109 = vmatpush3.bf16.msra.mxu0 %v5693_v21  ;;  %5076 = vmatprep.mubr.bf16.mxu0 %v2187_v35  ;;  %v2603_v21 = vrot.slane %v6012_v18, 2  ;;  %v2607_v18 = vrot.slane %v5722_v26, 2 }
  0x39   : > { %5110 = vmatprep.subr.bf16.mxu0 %v5695_v34  ;;  %4901 = vmatpush3.bf16.msra.mxu1 %v5706_v37  ;;  %v873_v35 = vor.u32 %v872_v30, %v868_v28  ;;  %v6132_v37 = vld [vmem:[%s5919_s18 + $0x18] sm:$0xff]   ;;  %v6189_v30 = vld [vmem:[%s5919_s18 + $0x90] sm:$0xff]  }
  0x3a   : > { %4902 = vmatprep.subr.bf16.mxu1 %v5710_v44  ;;  %v2604_v29 = vsel %vm2587_vm1, %v2601_v3, %v2603_v21  ;;  %v2606_v32 = vsel %vm2587_vm1, %v2603_v21, %v2605_v24  ;;  %v891_v50 = vshll.u32 %v6132_v37, 16  ;;  %v6166_v3 = vld [vmem:[%s6941_s1 + $0x1c0] sm:$0xff]  }
  0x3c   : > { %5111 = vmatpush3.bf16.msra.mxu0 %v5695_v34  ;;  %v5746_v34 = vld [vmem:[%s6941_s1 + $0x1b0] sm:$0xff]  }
  0x3d   : > { %5112 = vmatprep.subr.bf16.mxu0 %v5700_v14  ;;  %4903 = vmatpush3.bf16.msra.mxu1 %v5710_v44  ;;  %v883_v44 = vshll.u32 %v6097_v6, 16 }
  0x3e   : > { %4869 = vmatmul.mubr.bf16.gmra.mrb[12].mxu1 %v5698_v39  ;;  %4904 = vmatprep.subr.bf16.mxu1 %v5714_v48  ;;  %v2609_v39 = vrot.slane %v5726_v33, 2 }
  0x3f   : > { %5077 = vmatmul.mubr.bf16.gmra.mrb[12].mxu0 %v2196_v46  ;;  %4872 = vmatprep.mubr.bf16.mxu1 %v5703_v45  ;;  %v2608_v45 = vsel %vm2587_vm1, %v2605_v24, %v2607_v18  ;;  %v878_v46 = vsel %vm866_vm3, %v873_v35, %v877_v36 }
  0x40   : > { %5113 = vmatpush3.bf16.msra.mxu0 %v5700_v14  ;;  %5116 = vmatprep.mubr.bf16.mxu0 %v2590_v47  ;;  %v5721_v14 = vld [vmem:[%s5919_s18 + $0x88] sm:$0xff]   ;;  %v887_v47 = vshrl.u32 %v6097_v6, 16  ;;  %v6286_v6 = vld [vmem:[%s6941_s1 + $0xc0] sm:$0xff]  }
  0x41   : > { %5114 = vmatprep.subr.bf16.mxu0 %v5702_v17  ;;  %4905 = vmatpush3.bf16.msra.mxu1 %v5714_v48  ;;  %v5732_v48 = vld [vmem:[%s5919_s18 + $0x70] sm:$0xff]  }
  0x42   : > { %4906 = vmatprep.subr.bf16.mxu1 %v5719_v54  ;;  %v2613_v57 = vrot.slane %v5732_v48, 2  ;;  %v6209_v48 = vld [vmem:[%s5919_s18 + $0x50] sm:$0xff]  }
  0x44   : > { %5115 = vmatpush3.bf16.msra.mxu0 %v5702_v17  ;;  %v5729_v17 = vld [vmem:[%s5919_s18 + $0x68] sm:$0xff]  }
  0x45   : > { %5152 = vmatprep.subr.bf16.mxu0 %v5709_v52  ;;  %4907 = vmatpush3.bf16.msra.mxu1 %v5719_v54  ;;  %v2611_v54 = vrot.slane %v5729_v17, 2  ;;  %v2621_v17 = vrot.slane %v6189_v30, 2 }
  0x46   : > { %4873 = vmatmul.mubr.bf16.gmra.mrb[16].mxu1 %v5705_v49  ;;  %4944 = vmatprep.subr.bf16.mxu1 %v6080_v43  ;;  %v2610_v49 = vsel %vm2587_vm1, %v2607_v18, %v2609_v39  ;;  %v6195_v18 = vld [vmem:[%s5919_s18 + $0x40] sm:$0xff]  }
  0x47   : > { %5117 = vmatmul.mubr.bf16.vlgmr.msra.gmra.mrb[0].mxu0 %v2592_v56  ;;  %4876 = vmatprep.mubr.bf16.mxu1 %v5707_v53  ;;  %v885_v53 = vrot.slane %v883_v44, 1  ;;  %v6151_v56 = vld [vmem:[%s5919_s18 + $0x28] sm:$0xff]   ;;  %v5745_v44 = vld [vmem:[%s5919_s18 + $0x98] ss:$0 sps:$4 sm:$0x33]  }
  0x48   : > { %5120 = vmatprep.mubr.bf16.mxu0 %v2594_v27  ;;  %5153 = vmatpush3.bf16.msra.mxu0 %v5709_v52  ;;  %v881_v52 = vor.u32 %v879_v42, %v877_v36  ;;  %v907_v1 = vshll.u32 %v6151_v56, 16  ;;  %v911_v26 = vshrl.u32 %v6151_v56, 16 }
  0x49   : > { %5154 = vmatprep.subr.bf16.mxu0 %v5713_v38  ;;  %v889_v27 = vor.u32 %v887_v47, %v885_v53  ;;  %v931_v47 = vshll.u32 %v6195_v18, 16 }
  0x4a   : > { %v909_v21 = vrot.slane %v907_v1, 1 }
  0x4c   : > { %5155 = vmatpush3.bf16.msra.mxu0 %v5713_v38  ;;  %v893_v38 = vrot.slane %v891_v50, 1 }
  0x4d   : > { %5156 = vmatprep.subr.bf16.mxu0 %v5717_v59 }
  0x4e   : > { %4877 = vmatmul.mubr.bf16.gmra.mrb[20].mxu1 %v5708_v60  ;;  %v895_v60 = vshrl.u32 %v6132_v37, 16  ;;  %v894_v4 = vsel %vm866_vm3, %v889_v27, %v893_v38 }
  0x4f   : > { %5121 = vmatmul.mubr.bf16.gmra.mrb[4].mxu0 %v2596_v63  ;;  %4880 = vmatprep.mubr.bf16.mxu1 %v5711_v61  ;;  %v5734_v61 = vld [vmem:[%s5919_s18 + $0x78] sm:$0xff]   ;;  %v5735_v63 = vld [vmem:[%s6941_s1 + $0x88] sm:$0xff]  }
  0x50   : > { %5124 = vmatprep.mubr.bf16.mxu0 %v2598_v55  ;;  %5157 = vmatpush3.bf16.msra.mxu0 %v5717_v59  ;;  %v886_v59 = vsel %vm866_vm3, %v881_v52, %v885_v53  ;;  %v903_v55 = vshrl.u32 %v6148_v51, 16  ;;  %v897_v13 = vor.u32 %v895_v60, %v893_v38  ;;  %v927_v52 = vshrl.u32 %v6177_v19, 16  ;;  %v6217_v53 = vld [vmem:[%s5919_s18 + $0x18] sm:$0xff]   ;;  %v5760_v60 = vld [vmem:[%s6941_s1 + $0xa8] sm:$0xff]  }
  0x51   : > { %5158 = vmatprep.subr.bf16.mxu0 %v5723_v0  ;;  %v935_v38 = vshrl.u32 %v6195_v18, 16 }
  0x54   : > { %5159 = vmatpush3.bf16.msra.mxu0 %v5723_v0  ;;  %v2612_v0 = vsel %vm2587_vm1, %v2609_v39, %v2611_v54  ;;  %v913_v39 = vor.u32 %v911_v26, %v909_v21  ;;  %v6248_v26 = vld [vmem:[%s5919_s18 + $0x28] sm:$0xff]  }
  0x55   : > { %5160 = vmatprep.subr.bf16.mxu0 %v5730_v7 }
  0x56   : > { %4881 = vmatmul.mubr.bf16.gmra.mrb[24].mxu1 %v5712_v9  ;;  %v901_v9 = vrot.slane %v899_v58, 1 }
  0x57   : > { %5125 = vmatmul.mubr.bf16.gmra.mrb[8].mxu0 %v2600_v12  ;;  %4884 = vmatprep.mubr.bf16.mxu1 %v5715_v10  ;;  %v5737_v10 = vld [vmem:[%s5919_s18 + $0x80] sm:$0xff]   ;;  %v6172_v12 = vld [vmem:[%s5919_s18 + $0x30] sm:$0xff]  }
  0x58   : > { %5128 = vmatprep.mubr.bf16.mxu0 %v2602_v15  ;;  %5161 = vmatpush3.bf16.msra.mxu0 %v5730_v7  ;;  %v2614_v7 = vsel %vm2587_vm1, %v2611_v54, %v2613_v57  ;;  %v2615_v15 = vrot.slane %v5734_v61, 2  ;;  %v915_v24 = vshll.u32 %v6172_v12, 16  ;;  %v919_v28 = vshrl.u32 %v6172_v12, 16 }
  0x59   : > { %5162 = vmatprep.subr.bf16.mxu0 %v5738_v20  ;;  %v933_v61 = vrot.slane %v931_v47, 1 }
  0x5a   : > { %v2616_v31 = vsel %vm2587_vm1, %v2613_v57, %v2615_v15  ;;  %v917_v35 = vrot.slane %v915_v24, 1 }
  0x5c   : > { %5163 = vmatpush3.bf16.msra.mxu0 %v5738_v20  ;;  %v905_v20 = vor.u32 %v903_v55, %v901_v9  ;;  %v921_v42 = vor.u32 %v919_v28, %v917_v35  ;;  %v918_v50 = vsel %vm866_vm3, %v913_v39, %v917_v35  ;;  %v947_v55 = vshll.u32 %v6209_v48, 16 }
  0x5d   : > { %5164 = vmatprep.subr.bf16.mxu0 %v5746_v34 }
  0x5e   : > { %4885 = vmatmul.mubr.bf16.gmra.mrb[28].mxu1 %v5716_v23  ;;  %v2617_v23 = vrot.slane %v5737_v10, 2 }
  0x5f   : > { %5129 = vmatmul.mubr.bf16.gmra.mrb[12].mxu0 %v2604_v29  ;;  %4888 = vmatprep.mubr.bf16.mxu1 %v5718_v25  ;;  %v5740_v25 = vld [vmem:[%s5919_s18 + $0x88] sm:$0xff]   ;;  %v923_v29 = vshll.u32 %v6177_v19, 16 }
  0x60   : > { %5132 = vmatprep.mubr.bf16.mxu0 %v2606_v32  ;;  %5165 = vmatpush3.bf16.msra.mxu0 %v5746_v34  ;;  %v910_v32 = vsel %vm866_vm3, %v905_v20, %v909_v21  ;;  %v2618_v33 = vsel %vm2587_vm1, %v2615_v15, %v2617_v23  ;;  %v5747_v34 = vld [vmem:[%s6941_s1 + $0x98] sm:$0xff]   ;;  %v2619_v36 = vrot.slane %v5740_v25, 2  ;;  %v5766_v20 = vld [vmem:[%s6941_s1 + $0xb0] sm:$0xff]   ;;  %v1294_v21 = vld [vmem:[%s5919_s18] sm:$0xe] }
  0x61   : > { %5166 = vmatprep.subr.bf16.mxu0 %v5748_v41  ;;  %v4409_v24 = vcombine.low %v1294_v21, %v6094_v5  ;;  %v5773_v5 = vld [vmem:[%s6941_s1 + $0xb8] sm:$0xff]  }
  0x62   : > { %v2620_v54 = vsel %vm2587_vm1, %v2617_v23, %v2619_v36  ;;  %v2622_v58 = vsel %vm2587_vm1, %v2619_v36, %v2621_v17  ;;  %v1323_v36 = vrot.slane %v6148_v51, 1  ;;  %v3056_v51 = vrot.slane %v6248_v26, 2 }
  0x64   : > { %5167 = vmatpush3.bf16.msra.mxu0 %v5748_v41  ;;  %v925_v41 = vrot.slane %v923_v29, 1 }
  0x65   : > { %5204 = vmatprep.subr.bf16.mxu0 %v6166_v3 }
  0x66   : > { %4889 = vmatmul.mubr.bf16.gmra.mrb[32].mxu1 %v5721_v14  ;;  %v6201_v14 = vld [vmem:[%s5919_s18 + $0x48] sm:$0xff]   ;;  %v926_v27 = vsel %vm866_vm3, %v921_v42, %v925_v41  ;;  %v929_v1 = vor.u32 %v927_v52, %v925_v41  ;;  %v1325_v42 = vrot.slane %v6151_v56, 1 }
  0x67   : > { %5133 = vmatmul.mubr.bf16.gmra.mrb[16].mxu0 %v2608_v45  ;;  %4908 = vmatprep.mubr.bf16.mxu1 %v878_v46  ;;  %v2904_v45 = vld [vmem:[%s5919_s18 + $0x10] sm:$0xc]  ;;  %v2905_v46 = vld [vmem:[%s5919_s18 + $0x14] sm:$0xf]  ;;  %v939_v57 = vshll.u32 %v6201_v14, 16  ;;  %v6268_v41 = vld [vmem:[%s5919_s18 + $0x68] sm:$0xff]  }
  0x68   : > { %5136 = vmatprep.mubr.bf16.mxu0 %v2610_v49  ;;  %v5754_v49 = vld [vmem:[%s6941_s1 + $0xa0] sm:$0xff]   ;;  %v934_v25 = vsel %vm866_vm3, %v929_v1, %v933_v61 }
  0x69   : > { %v941_v10 = vrot.slane %v939_v57, 1  ;;  %v6305_v57 = vld [vmem:[%s5919_s18 + $0x38] sm:$0xff]  }
  0x6e   : > { %4909 = vmatmul.mubr.bf16.vlgmr.msra.gmra.mrb[0].mxu1 %v886_v59  ;;  %v6224_v59 = vcombine.low %v2904_v45, %v2905_v46  ;;  %v6281_v45 = vld [vmem:[%s5919_s18 + $0x30] sm:$0xff]   ;;  %v1327_v46 = vrot.slane %v6172_v12, 1 }
  0x6f   : > { %5137 = vmatmul.mubr.bf16.gmra.mrb[20].mxu0 %v2612_v0  ;;  %4945 = vmatpush3.bf16.msra.mxu1 %v6080_v43  ;;  %v902_v43 = vsel %vm866_vm3, %v897_v13, %v901_v9  ;;  %v6231_v0 = vld [vmem:[%s5919_s18 + $0x20] sm:$0xff]   ;;  %v937_v9 = vor.u32 %v935_v38, %v933_v61  ;;  %v6236_v13 = vld [vmem:[%s5919_s18 + $0x58] sm:$0xff]   ;;  %v1329_v38 = vrot.slane %v6177_v19, 1  ;;  %v3058_v1 = vrot.slane %v6281_v45, 2 }
  0x70   : > { %4912 = vmatprep.mubr.bf16.mxu1 %v894_v4  ;;  %5140 = vmatprep.mubr.bf16.mxu0 %v2614_v7  ;;  %v3052_v4 = vrot.slane %v6217_v53, 2  ;;  %v943_v7 = vshrl.u32 %v6201_v14, 16  ;;  %v3051_v15 = vrot.slane %v6224_v59, 2  ;;  %v3054_v23 = vrot.slane %v6231_v0, 2 }
  0x71   : > { %4946 = vmatprep.subr.bf16.mxu1 %v5735_v63  ;;  %v942_v29 = vsel %vm866_vm3, %v937_v9, %v941_v10  ;;  %v955_v30 = vshll.u32 %v6236_v13, 16  ;;  %v6324_v9 = vld [vmem:[%s5919_s18 + $0x78] sm:$0xff]  }
  0x72   : > { %v945_v39 = vor.u32 %v943_v7, %v941_v10  ;;  %v3055_v47 = vsel %vm2587_vm1, %v3052_v4, %v3054_v23  ;;  %v3057_v12 = vsel %vm2587_vm1, %v3054_v23, %v3056_v51  ;;  %v1333_v10 = vrot.slane %v6201_v14, 1 }
  0x73   : > { %4947 = vmatpush3.bf16.msra.mxu1 %v5735_v63  ;;  %v2623_v63 = vrot.slane %v5745_v44, 2  ;;  %v957_v2 = vrot.slane %v955_v30, 1  ;;  %v3059_v23 = vsel %vm2587_vm1, %v3056_v51, %v3058_v1  ;;  %v975_v14 = vshrl.u32 %v6268_v41, 16 }
  0x74   : > { %4948 = vmatprep.subr.bf16.mxu1 %v5741_v22  ;;  %v1337_v30 = vrot.slane %v6236_v13, 1 }
  0x75   : > { %v2624_v28 = vsel %vm2587_vm1, %v2621_v17, %v2623_v63  ;;  %v6313_v63 = vld [vmem:[%s5919_s18 + $0x70] sm:$0xff]  }
  0x76   : > { %4913 = vmatmul.mubr.bf16.gmra.mrb[4].mxu1 %v902_v43  ;;  %v951_v43 = vshrl.u32 %v6209_v48, 16  ;;  %v979_v21 = vshll.u32 %v6313_v63, 16 }
  0x77   : > { %5141 = vmatmul.mubr.bf16.gmra.mrb[24].mxu0 %v2616_v31  ;;  %4916 = vmatprep.mubr.bf16.mxu1 %v910_v32  ;;  %v1316_v31 = vrot.slane %v4409_v24, 1  ;;  %v3053_v32 = vsel %vm2587_vm1, %v3051_v15, %v3052_v4  ;;  %v3060_v15 = vrot.slane %v6305_v57, 2  ;;  %v6339_v24 = vld [vmem:[%s5919_s18 + $0x40] sm:$0xff]  }
  0x78   : > { %5144 = vmatprep.mubr.bf16.mxu0 %v2618_v33  ;;  %4949 = vmatpush3.bf16.msra.mxu1 %v5741_v22  ;;  %v949_v22 = vrot.slane %v947_v55, 1  ;;  %v1321_v33 = vrot.slane %v6132_v37, 1  ;;  %v6316_v55 = vsel %vm1315_vm2, %v1327_v46, %v1329_v38 }
  0x79   : > { %4950 = vmatprep.subr.bf16.mxu1 %v5747_v34  ;;  %v6264_v35 = vsel %vm1315_vm2, %v1316_v31, %v1317_v62  ;;  %v3061_v31 = vsel %vm2587_vm1, %v3058_v1, %v3060_v15  ;;  %v1345_v1 = vrot.slane %v6324_v9, 1 }
  0x7a   : > { %v6273_v37 = vsel %vm1315_vm2, %v1319_v8, %v1321_v33  ;;  %v953_v44 = vor.u32 %v951_v43, %v949_v22  ;;  %v6277_v62 = vsel %vm1315_vm2, %v1321_v33, %v1323_v36  ;;  %v6289_v8 = vsel %vm1315_vm2, %v1323_v36, %v1325_v42  ;;  %v5769_v36 = vld [vmem:[%s5919_s18 + $0x80] sm:$0xff]  }
  0x7b   : > { %v950_v17 = vsel %vm866_vm3, %v945_v39, %v949_v22  ;;  %v981_v33 = vrot.slane %v979_v21, 1  ;;  %v1347_v21 = vrot.slane %v5769_v36, 1 }
  0x7c   : > { %4951 = vmatpush3.bf16.msra.mxu1 %v5747_v34  ;;  %v6259_v34 = vld [vmem:[%s5919_s18 + $0x60] sm:$0xff]   ;;  %v958_v52 = vsel %vm866_vm3, %v953_v44, %v957_v2 }
  0x7d   : > { %4952 = vmatprep.subr.bf16.mxu1 %v5754_v49  ;;  %v963_v56 = vshll.u32 %v6259_v34, 16  ;;  %v1339_v44 = vrot.slane %v6259_v34, 1 }
  0x7e   : > { %4917 = vmatmul.mubr.bf16.gmra.mrb[8].mxu1 %v918_v50  ;;  %v971_v50 = vshll.u32 %v6268_v41, 16 }
  0x7f   : > { %5145 = vmatmul.mubr.bf16.gmra.mrb[28].mxu0 %v2620_v54  ;;  %4920 = vmatprep.mubr.bf16.mxu1 %v926_v27  ;;  %v967_v54 = vshrl.u32 %v6259_v34, 16  ;;  %v6300_v27 = vsel %vm1315_vm2, %v1325_v42, %v1327_v46  ;;  %v965_v61 = vrot.slane %v963_v56, 1  ;;  %v3062_v42 = vrot.slane %v6339_v24, 2  ;;  %v5772_v56 = vld [vmem:[%s5919_s18 + $0x88] sm:$0xff]  }
  0x80   : > { %5148 = vmatprep.mubr.bf16.mxu0 %v2622_v58  ;;  %4953 = vmatpush3.bf16.msra.mxu1 %v5754_v49  ;;  %v959_v49 = vshrl.u32 %v6236_v13, 16  ;;  %v5765_v58 = vld [vmem:[%s6941_s1 + $0x1c8] sm:$0xff]   ;;  %v973_v4 = vrot.slane %v971_v50, 1  ;;  %v1341_v46 = vrot.slane %v6268_v41, 1  ;;  %v995_v34 = vshll.u32 %v5769_v36, 16 }
  0x81   : > { %4954 = vmatprep.subr.bf16.mxu1 %v5760_v60  ;;  %v991_v41 = vshrl.u32 %v6324_v9, 16 }
  0x82   : > { %v961_v19 = vor.u32 %v959_v49, %v957_v2  ;;  %v977_v13 = vor.u32 %v975_v14, %v973_v4  ;;  %v6369_v49 = vsel %vm1315_vm2, %v1337_v30, %v1339_v44  ;;  %v6372_v50 = vsel %vm1315_vm2, %v1339_v44, %v1341_v46 }
  0x84   : > { %4955 = vmatpush3.bf16.msra.mxu1 %v5760_v60  ;;  %v1331_v60 = vrot.slane %v6195_v18, 1  ;;  %v969_v18 = vor.u32 %v967_v54, %v965_v61  ;;  %v3063_v54 = vsel %vm2587_vm1, %v3060_v15, %v3062_v42  ;;  %v5775_v15 = vld [vmem:[%s5919_s18 + $0x90] ss:$0 sps:$4 sm:$0x11]  }
  0x85   : > { %4956 = vmatprep.subr.bf16.mxu1 %v5766_v20 }
  0x86   : > { %4921 = vmatmul.mubr.bf16.gmra.mrb[12].mxu1 %v934_v25  ;;  %v6320_v7 = vsel %vm1315_vm2, %v1329_v38, %v1331_v60  ;;  %v6333_v22 = vsel %vm1315_vm2, %v1331_v60, %v1333_v10  ;;  %v1335_v25 = vrot.slane %v6209_v48, 1  ;;  %v974_v43 = vsel %vm866_vm3, %v969_v18, %v973_v4  ;;  %v6378_v38 = vld [vmem:[%s5919_s18 + $0x50] sm:$0xff]   ;;  %v5787_v18 = vld [vmem:[%s6941_s1 + $0x1e8] sm:$0xff]  }
  0x87   : > { %5149 = vmatmul.mubr.bf16.gmra.mrb[32].mxu0 %v2624_v28  ;;  %4924 = vmatprep.mubr.bf16.mxu1 %v942_v29  ;;  %v983_v28 = vshrl.u32 %v6313_v63, 16  ;;  %v987_v29 = vshll.u32 %v6324_v9, 16  ;;  %v999_v60 = vshrl.u32 %v5769_v36, 16 }
  0x88   : > { %5168 = vmatprep.mubr.bf16.mxu0 %v3053_v32  ;;  %4957 = vmatpush3.bf16.msra.mxu1 %v5766_v20  ;;  %v5771_v20 = vld [vmem:[%s6941_s1 + $0x1d0] sm:$0xff]   ;;  %v6348_v32 = vld [vmem:[%s5919_s18 + $0x48] sm:$0xff]   ;;  %v6354_v48 = vsel %vm1315_vm2, %v1333_v10, %v1335_v25  ;;  %v6358_v39 = vsel %vm1315_vm2, %v1335_v25, %v1337_v30  ;;  %v6399_v25 = vld [vmem:[%s5919_s18 + $0x60] sm:$0xff]   ;;  %v6406_v30 = vsel %vm1315_vm2, %v1345_v1, %v1347_v21 }
  0x89   : > { %4958 = vmatprep.subr.bf16.mxu1 %v5773_v5  ;;  %v985_v2 = vor.u32 %v983_v28, %v981_v33  ;;  %v989_v51 = vrot.slane %v987_v29, 1  ;;  %v5792_v29 = vld [vmem:[%s6941_s1 + $0x1f0] sm:$0xff]  }
  0x8b   : > { %v993_v9 = vor.u32 %v991_v41, %v989_v51 }
  0x8c   : > { %4959 = vmatpush3.bf16.msra.mxu1 %v5773_v5  ;;  %v5777_v5 = vld [vmem:[%s6941_s1 + $0x1d8] sm:$0xff]  }
  0x8d   : > { %4996 = vmatprep.subr.bf16.mxu1 %v6286_v6 }
  0x8e   : > { %4925 = vmatmul.mubr.bf16.gmra.mrb[16].mxu1 %v950_v17  ;;  %v3064_v17 = vrot.slane %v6348_v32, 2 }
  0x8f   : > { %5169 = vmatmul.mubr.bf16.vlgmr.msra.gmra.mrb[0].mxu0 %v3055_v47  ;;  %4928 = vmatprep.mubr.bf16.mxu1 %v958_v52  ;;  %v5782_v47 = vld [vmem:[%s6941_s1 + $0x1e0] sm:$0xff]   ;;  %v982_v52 = vsel %vm866_vm3, %v977_v13, %v981_v33  ;;  %v1351_v13 = vrot.slane %v5775_v15, 1 }
  0x90   : > { %5172 = vmatprep.mubr.bf16.mxu0 %v3057_v12  ;;  %5205 = vmatpush3.bf16.msra.mxu0 %v6166_v3  ;;  %v966_v3 = vsel %vm866_vm3, %v961_v19, %v965_v61  ;;  %v1343_v12 = vrot.slane %v6313_v63, 1  ;;  %v1003_v61 = vshll.u32 %v5772_v56, 16  ;;  %v6383_v19 = vld [vmem:[%s5919_s18 + $0x58] sm:$0xff]   ;;  %v3065_v4 = vsel %vm2587_vm1, %v3062_v42, %v3064_v17 }
  0x91   : > { %5206 = vmatprep.subr.bf16.mxu0 %v5765_v58  ;;  %v997_v63 = vrot.slane %v995_v34, 1  ;;  %v3068_v28 = vrot.slane %v6383_v19, 2  ;;  %v3479_v42 = vshrl.u32 %v6399_v25, 16  ;;  %v5794_v34 = vld [vmem:[%s6941_s1 + $0x1f8] sm:$0xff]  }
  0x92   : > { %v6391_v10 = vsel %vm1315_vm2, %v1341_v46, %v1343_v12  ;;  %v1005_v14 = vrot.slane %v1003_v61, 1  ;;  %v6419_v46 = vld [vmem:[%s5919_s18 + $0x70] sm:$0xff]  }
  0x93   : > { %v998_v36 = vsel %vm866_vm3, %v993_v9, %v997_v63  ;;  %v3497_v61 = vshrl.u32 %v6419_v46, 16  ;;  %v6441_v9 = vld [vmem:[%s6941_s1 + $0x200] sm:$0xff]  }
  0x94   : > { %5207 = vmatpush3.bf16.msra.mxu0 %v5765_v58  ;;  %v990_v58 = vsel %vm866_vm3, %v985_v2, %v989_v51  ;;  %v6416_v51 = vld [vmem:[%s5919_s18 + $0x68] sm:$0xff]  }
  0x95   : > { %5208 = vmatprep.subr.bf16.mxu0 %v5771_v20  ;;  %v3488_v41 = vshrl.u32 %v6416_v51, 16 }
  0x96   : > { %4929 = vmatmul.mubr.bf16.gmra.mrb[20].mxu1 %v966_v3  ;;  %v3066_v3 = vrot.slane %v6378_v38, 2 }
  0x97   : > { %5173 = vmatmul.mubr.bf16.gmra.mrb[4].mxu0 %v3059_v23  ;;  %4932 = vmatprep.mubr.bf16.mxu1 %v974_v43  ;;  %v1001_v23 = vor.u32 %v999_v60, %v997_v63  ;;  %v1349_v43 = vrot.slane %v5772_v56, 1  ;;  %v3491_v60 = vshll.u32 %v6416_v51, 16  ;;  %v3500_v63 = vshll.u32 %v6419_v46, 16 }
  0x98   : > { %5176 = vmatprep.mubr.bf16.mxu0 %v3061_v31  ;;  %5209 = vmatpush3.bf16.msra.mxu0 %v5771_v20  ;;  %v6395_v20 = vsel %vm1315_vm2, %v1343_v12, %v1345_v1  ;;  %v1007_v31 = vshrl.u32 %v5772_v56, 16  ;;  %v3067_v44 = vsel %vm2587_vm1, %v3064_v17, %v3066_v3  ;;  %v3482_v56 = vshll.u32 %v6399_v25, 16 }
  0x99   : > { %5210 = vmatprep.subr.bf16.mxu0 %v5777_v5  ;;  %v6409_v33 = vsel %vm1315_vm2, %v1347_v21, %v1349_v43  ;;  %v1006_v2 = vsel %vm866_vm3, %v1001_v23, %v1005_v14  ;;  %v3481_v12 = vrot.slane %v3479_v42, 2  ;;  %v3070_v1 = vrot.slane %v6399_v25, 2 }
  0x9a   : > { %v1009_v17 = vor.u32 %v1007_v31, %v1005_v14  ;;  %v3493_v21 = vrot.slane %v3491_v60, 3  ;;  %v3502_v23 = vrot.slane %v3500_v63, 3  ;;  %v6476_v60 = vld [vmem:[%s5919_s18 + $0x88] sm:$0xff]  }
  0x9c   : > { %5211 = vmatpush3.bf16.msra.mxu0 %v5777_v5  ;;  %v1011_v5 = vshll.u32 %v5775_v15, 16  ;;  %v3072_v15 = vrot.slane %v6416_v51, 2 }
  0x9d   : > { %5212 = vmatprep.subr.bf16.mxu0 %v5782_v47 }
  0x9e   : > { %4933 = vmatmul.mubr.bf16.gmra.mrb[24].mxu1 %v982_v52  ;;  %v6427_v52 = vsel %vm1315_vm2, %v1349_v43, %v1351_v13 }
  0x9f   : > { %5177 = vmatmul.mubr.bf16.gmra.mrb[8].mxu0 %v3063_v54  ;;  %4936 = vmatprep.mubr.bf16.mxu1 %v990_v58  ;;  %v1013_v54 = vrot.slane %v1011_v5, 1  ;;  %v3484_v58 = vrot.slane %v3482_v56, 3 }
  0xa0   : > { %5180 = vmatprep.mubr.bf16.mxu0 %v3065_v4  ;;  %5213 = vmatpush3.bf16.msra.mxu0 %v5782_v47  ;;  %v3069_v47 = vsel %vm2587_vm1, %v3066_v3, %v3068_v28  ;;  %v6434_v4 = vld [vmem:[%s5919_s18 + $0x78] sm:$0xff]   ;;  %v3499_v3 = vrot.slane %v3497_v61, 2 }
  0xa1   : > { %5214 = vmatprep.subr.bf16.mxu0 %v5787_v18  ;;  %v3506_v14 = vshrl.u32 %v6434_v4, 16  ;;  %v1014_v43 = vsel %vm866_vm3, %v1009_v17, %v1013_v54  ;;  %v6445_v31 = vor.u32 %v3484_v58, %v3481_v12  ;;  %v3509_v5 = vshll.u32 %v6434_v4, 16  ;;  %v6469_v12 = vld [vmem:[%s5919_s18 + $0x80] sm:$0xff]  }
  0xa2   : > { %v3503_v13 = vor.u32 %v3502_v23, %v3499_v3  ;;  %v3076_v17 = vrot.slane %v6434_v4, 2  ;;  %v3078_v61 = vrot.slane %v6469_v12, 2  ;;  %v3390_v23 = vshrl.u32 %v6224_v59, 16 }
  0xa3   : > { %v3508_v42 = vrot.slane %v3506_v14, 2  ;;  %v3511_v56 = vrot.slane %v3509_v5, 3  ;;  %v3393_v14 = vshll.u32 %v6224_v59, 16  ;;  %v3881_v5 = vrot.slane %v6416_v51, 3  ;;  %v5797_v51 = vld [vmem:[%s6941_s1 + $0xe8] sm:$0xff]  }
  0xa4   : > { %5215 = vmatpush3.bf16.msra.mxu0 %v5787_v18  ;;  %v3490_v18 = vrot.slane %v3488_v41, 2  ;;  %v3079_v63 = vsel %vm2587_vm1, %v3076_v17, %v3078_v61 }
  0xa5   : > { %5216 = vmatprep.subr.bf16.mxu0 %v5792_v29 }
  0xa6   : > { %4937 = vmatmul.mubr.bf16.gmra.mrb[28].mxu1 %v998_v36  ;;  %v3071_v36 = vsel %vm2587_vm1, %v3068_v28, %v3070_v1  ;;  %v6459_v28 = vor.u32 %v3511_v56, %v3508_v42  ;;  %v5791_v42 = vld [vmem:[%s5919_s18 + $0xa0] ss:$0 sps:$4 sm:$0x33]   ;;  %v3395_v56 = vrot.slane %v3393_v14, 3 }
  0xa7   : > { %5181 = vmatmul.mubr.bf16.gmra.mrb[12].mxu0 %v3067_v44  ;;  %4940 = vmatprep.mubr.bf16.mxu1 %v1006_v2  ;;  %v3073_v44 = vsel %vm2587_vm1, %v3070_v1, %v3072_v15  ;;  %v5789_v1 = vld [vmem:[%s6941_s1 + $0xd0] sm:$0xff]  }
  0xa8   : > { %5184 = vmatprep.mubr.bf16.mxu0 %v3069_v47  ;;  %5217 = vmatpush3.bf16.msra.mxu0 %v5792_v29  ;;  %v3494_v29 = vor.u32 %v3493_v21, %v3490_v18  ;;  %v6465_v54 = vsel %vm3388_vm4, %v3503_v13, %v6459_v28  ;;  %v3080_v18 = vrot.slane %v6476_v60, 2 }
  0xa9   : > { %5218 = vmatprep.subr.bf16.mxu0 %v5794_v34 }
  0xaa   : > { %v6453_v2 = vsel %vm3388_vm4, %v6445_v31, %v3494_v29  ;;  %v6456_v47 = vsel %vm3388_vm4, %v3494_v29, %v3503_v13  ;;  %v3401_v29 = vshll.u32 %v6217_v53, 16 }
  0xac   : > { %5219 = vmatpush3.bf16.msra.mxu0 %v5794_v34  ;;  %v3074_v34 = vrot.slane %v6419_v46, 2 }
  0xad   : > { %5256 = vmatprep.subr.bf16.mxu0 %v6441_v9 }
  0xae   : > { %4941 = vmatmul.mubr.bf16.gmra.mrb[32].mxu1 %v1014_v43  ;;  %v3075_v41 = vsel %vm2587_vm1, %v3072_v15, %v3074_v34  ;;  %v3077_v58 = vsel %vm2587_vm1, %v3074_v34, %v3076_v17  ;;  %v6488_v15 = vld [vmem:[%s5919_s18 + $0x90] sm:$0xff]   ;;  %v3398_v43 = vshrl.u32 %v6217_v53, 16  ;;  %v3883_v53 = vrot.slane %v6419_v46, 3 }
  0xaf   : > { %5185 = vmatmul.mubr.bf16.gmra.mrb[16].mxu0 %v3071_v36  ;;  %4960 = vmatprep.mubr.bf16.mxu1 %v6264_v35  ;;  %v5785_v35 = vld [vmem:[%s6941_s1 + $0xc8] sm:$0xff]   ;;  %v3082_v21 = vrot.slane %v6488_v15, 2  ;;  %v3403_v17 = vrot.slane %v3401_v29, 3  ;;  %v3407_v46 = vshrl.u32 %v6231_v0, 16  ;;  %v5801_v29 = vld [vmem:[%s6941_s1 + $0xf8] sm:$0xff]  }
  0xb0   : > { %5188 = vmatprep.mubr.bf16.mxu0 %v3073_v44  ;;  %v3392_v44 = vrot.slane %v3390_v23, 2  ;;  %v3400_v34 = vrot.slane %v3398_v43, 2 }
  0xb1   : > { %v3083_v36 = vsel %vm2587_vm1, %v3080_v18, %v3082_v21 }
  0xb6   : > { %4961 = vmatmul.mubr.bf16.vlgmr.msra.gmra.mrb[0].mxu1 %v6111_v11  ;;  %v6491_v11 = vld [vmem:[%s5919_s18 + $0x98] sm:$0xff]  }
  0xb7   : > { %5189 = vmatmul.mubr.bf16.gmra.mrb[20].mxu0 %v3075_v41  ;;  %4997 = vmatpush3.bf16.msra.mxu1 %v6286_v6  ;;  %v5793_v6 = vld [vmem:[%s6941_s1 + $0xd8] sm:$0xff]   ;;  %v3084_v3 = vrot.slane %v6491_v11, 2  ;;  %v6524_v41 = vsel %vm3859_vm5, %v3881_v5, %v3883_v53 }
  0xb8   : > { %4964 = vmatprep.mubr.bf16.mxu1 %v6273_v37  ;;  %5192 = vmatprep.mubr.bf16.mxu0 %v3077_v58  ;;  %v3081_v37 = vsel %vm2587_vm1, %v3078_v61, %v3080_v18  ;;  %v3086_v58 = vrot.slane %v5791_v42, 2  ;;  %v3885_v61 = vrot.slane %v6434_v4, 3  ;;  %v3404_v18 = vor.u32 %v3403_v17, %v3400_v34  ;;  %v5798_v17 = vld [vmem:[%s6941_s1 + $0x208] sm:$0xff]  }
  0xb9   : > { %4998 = vmatprep.subr.bf16.mxu1 %v5785_v35  ;;  %v3085_v13 = vsel %vm2587_vm1, %v3082_v21, %v3084_v3  ;;  %v3437_v42 = vshll.u32 %v6305_v57, 16 }
  0xbb   : > { %4999 = vmatpush3.bf16.msra.mxu1 %v5785_v35  ;;  %v3410_v35 = vshll.u32 %v6231_v0, 16  ;;  %v3087_v0 = vsel %vm2587_vm1, %v3084_v3, %v3086_v58  ;;  %v3425_v3 = vshrl.u32 %v6281_v45, 16  ;;  %v3439_v34 = vrot.slane %v3437_v42, 3  ;;  %v5803_v42 = vld [vmem:[%s6941_s1 + $0x220] sm:$0xff]  }
  0xbc   : > { %5000 = vmatprep.subr.bf16.mxu1 %v5789_v1 }
  0xbd   : > { %v3412_v21 = vrot.slane %v3410_v35, 3  ;;  %v3446_v35 = vshll.u32 %v6339_v24, 16 }
  0xbe   : > { %4965 = vmatmul.mubr.bf16.gmra.mrb[4].mxu1 %v6277_v62  ;;  %v5795_v62 = vld [vmem:[%s6941_s1 + $0xe0] sm:$0xff]  }
  0xbf   : > { %5193 = vmatmul.mubr.bf16.gmra.mrb[24].mxu0 %v3079_v63  ;;  %4968 = vmatprep.mubr.bf16.mxu1 %v6289_v8  ;;  %v3879_v8 = vrot.slane %v6399_v25, 3  ;;  %v3416_v63 = vshrl.u32 %v6248_v26, 16 }
  0xc0   : > { %5196 = vmatprep.mubr.bf16.mxu0 %v3081_v37  ;;  %5001 = vmatpush3.bf16.msra.mxu1 %v5789_v1  ;;  %v3396_v1 = vor.u32 %v3395_v56, %v3392_v44  ;;  %v6538_v37 = vsel %vm3859_vm5, %v3883_v53, %v3885_v61  ;;  %v3427_v44 = vrot.slane %v3425_v3, 2  ;;  %v3461_v3 = vshrl.u32 %v6378_v38, 16 }
  0xc1   : > { %5002 = vmatprep.subr.bf16.mxu1 %v5793_v6  ;;  %v6516_v59 = vsel %vm3859_vm5, %v3879_v8, %v3881_v5  ;;  %v3418_v14 = vrot.slane %v3416_v63, 2  ;;  %v3428_v5 = vshll.u32 %v6281_v45, 16  ;;  %v3455_v63 = vshll.u32 %v6348_v32, 16 }
  0xc2   : > { %v3405_v23 = vsel %vm3388_vm4, %v3396_v1, %v3404_v18 }
  0xc4   : > { %5003 = vmatpush3.bf16.msra.mxu1 %v5793_v6  ;;  %v3409_v6 = vrot.slane %v3407_v46, 2  ;;  %v3443_v46 = vshrl.u32 %v6339_v24, 16 }
  0xc5   : > { %5004 = vmatprep.subr.bf16.mxu1 %v5795_v62 }
  0xc6   : > { %4969 = vmatmul.mubr.bf16.gmra.mrb[8].mxu1 %v6300_v27  ;;  %v3419_v27 = vshll.u32 %v6248_v26, 16 }
  0xc7   : > { %5197 = vmatmul.mubr.bf16.gmra.mrb[28].mxu0 %v3083_v36  ;;  %4972 = vmatprep.mubr.bf16.mxu1 %v6316_v55  ;;  %v5799_v55 = vld [vmem:[%s6941_s1 + $0xf0] sm:$0xff]  }
  0xc8   : > { %5200 = vmatprep.mubr.bf16.mxu0 %v3085_v13  ;;  %5005 = vmatpush3.bf16.msra.mxu1 %v5795_v62  ;;  %v3421_v43 = vrot.slane %v3419_v27, 3  ;;  %v3413_v62 = vor.u32 %v3412_v21, %v3409_v6  ;;  %v3434_v13 = vshrl.u32 %v6305_v57, 16  ;;  %v6573_v27 = vld [vmem:[%s5919_s18 + $0xa0] ss:$0 sps:$4 sm:$0x77]  }
  0xc9   : > { %5006 = vmatprep.subr.bf16.mxu1 %v5797_v51  ;;  %v3895_v6 = vrot.slane %v6573_v27, 3 }
  0xca   : > { %v3422_v36 = vor.u32 %v3421_v43, %v3418_v14  ;;  %v3414_v53 = vsel %vm3388_vm4, %v3404_v18, %v3413_v62  ;;  %v3436_v56 = vrot.slane %v3434_v13, 2  ;;  %v3452_v18 = vshrl.u32 %v6348_v32, 16  ;;  %v5802_v43 = vld [vmem:[%s6941_s1 + $0x218] sm:$0xff]  }
  0xcb   : > { %v3457_v14 = vrot.slane %v3455_v63, 3  ;;  %v3470_v13 = vshrl.u32 %v6383_v19, 16 }
  0xcc   : > { %5007 = vmatpush3.bf16.msra.mxu1 %v5797_v51  ;;  %v6559_v51 = vld [vmem:[%s6941_s1 + $0x100] sm:$0xff]   ;;  %v3440_v1 = vor.u32 %v3439_v34, %v3436_v56  ;;  %v5804_v34 = vld [vmem:[%s6941_s1 + $0x228] sm:$0xff]  }
  0xcd   : > { %5008 = vmatprep.subr.bf16.mxu1 %v5799_v55 }
  0xce   : > { %4973 = vmatmul.mubr.bf16.gmra.mrb[12].mxu1 %v6320_v7  ;;  %v3430_v7 = vrot.slane %v3428_v5, 3  ;;  %v3464_v5 = vshll.u32 %v6378_v38, 16 }
  0xcf   : > { %5201 = vmatmul.mubr.bf16.gmra.mrb[32].mxu0 %v3087_v0  ;;  %4976 = vmatprep.mubr.bf16.mxu1 %v6333_v22  ;;  %v3423_v22 = vsel %vm3388_vm4, %v3413_v62, %v3422_v36  ;;  %v3448_v0 = vrot.slane %v3446_v35, 3 }
  0xd0   : > { %5220 = vmatprep.mubr.bf16.mxu0 %v3405_v23  ;;  %5009 = vmatpush3.bf16.msra.mxu1 %v5799_v55  ;;  %v3431_v58 = vor.u32 %v3430_v7, %v3427_v44  ;;  %v3445_v55 = vrot.slane %v3443_v46, 2  ;;  %v3454_v23 = vrot.slane %v3452_v18, 2  ;;  %v3466_v44 = vrot.slane %v3464_v5, 3  ;;  %v5806_v46 = vld [vmem:[%s6941_s1 + $0x230] sm:$0xff]  }
  0xd1   : > { %5010 = vmatprep.subr.bf16.mxu1 %v5801_v29  ;;  %v5811_v18 = vld [vmem:[%s5919_s18 + $0x10] sm:$0xff]  }
  0xd2   : > { %v3441_v21 = vsel %vm3388_vm4, %v3431_v58, %v3440_v1  ;;  %v3449_v62 = vor.u32 %v3448_v0, %v3445_v55  ;;  %v1780_v63 = vrot.slane %v5811_v18, 1  ;;  %v3518_v55 = vshll.u32 %v6469_v12, 16  ;;  %v5813_v0 = vld [vmem:[%s5919_s18 + $0x20] sm:$0xff]  }
  0xd4   : > { %5011 = vmatpush3.bf16.msra.mxu1 %v5801_v29 }
  0xd5   : > { %5308 = vmatprep.subr.bf16.mxu1 %v6559_v51 }
  0xd6   : > { %4977 = vmatmul.mubr.bf16.gmra.mrb[16].mxu1 %v6354_v48  ;;  %v5800_v48 = vld [vmem:[%s6941_s1 + $0x210] sm:$0xff]  }
  0xd7   : > { %5221 = vmatmul.mubr.bf16.vlgmr.msra.gmra.mrb[0].mxu0 %v3414_v53  ;;  %4980 = vmatprep.mubr.bf16.mxu1 %v6358_v39  ;;  %v3893_v39 = vrot.slane %v6491_v11, 3  ;;  %v3450_v53 = vsel %vm3388_vm4, %v3440_v1, %v3449_v62 }
  0xd8   : > { %5224 = vmatprep.mubr.bf16.mxu0 %v3423_v22  ;;  %5257 = vmatpush3.bf16.msra.mxu0 %v6441_v9  ;;  %v3432_v9 = vsel %vm3388_vm4, %v3422_v36, %v3431_v58  ;;  %v3458_v36 = vor.u32 %v3457_v14, %v3454_v23  ;;  %v3472_v22 = vrot.slane %v3470_v13, 2  ;;  %v3520_v14 = vrot.slane %v3518_v55, 3  ;;  %v5815_v13 = vld [vmem:[%s5919_s18 + $0x30] sm:$0xff]  }
  0xd9   : > { %5258 = vmatprep.subr.bf16.mxu0 %v5798_v17  ;;  %v6586_v29 = vsel %vm3859_vm5, %v3893_v39, %v3895_v6  ;;  %v1784_v6 = vrot.slane %v5813_v0, 1 }
  0xda   : > { %v3459_v7 = vsel %vm3388_vm4, %v3449_v62, %v3458_v36 }
  0xdc   : > { %5259 = vmatpush3.bf16.msra.mxu0 %v5798_v17 }
  0xdd   : > { %5260 = vmatprep.subr.bf16.mxu0 %v5800_v48 }
  0xde   : > { %4981 = vmatmul.mubr.bf16.gmra.mrb[20].mxu1 %v6369_v49  ;;  %v3473_v49 = vshll.u32 %v6383_v19, 16 }
  0xdf   : > { %5225 = vmatmul.mubr.bf16.gmra.mrb[4].mxu0 %v3432_v9  ;;  %4984 = vmatprep.mubr.bf16.mxu1 %v6372_v50  ;;  %v3463_v50 = vrot.slane %v3461_v3, 2  ;;  %v5814_v3 = vld [vmem:[%s5919_s18 + $0x28] sm:$0xff]  }
  0xe0   : > { %5228 = vmatprep.mubr.bf16.mxu0 %v3441_v21  ;;  %5261 = vmatpush3.bf16.msra.mxu0 %v5800_v48  ;;  %v3475_v56 = vrot.slane %v3473_v49, 3  ;;  %v3527_v21 = vshll.u32 %v6476_v60, 16  ;;  %v1786_v5 = vrot.slane %v5814_v3, 1  ;;  %v1788_v49 = vrot.slane %v5815_v13, 1 }
  0xe1   : > { %5262 = vmatprep.subr.bf16.mxu0 %v5802_v43  ;;  %v3467_v17 = vor.u32 %v3466_v44, %v3463_v50  ;;  %v5816_v50 = vld [vmem:[%s6941_s1 + $0x108] sm:$0xff]   ;;  %v3545_v44 = vshll.u32 %v6491_v11, 16 }
  0xe2   : > { %v3476_v58 = vor.u32 %v3475_v56, %v3472_v22  ;;  %v1789_v22 = vsel %vm1315_vm2, %v1786_v5, %v1788_v49 }
  0xe3   : > { %v3468_v35 = vsel %vm3388_vm4, %v3458_v36, %v3467_v17 }
  0xe4   : > { %5263 = vmatpush3.bf16.msra.mxu0 %v5802_v43  ;;  %v3477_v1 = vsel %vm3388_vm4, %v3467_v17, %v3476_v58  ;;  %v3486_v48 = vsel %vm3388_vm4, %v3476_v58, %v6445_v31  ;;  %v3524_v31 = vshrl.u32 %v6476_v60, 16  ;;  %v5817_v17 = vld [vmem:[%s6941_s1 + $0x110] sm:$0xff]  }
  0xe5   : > { %5264 = vmatprep.subr.bf16.mxu0 %v5803_v42 }
  0xe6   : > { %4985 = vmatmul.mubr.bf16.gmra.mrb[24].mxu1 %v6391_v10  ;;  %v5807_v10 = vld [vmem:[%s6941_s1 + $0x238] sm:$0xff]   ;;  %v3526_v62 = vrot.slane %v3524_v31, 2 }
  0xe7   : > { %5229 = vmatmul.mubr.bf16.gmra.mrb[8].mxu0 %v3450_v53  ;;  %4988 = vmatprep.mubr.bf16.mxu1 %v6395_v20  ;;  %v1779_v20 = vrot.slane %v5933_v16, 1  ;;  %v3515_v16 = vshrl.u32 %v6469_v12, 16  ;;  %v3536_v53 = vshll.u32 %v6488_v15, 16 }
  0xe8   : > { %5232 = vmatprep.mubr.bf16.mxu0 %v3459_v7  ;;  %5265 = vmatpush3.bf16.msra.mxu0 %v5803_v42  ;;  %v3533_v42 = vshrl.u32 %v6488_v15, 16 }
  0xe9   : > { %5266 = vmatprep.subr.bf16.mxu0 %v5804_v34  ;;  %v1781_v9 = vsel %vm1315_vm2, %v1779_v20, %v1780_v63  ;;  %v3517_v23 = vrot.slane %v3515_v16, 2  ;;  %v5819_v20 = vld [vmem:[%s5919_s18 + $0x40] sm:$0xff]  }
  0xea   : > { %v3535_v56 = vrot.slane %v3533_v42, 2  ;;  %v1792_v18 = vrot.slane %v5819_v20, 1  ;;  %v3867_v20 = vrot.slane %v6281_v45, 3 }
  0xeb   : > { %v3521_v36 = vor.u32 %v3520_v14, %v3517_v23  ;;  %v5822_v23 = vld [vmem:[%s6941_s1 + $0x120] sm:$0xff]   ;;  %v5823_v14 = vld [vmem:[%s5919_s18 + $0x48] sm:$0xff]  }
  0xec   : > { %5267 = vmatpush3.bf16.msra.mxu0 %v5804_v34  ;;  %v3538_v34 = vrot.slane %v3536_v53, 3 }
  0xed   : > { %5268 = vmatprep.subr.bf16.mxu0 %v5806_v46  ;;  %v3522_v7 = vsel %vm3388_vm4, %v6459_v28, %v3521_v36 }
  0xee   : > { %4989 = vmatmul.mubr.bf16.gmra.mrb[28].mxu1 %v6406_v30  ;;  %v5812_v30 = vld [vmem:[%s5919_s18 + $0x18] sm:$0xff]  }
  0xef   : > { %5233 = vmatmul.mubr.bf16.gmra.mrb[12].mxu0 %v3468_v35  ;;  %4992 = vmatprep.mubr.bf16.mxu1 %v6409_v33  ;;  %v1782_v33 = vrot.slane %v5812_v30, 1  ;;  %v3547_v35 = vrot.slane %v3545_v44, 3  ;;  %v5820_v30 = vld [vmem:[%s6941_s1 + $0x118] sm:$0xff]  }
  0xf0   : > { %5236 = vmatprep.mubr.bf16.mxu0 %v3477_v1  ;;  %5269 = vmatpush3.bf16.msra.mxu0 %v5806_v46  ;;  %v5818_v1 = vld [vmem:[%s5919_s18 + $0x38] sm:$0xff]  }
  0xf1   : > { %5270 = vmatprep.subr.bf16.mxu0 %v5807_v10  ;;  %v1785_v43 = vsel %vm1315_vm2, %v1782_v33, %v1784_v6  ;;  %v1790_v28 = vrot.slane %v5818_v1, 1  ;;  %v6681_v44 = vld [vmem:[%s5919_s18 + $0x58] sm:$0xff]  }
  0xf3   : > { %v1791_v16 = vsel %vm1315_vm2, %v1788_v49, %v1790_v28  ;;  %v1793_v0 = vsel %vm1315_vm2, %v1790_v28, %v1792_v18  ;;  %v5826_v49 = vld [vmem:[%s6941_s1 + $0x128] sm:$0xff]  }
  0xf4   : > { %5271 = vmatpush3.bf16.msra.mxu0 %v5807_v10  ;;  %v3539_v10 = vor.u32 %v3538_v34, %v3535_v56  ;;  %v6686_v56 = vld [vmem:[%s5919_s18 + $0x60] sm:$0xff]  }
  0xf5   : > { %v1800_v34 = vrot.slane %v6686_v56, 1 }
  0xf6   : > { %4993 = vmatmul.mubr.bf16.gmra.mrb[32].mxu1 %v6427_v52  ;;  %v1783_v52 = vsel %vm1315_vm2, %v1780_v63, %v1782_v33  ;;  %v3551_v63 = vshrl.u32 %v6573_v27, 16  ;;  %v3838_v33 = vld [vmem:[%s5919_s18 + $0x10] sm:$0x8] }
  0xf7   : > { %5237 = vmatmul.mubr.bf16.gmra.mrb[16].mxu0 %v3486_v48  ;;  %5012 = vmatprep.mubr.bf16.mxu1 %v1781_v9  ;;  %v3554_v48 = vshll.u32 %v6573_v27, 16 }
  0xf8   : > { %5240 = vmatprep.mubr.bf16.mxu0 %v6453_v2  ;;  %v3529_v2 = vrot.slane %v3527_v21, 3  ;;  %v5821_v21 = vld [vmem:[%s5919_s18 + $0x14] sm:$0xf] }
  0xf9   : > { %v3556_v31 = vrot.slane %v3554_v48, 3  ;;  %v3869_v48 = vrot.slane %v6305_v57, 3  ;;  %v3871_v57 = vrot.slane %v6339_v24, 3 }
  0xfe   : > { %5013 = vmatmul.mubr.bf16.vlgmr.msra.gmra.mrb[0].mxu1 %v1783_v52  ;;  %v4595_v52 = vcombine.low %v3838_v33, %v5821_v21  ;;  %v3872_v21 = vsel %vm3859_vm5, %v3869_v48, %v3871_v57 }
  0xff   : > { %5241 = vmatmul.mubr.bf16.gmra.mrb[20].mxu0 %v6456_v47  ;;  %5316 = vmatpush3.bf16.msra.mxu1 %v6559_v51  ;;  %v3530_v47 = vor.u32 %v3529_v2, %v3526_v62  ;;  %v3542_v51 = vshrl.u32 %v6491_v11, 16  ;;  %v6666_v2 = vld [vmem:[%s5919_s18 + $0x50] sm:$0xff]  }
 0x100   : > { %5016 = vmatprep.mubr.bf16.mxu1 %v1785_v43  ;;  %5244 = vmatprep.mubr.bf16.mxu0 %v6465_v54  ;;  %v1787_v54 = vsel %vm1315_vm2, %v1784_v6, %v1786_v5  ;;  %v3553_v6 = vrot.slane %v3551_v63, 2  ;;  %v1794_v43 = vrot.slane %v5823_v14, 1  ;;  %v1796_v3 = vrot.slane %v6666_v2, 1  ;;  %v6726_v14 = vld [vmem:[%s5919_s18 + $0x88] sm:$0xff]  }
 0x101   : > { %5309 = vmatprep.subr.bf16.mxu1 %v5816_v50  ;;  %v3531_v58 = vsel %vm3388_vm4, %v3521_v36, %v3530_v47  ;;  %v3544_v46 = vrot.slane %v3542_v51, 2  ;;  %v3540_v55 = vsel %vm3388_vm4, %v3530_v47, %v3539_v10  ;;  %v3860_v5 = vrot.slane %v4595_v52, 3  ;;  %v5825_v36 = vld [vmem:[%s5919_s18 + $0x18] sm:$0xff]   ;;  %v5827_v51 = vld [vmem:[%s6941_s1 + $0x130] sm:$0xff]  }
 0x102   : > { %v3557_v62 = vor.u32 %v3556_v31, %v3553_v6  ;;  %v3861_v13 = vrot.slane %v5825_v36, 3  ;;  %v1795_v42 = vsel %vm1315_vm2, %v1792_v18, %v1794_v43  ;;  %v6703_v18 = vld [vmem:[%s5919_s18 + $0x70] sm:$0xff]   ;;  %v3873_v31 = vrot.slane %v6348_v32, 3 }
 0x103   : > { %5317 = vmatpush3.bf16.msra.mxu1 %v5816_v50  ;;  %v3548_v9 = vor.u32 %v3547_v35, %v3544_v46  ;;  %v1797_v50 = vsel %vm1315_vm2, %v1794_v43, %v1796_v3  ;;  %v1804_v63 = vrot.slane %v6703_v18, 1  ;;  %v1810_v24 = vrot.slane %v6726_v14, 1  ;;  %v6731_v32 = vld [vmem:[%s5919_s18 + $0x90] sm:$0xff]  }
 0x104   : > { %5310 = vmatprep.subr.bf16.mxu1 %v5817_v17  ;;  %v3862_v47 = vsel %vm3859_vm5, %v3860_v5, %v3861_v13  ;;  %v3875_v43 = vrot.slane %v6378_v38, 3  ;;  %v2201_v5 = vshll.u32 %v6666_v2, 16  ;;  %v3877_v36 = vrot.slane %v6383_v19, 3 }
 0x105   : > { %v3549_v27 = vsel %vm3388_vm4, %v3539_v10, %v3548_v9  ;;  %v3558_v53 = vsel %vm3388_vm4, %v3548_v9, %v3557_v62  ;;  %v6698_v10 = vld [vmem:[%s5919_s18 + $0x68] sm:$0xff]   ;;  %v1812_v62 = vrot.slane %v6731_v32, 1  ;;  %v2234_v25 = vshrl.u32 %v6703_v18, 16 }
 0x106   : > { %5017 = vmatmul.mubr.bf16.gmra.mrb[4].mxu1 %v1787_v54  ;;  %v1798_v54 = vrot.slane %v6681_v44, 1  ;;  %v3878_v38 = vsel %vm3859_vm5, %v3875_v43, %v3877_v36 }
 0x107   : > { %5245 = vmatmul.mubr.bf16.gmra.mrb[24].mxu0 %v3522_v7  ;;  %5020 = vmatprep.mubr.bf16.mxu1 %v1789_v22  ;;  %v5829_v7 = vld [vmem:[%s5919_s18 + $0x20] sm:$0xff]  }
 0x108   : > { %5248 = vmatprep.mubr.bf16.mxu0 %v3531_v58  ;;  %5318 = vmatpush3.bf16.msra.mxu1 %v5817_v17  ;;  %v3863_v22 = vrot.slane %v5829_v7, 3  ;;  %v3865_v17 = vrot.slane %v6248_v26, 3  ;;  %v5831_v58 = vld [vmem:[%s6941_s1 + $0x138] sm:$0xff]   ;;  %v1799_v46 = vsel %vm1315_vm2, %v1796_v3, %v1798_v54  ;;  %v1801_v1 = vsel %vm1315_vm2, %v1798_v54, %v1800_v34 }
 0x109   : > { %5311 = vmatprep.subr.bf16.mxu1 %v5820_v30  ;;  %v1802_v26 = vrot.slane %v6698_v10, 1  ;;  %v2198_v3 = vshrl.u32 %v6666_v2, 16  ;;  %v2207_v54 = vshrl.u32 %v6681_v44, 16  ;;  %v2210_v2 = vshll.u32 %v6681_v44, 16 }
 0x10a   : > { %v3864_v35 = vsel %vm3859_vm5, %v3861_v13, %v3863_v22  ;;  %v3866_v28 = vsel %vm3859_vm5, %v3863_v22, %v3865_v17  ;;  %v2216_v7 = vshrl.u32 %v6686_v56, 16  ;;  %v2219_v22 = vshll.u32 %v6686_v56, 16 }
 0x10b   : > { %v1803_v9 = vsel %vm1315_vm2, %v1800_v34, %v1802_v26  ;;  %v1805_v33 = vsel %vm1315_vm2, %v1802_v26, %v1804_v63  ;;  %v2225_v26 = vshrl.u32 %v6698_v10, 16  ;;  %v2228_v56 = vshll.u32 %v6698_v10, 16 }
 0x10c   : > { %5319 = vmatpush3.bf16.msra.mxu1 %v5820_v30  ;;  %v3868_v30 = vsel %vm3859_vm5, %v3865_v17, %v3867_v20  ;;  %v2209_v17 = vrot.slane %v2207_v54, 1 }
 0x10d   : > { %5312 = vmatprep.subr.bf16.mxu1 %v5822_v23 }
 0x10e   : > { %5021 = vmatmul.mubr.bf16.gmra.mrb[8].mxu1 %v1791_v16  ;;  %v3870_v16 = vsel %vm3859_vm5, %v3867_v20, %v3869_v48  ;;  %v2230_v48 = vrot.slane %v2228_v56, 2 }
 0x10f   : > { %5249 = vmatmul.mubr.bf16.gmra.mrb[28].mxu0 %v3540_v55  ;;  %5024 = vmatprep.mubr.bf16.mxu1 %v1793_v0  ;;  %v6712_v55 = vld [vmem:[%s5919_s18 + $0x78] sm:$0xff]   ;;  %v6717_v0 = vld [vmem:[%s5919_s18 + $0x80] sm:$0xff]  }
 0x110   : > { %5252 = vmatprep.mubr.bf16.mxu0 %v3549_v27  ;;  %5320 = vmatpush3.bf16.msra.mxu1 %v5822_v23  ;;  %v1806_v45 = vrot.slane %v6712_v55, 1  ;;  %v1808_v6 = vrot.slane %v6717_v0, 1  ;;  %v3874_v23 = vsel %vm3859_vm5, %v3871_v57, %v3873_v31  ;;  %v2252_v57 = vshrl.u32 %v6717_v0, 16 }
 0x111   : > { %5313 = vmatprep.subr.bf16.mxu1 %v5826_v49 }
 0x112   : > { %v1807_v27 = vsel %vm1315_vm2, %v1804_v63, %v1806_v45  ;;  %v1809_v52 = vsel %vm1315_vm2, %v1806_v45, %v1808_v6  ;;  %v1811_v13 = vsel %vm1315_vm2, %v1808_v6, %v1810_v24  ;;  %v2255_v6 = vshll.u32 %v6717_v0, 16 }
 0x114   : > { %5321 = vmatpush3.bf16.msra.mxu1 %v5826_v49  ;;  %v5809_v49 = vld [vmem:[%s5919_s18 + $0x98] ss:$0 sps:$4 sm:$0x11]  }
 0x115   : > { %5314 = vmatprep.subr.bf16.mxu1 %v5827_v51 }
 0x116   : > { %5025 = vmatmul.mubr.bf16.gmra.mrb[12].mxu1 %v1795_v42  ;;  %v3876_v42 = vsel %vm3859_vm5, %v3873_v31, %v3875_v43  ;;  %v3889_v31 = vrot.slane %v6476_v60, 3  ;;  %v2261_v60 = vshrl.u32 %v6726_v14, 16  ;;  %v3891_v43 = vrot.slane %v6488_v15, 3 }
 0x117   : > { %5253 = vmatmul.mubr.bf16.gmra.mrb[32].mxu0 %v3558_v53  ;;  %5028 = vmatprep.mubr.bf16.mxu1 %v1797_v50  ;;  %v1813_v53 = vsel %vm1315_vm2, %v1810_v24, %v1812_v62  ;;  %v2200_v50 = vrot.slane %v2198_v3, 1  ;;  %v2264_v24 = vshll.u32 %v6726_v14, 16 }
 0x118   : > { %5272 = vmatprep.mubr.bf16.mxu0 %v3862_v47  ;;  %5322 = vmatpush3.bf16.msra.mxu1 %v5827_v51  ;;  %v2203_v47 = vrot.slane %v2201_v5, 2  ;;  %v1814_v51 = vrot.slane %v5809_v49, 1  ;;  %v2263_v5 = vrot.slane %v2261_v60, 1  ;;  %v3894_v15 = vsel %vm3859_vm5, %v3891_v43, %v3893_v39 }
 0x119   : > { %5315 = vmatprep.subr.bf16.mxu1 %v5831_v58 }
 0x11a   : > { %v2204_v19 = vor.u32 %v2203_v47, %v2200_v50  ;;  %v1815_v34 = vsel %vm1315_vm2, %v1812_v62, %v1814_v51  ;;  %v2273_v62 = vshll.u32 %v6731_v32, 16  ;;  %v5838_v50 = vld [vmem:[%s5919_s18 + $0x98] ss:$0 sps:$4 sm:$0x33]   ;;  %s5649_s18 = smul.u32 288, %s6946_s16 }
 0x11b   : > { %v2282_v47 = vshll.u32 %v5838_v50, 16 }
 0x11c   : > { %5323 = vmatpush3.bf16.msra.mxu1 %v5831_v58  ;;  %v2212_v58 = vrot.slane %v2210_v2, 2  ;;  %s6801_s21 = scalar_lea.vmem %s6943_s3, %s5649_s18  ;;  %s6830_s25 = scalar_lea.vmem %s6944_s4, %s5649_s18 }
 0x11d   : > { %v2284_v2 = vrot.slane %v2282_v47, 2 }
 0x11e   : > { %5029 = vmatmul.mubr.bf16.gmra.mrb[16].mxu1 %v1799_v46  ;;  %v3880_v46 = vsel %vm3859_vm5, %v3877_v36, %v3879_v8  ;;  %v2213_v44 = vor.u32 %v2212_v58, %v2209_v17  ;;  %v2237_v8 = vshll.u32 %v6703_v18, 16  ;;  %v3887_v18 = vrot.slane %v6469_v12, 3 }
 0x11f   : > { %5273 = vmatmul.mubr.bf16.vlgmr.msra.gmra.mrb[0].mxu0 %v3864_v35  ;;  %5032 = vmatprep.mubr.bf16.mxu1 %v1801_v1  ;;  %v2205_v35 = vsel %vm2116_vm0, %v6035_v40, %v2204_v19  ;;  %v2218_v1 = vrot.slane %v2216_v7, 1  ;;  %v2227_v40 = vrot.slane %v2225_v26, 1  ;;  %v2266_v36 = vrot.slane %v2264_v24, 2 }
 0x120   : > { %5276 = vmatprep.mubr.bf16.mxu0 %v3866_v28  ;;  %v2221_v28 = vrot.slane %v2219_v22, 2  ;;  %v2214_v63 = vsel %vm2116_vm0, %v2204_v19, %v2213_v44  ;;  %v3890_v12 = vsel %vm3859_vm5, %v3887_v18, %v3889_v31 }
 0x121   : > { %v2231_v10 = vor.u32 %v2230_v48, %v2227_v40  ;;  %v2267_v14 = vor.u32 %v2266_v36, %v2263_v5  ;;  %v222_v48 = vld [vmem:[%s6801_s21 + $0x18] sm:$0xff] }
 0x122   : > { %v2222_v20 = vor.u32 %v2221_v28, %v2218_v1 }
 0x126   : > { %5033 = vmatmul.mubr.bf16.gmra.mrb[20].mxu1 %v1803_v9  ;;  %v2223_v9 = vsel %vm2116_vm0, %v2213_v44, %v2222_v20 }
 0x127   : > { %5277 = vmatmul.mubr.bf16.gmra.mrb[4].mxu0 %v3868_v30  ;;  %5036 = vmatprep.mubr.bf16.mxu1 %v1805_v33  ;;  %v2236_v30 = vrot.slane %v2234_v25, 1  ;;  %v2239_v33 = vrot.slane %v2237_v8, 2  ;;  %v6809_v25 = vld [vmem:[%s6942_s2] ss:$0 sm:$0xff] }
 0x128   : > { %5280 = vmatprep.mubr.bf16.mxu0 %v3870_v16  ;;  %v2246_v16 = vshll.u32 %v6712_v55, 16 }
 0x129   : > { %v2240_v45 = vor.u32 %v2239_v33, %v2236_v30  ;;  %v220_v33 = vld [vmem:[%s6801_s21 + $0x8] sm:$0xff] }
 0x12e   : > { %5037 = vmatmul.mubr.bf16.gmra.mrb[24].mxu1 %v1807_v27  ;;  %v2232_v27 = vsel %vm2116_vm0, %v2222_v20, %v2231_v10  ;;  %v221_v20 = vld [vmem:[%s6801_s21 + $0x10] sm:$0xff] }
 0x12f   : > { %5281 = vmatmul.mubr.bf16.gmra.mrb[8].mxu0 %v3872_v21  ;;  %5040 = vmatprep.mubr.bf16.mxu1 %v1809_v52  ;;  %v2248_v21 = vrot.slane %v2246_v16, 2  ;;  %v3888_v52 = vsel %vm3859_vm5, %v3885_v61, %v3887_v18  ;;  %v2270_v61 = vshrl.u32 %v6731_v32, 16  ;;  %v2279_v32 = vshrl.u32 %v5838_v50, 16  ;;  %v227_v50 = vld [vmem:[%s6801_s21 + $0x40] sm:$0xff] }
 0x130   : > { %5284 = vmatprep.mubr.bf16.mxu0 %v3874_v23  ;;  %v2257_v23 = vrot.slane %v2255_v6, 2  ;;  %v264_v30 = vadd.f32 %v6809_v25, %v221_v20  ;;  %v263_v16 = vadd.f32 %v6809_v25, %v220_v33 }
 0x131   : > { %v2281_v54 = vrot.slane %v2279_v32, 1 }
 0x133   : > { %v2285_v11 = vor.u32 %v2284_v2, %v2281_v54 }
 0x136   : > { %5041 = vmatmul.mubr.bf16.gmra.mrb[28].mxu1 %v1811_v13  ;;  %v3892_v13 = vsel %vm3859_vm5, %v3889_v31, %v3891_v43 }
 0x137   : > { %5285 = vmatmul.mubr.bf16.gmra.mrb[12].mxu0 %v3876_v42  ;;  %5044 = vmatprep.mubr.bf16.mxu1 %v1813_v53  ;;  %v2272_v42 = vrot.slane %v2270_v61, 1  ;;  %v2275_v53 = vrot.slane %v2273_v62, 2 }
 0x138   : > { %5288 = vmatprep.mubr.bf16.mxu0 %v3878_v38 }
 0x139   : > { %v2276_v38 = vor.u32 %v2275_v53, %v2272_v42  ;;  %v229_v53 = vld [vmem:[%s6801_s21 + $0x50] sm:$0xff] }
 0x13b   : > { %v2277_v19 = vsel %vm2116_vm0, %v2267_v14, %v2276_v38  ;;  %v2286_v39 = vsel %vm2116_vm0, %v2276_v38, %v2285_v11  ;;  %v228_v11 = vld [vmem:[%s6801_s21 + $0x48] sm:$0xff] }
 0x13e   : > { %5045 = vmatmul.mubr.bf16.gmra.mrb[32].mxu1 %v1815_v34 }
 0x13f   : > { %5289 = vmatmul.mubr.bf16.gmra.mrb[16].mxu0 %v3880_v46  ;;  %5080 = vmatprep.mubr.bf16.mxu1 %v2205_v35 }
 0x140   : > { %5292 = vmatprep.mubr.bf16.mxu0 %v6516_v59  ;;  %v2243_v59 = vshrl.u32 %v6712_v55, 16  ;;  %v2241_v55 = vsel %vm2116_vm0, %v2231_v10, %v2240_v45 }
 0x146   : > { %5081 = vmatmul.mubr.bf16.vlgmr.msra.gmra.mrb[16].mxu1 %v2214_v63  ;;  %v219_v63 = vld [vmem:[%s6801_s21] sm:$0xff] }
 0x147   : > { %5293 = vmatmul.mubr.bf16.gmra.mrb[20].mxu0 %v6524_v41  ;;  %5084 = vmatprep.mubr.bf16.mxu1 %v2223_v9  ;;  %v2245_v41 = vrot.slane %v2243_v59, 1  ;;  %v262_v10 = vadd.f32 %v6809_v25, %v219_v63  ;;  %v265_v59 = vadd.f32 %v6809_v25, %v222_v48 }
 0x148   : > { %5296 = vmatprep.mubr.bf16.mxu0 %v6538_v37  ;;  %v2254_v37 = vrot.slane %v2252_v57, 1  ;;  %v225_v57 = vld [vmem:[%s6801_s21 + $0x30] sm:$0xff] }
 0x149   : > { %v2249_v0 = vor.u32 %v2248_v21, %v2245_v41 }
 0x14a   : > { %v2258_v4 = vor.u32 %v2257_v23, %v2254_v37 }
 0x14b   : > { %v2250_v3 = vsel %vm2116_vm0, %v2240_v45, %v2249_v0 }
 0x14c   : > { %v2259_v49 = vsel %vm2116_vm0, %v2249_v0, %v2258_v4  ;;  %v2268_v51 = vsel %vm2116_vm0, %v2258_v4, %v2267_v14  ;;  %v224_v0 = vld [vmem:[%s6801_s21 + $0x28] sm:$0xff] }
 0x14d   : > { %v267_v36 = vadd.f32 %v6809_v25, %v224_v0 }
 0x14e   : > { %5085 = vmatmul.mubr.bf16.gmra.mrb[20].mxu1 %v2232_v27  ;;  %v223_v27 = vld [vmem:[%s6801_s21 + $0x20] sm:$0xff] }
 0x14f   : > { %5297 = vmatmul.mubr.bf16.gmra.mrb[24].mxu0 %v3888_v52  ;;  %5088 = vmatprep.mubr.bf16.mxu1 %v2241_v55  ;;  %v226_v55 = vld [vmem:[%s6801_s21 + $0x38] sm:$0xff]  ;;  %v266_v4 = vadd.f32 %v6809_v25, %v223_v27  ;;  %v232_v27 = vld [vmem:[%s6801_s21 + $0x68] sm:$0xff] }
 0x150   : > { %5300 = vmatprep.mubr.bf16.mxu0 %v3890_v12  ;;  %v268_v12 = vadd.f32 %v6809_v25, %v225_v57  ;;  %v234_v57 = vld [vmem:[%s6801_s21 + $0x78] sm:$0xff] }
 0x156   : > { %5089 = vmatmul.mubr.bf16.gmra.mrb[24].mxu1 %v2250_v3  ;;  %v269_v3 = vadd.f32 %v6809_v25, %v226_v55 }
 0x157   : > { %5301 = vmatmul.mubr.bf16.gmra.mrb[28].mxu0 %v3892_v13  ;;  %5092 = vmatprep.mubr.bf16.mxu1 %v2259_v49 }
 0x158   : > { %5304 = vmatprep.mubr.bf16.mxu0 %v3894_v15 }
 0x15e   : > { %5093 = vmatmul.mubr.bf16.gmra.mrb[28].mxu1 %v2268_v51  ;;  %v230_v51 = vld [vmem:[%s6801_s21 + $0x58] sm:$0xff] }
 0x15f   : > { %5305 = vmatmul.mubr.bf16.gmra.mrb[32].mxu0 %v6586_v29  ;;  %5096 = vmatprep.mubr.bf16.mxu1 %v2277_v19  ;;  %v272_v19 = vadd.f32 %v6809_v25, %v229_v53 }
 0x166   : > { %5097 = vmatmul.mubr.bf16.gmra.mrb[32].mxu1 %v2286_v39 }
 0x1d1   : > { %v5014_v7 = vpop.f32.mrb[0].mxu1 }
 0x1d2   : > { %v1916_v22 = vpop.f32.mrb[1].mxu1  ;;  %v5324_v18 = vadd.f32 %v5014_v7, %v264_v30  ;;  %v233_v30 = vld [vmem:[%s6801_s21 + $0x70] sm:$0xff] }
 0x1d3   : > { %v5015_v34 = vpop.f32.mrb[2].mxu1  ;;  %v5326_v45 = vadd.f32 %v1916_v22, %v262_v10 }
 0x1d4   : > { %v1919_v17 = vpop.f32.mrb[3].mxu1  ;;  %v5328_v31 = vadd.f32 %v5015_v34, %v265_v59  ;;  %v270_v34 = vadd.f32 %v6809_v25, %v227_v50  ;;  %v231_v59 = vld [vmem:[%s6801_s21 + $0x60] sm:$0xff] }
 0x1d5   : > { %v5330_v52 = vadd.f32 %v1919_v17, %v263_v16  ;;  %v235_v50 = vld [vmem:[%s6801_s21 + $0x80] sm:$0xff] }
 0x1d9   : > { %v5018_v58 = vpop.f32.mrb[4].mxu1 }
 0x1da   : > { %v1932_v46 = vpop.f32.mrb[5].mxu1  ;;  %v5332_v49 = vadd.f32 %v5018_v58, %v268_v12 }
 0x1db   : > { %v5019_v35 = vpop.f32.mrb[6].mxu1  ;;  %v5334_v42 = vadd.f32 %v1932_v46, %v266_v4  ;;  %v273_v46 = vadd.f32 %v6809_v25, %v230_v51  ;;  %v236_v51 = vld [vmem:[%s6801_s21 + $0x88] sm:$0xff] }
 0x1dc   : > { %v1935_v1 = vpop.f32.mrb[7].mxu1  ;;  %v5336_v14 = vadd.f32 %v5019_v35, %v269_v3 }
 0x1dd   : > { %v5338_v38 = vadd.f32 %v1935_v1, %v267_v36  ;;  %v271_v1 = vadd.f32 %v6809_v25, %v228_v11  ;;  %v279_v11 = vadd.f32 %v6809_v25, %v236_v51 }
 0x1e1   : > { %v6789_v28 = vpop.f32.mrb[8].mxu1 }
 0x1e2   : > { %v6791_v44 = vpop.f32.mrb[9].mxu1  ;;  %v5340_v63 = vadd.f32 %v6789_v28, %v272_v19  ;;  %v276_v28 = vadd.f32 %v6809_v25, %v233_v30 }
 0x1e3   : > { %v6794_v26 = vpop.f32.mrb[10].mxu1  ;;  %v5342_v48 = vadd.f32 %v6791_v44, %v270_v34 }
 0x1e4   : > { %v6796_v29 = vpop.f32.mrb[11].mxu1  ;;  %v5344_v10 = vadd.f32 %v6794_v26, %v273_v46  ;;  %v274_v26 = vadd.f32 %v6809_v25, %v231_v59  ;;  %v241_v46 = vld [vmem:[%s6801_s21 + $0xb0] sm:$0xff]  ;;  %v242_v59 = vld [vmem:[%s6801_s21 + $0xb8] sm:$0xff] }
 0x1e9   : > { %v6803_v56 = vpop.f32.mrb[12].mxu1 }
 0x1ea   : > { %v6811_v8 = vpop.f32.mrb[13].mxu1  ;;  %v5348_v0 = vadd.f32 %v6803_v56, %v276_v28 }
 0x1eb   : > { %v6814_v40 = vpop.f32.mrb[14].mxu1 }
 0x1ec   : > { %v6817_v9 = vpop.f32.mrb[15].mxu1 }
 0x1f2   : > { %v5274_v6 = vpop.f32.mrb[0].mxu0 }
 0x1f3   : > { %v5325_v41 = vadd.f32 %v5324_v18, %v5274_v6  ;;  %v3997_v21 = vpop.f32.mrb[1].mxu0 }
 0x1f4   : > { %v5327_v37 = vadd.f32 %v5326_v45, %v3997_v21  ;;  %v5275_v23 = vpop.f32.mrb[2].mxu0  ;;  %v5346_v45 = vadd.f32 %v6796_v29, %v271_v1 }
 0x1f5   : > { %v4178_v60 = vmax.f32 %v5325_v41, 0.0  ;;  %v5329_v24 = vadd.f32 %v5328_v31, %v5275_v23  ;;  %v4000_v43 = vpop.f32.mrb[3].mxu0  ;;  %v275_v23 = vadd.f32 %v6809_v25, %v232_v27 }
 0x1f6   : > { %v4176_v61 = vmax.f32 %v5327_v37, 0.0  ;;  %v5331_v62 = vadd.f32 %v5330_v52, %v4000_v43  ;;  %v277_v37 = vadd.f32 %v6809_v25, %v234_v57  ;;  %v240_v57 = vld [vmem:[%s6801_s21 + $0xa8] sm:$0xff] }
 0x1f7   : > { %4214 = vst [vmem:[%s6830_s25 + $0x10] sm:$0xff] %v4178_v60  ;;  %v4179_v5 = vmax.f32 %v5329_v24, 0.0  ;;  %v5350_v60 = vadd.f32 %v6811_v8, %v274_v26  ;;  %v283_v26 = vadd.f32 %v6809_v25, %v240_v57 }
 0x1f8   : > { %4212 = vst [vmem:[%s6830_s25] sm:$0xff] %v4176_v61  ;;  %v4177_v13 = vmax.f32 %v5331_v62, 0.0  ;;  %v5352_v43 = vadd.f32 %v6814_v40, %v277_v37  ;;  %v5354_v62 = vadd.f32 %v6817_v9, %v275_v23  ;;  %v237_v9 = vld [vmem:[%s6801_s21 + $0x90] sm:$0xff] }
 0x1f9   : > { %4215 = vst [vmem:[%s6830_s25 + $0x18] sm:$0xff] %v4179_v5 }
 0x1fa   : > { %4213 = vst [vmem:[%s6830_s25 + $0x8] sm:$0xff] %v4177_v13  ;;  %v5278_v15 = vpop.f32.mrb[4].mxu0 }
 0x1fb   : > { %v5333_v32 = vadd.f32 %v5332_v49, %v5278_v15  ;;  %v4013_v47 = vpop.f32.mrb[5].mxu0 }
 0x1fc   : > { %v5335_v54 = vadd.f32 %v5334_v42, %v4013_v47  ;;  %v5279_v2 = vpop.f32.mrb[6].mxu0  ;;  %v238_v47 = vld [vmem:[%s6801_s21 + $0x98] sm:$0xff] }
 0x1fd   : > { %v4182_v39 = vmax.f32 %v5333_v32, 0.0  ;;  %v5337_v7 = vadd.f32 %v5336_v14, %v5279_v2  ;;  %v4016_v22 = vpop.f32.mrb[7].mxu0  ;;  %v281_v2 = vadd.f32 %v6809_v25, %v238_v47 }
 0x1fe   : > { %v4180_v17 = vmax.f32 %v5335_v54, 0.0  ;;  %v5339_v58 = vadd.f32 %v5338_v38, %v4016_v22  ;;  %v280_v38 = vadd.f32 %v6809_v25, %v237_v9  ;;  %v278_v54 = vadd.f32 %v6809_v25, %v235_v50 }
 0x1ff   : > { %4218 = vst [vmem:[%s6830_s25 + $0x30] sm:$0xff] %v4182_v39  ;;  %v4183_v35 = vmax.f32 %v5337_v7, 0.0 }
 0x200   : > { %4216 = vst [vmem:[%s6830_s25 + $0x20] sm:$0xff] %v4180_v17  ;;  %v4181_v20 = vmax.f32 %v5339_v58, 0.0 }
 0x201   : > { %4219 = vst [vmem:[%s6830_s25 + $0x38] sm:$0xff] %v4183_v35 }
 0x202   : > { %4217 = vst [vmem:[%s6830_s25 + $0x28] sm:$0xff] %v4181_v20  ;;  %v5282_v33 = vpop.f32.mrb[8].mxu0 }
 0x203   : > { %v5341_v16 = vadd.f32 %v5340_v63, %v5282_v33  ;;  %v4029_v18 = vpop.f32.mrb[9].mxu0 }
 0x204   : > { %v5343_v6 = vadd.f32 %v5342_v48, %v4029_v18  ;;  %v5283_v31 = vpop.f32.mrb[10].mxu0  ;;  %v239_v48 = vld [vmem:[%s6801_s21 + $0xa0] sm:$0xff] }
 0x205   : > { %v4186_v44 = vmax.f32 %v5341_v16, 0.0  ;;  %v5345_v41 = vadd.f32 %v5344_v10, %v5283_v31  ;;  %v4032_v21 = vpop.f32.mrb[11].mxu0  ;;  %v282_v28 = vadd.f32 %v6809_v25, %v239_v48 }
 0x206   : > { %v4184_v52 = vmax.f32 %v5343_v6, 0.0  ;;  %v5347_v55 = vadd.f32 %v5346_v45, %v4032_v21  ;;  %v284_v45 = vadd.f32 %v6809_v25, %v241_v46 }
 0x207   : > { %4222 = vst [vmem:[%s6830_s25 + $0x50] sm:$0xff] %v4186_v44  ;;  %v4187_v29 = vmax.f32 %v5345_v41, 0.0  ;;  %v285_v44 = vadd.f32 %v6809_v25, %v242_v59 }
 0x208   : > { %4220 = vst [vmem:[%s6830_s25 + $0x40] sm:$0xff] %v4184_v52  ;;  %v4185_v12 = vmax.f32 %v5347_v55, 0.0 }
 0x209   : > { %4223 = vst [vmem:[%s6830_s25 + $0x58] sm:$0xff] %v4187_v29 }
 0x20a   : > { %4221 = vst [vmem:[%s6830_s25 + $0x48] sm:$0xff] %v4185_v12  ;;  %v5286_v24 = vpop.f32.mrb[12].mxu0 }
 0x20b   : > { %v5349_v4 = vadd.f32 %v5348_v0, %v5286_v24  ;;  %v4045_v61 = vpop.f32.mrb[13].mxu0  ;;  %v245_v0 = vld [vmem:[%s6801_s21 + $0xd0] sm:$0xff] }
 0x20c   : > { %v5351_v3 = vadd.f32 %v5350_v60, %v4045_v61  ;;  %v5287_v5 = vpop.f32.mrb[14].mxu0  ;;  %v243_v61 = vld [vmem:[%s6801_s21 + $0xc0] sm:$0xff] }
 0x20d   : > { %v4190_v56 = vmax.f32 %v5349_v4, 0.0  ;;  %v5353_v36 = vadd.f32 %v5352_v43, %v5287_v5  ;;  %v4048_v13 = vpop.f32.mrb[15].mxu0 }
 0x20e   : > { %v4188_v8 = vmax.f32 %v5351_v3, 0.0  ;;  %v5355_v49 = vadd.f32 %v5354_v62, %v4048_v13 }
 0x20f   : > { %4226 = vst [vmem:[%s6830_s25 + $0x70] sm:$0xff] %v4190_v56  ;;  %v4191_v42 = vmax.f32 %v5353_v36, 0.0  ;;  %v246_v56 = vld [vmem:[%s6801_s21 + $0xd8] sm:$0xff] }
 0x210   : > { %4224 = vst [vmem:[%s6830_s25 + $0x60] sm:$0xff] %v4188_v8  ;;  %v4189_v40 = vmax.f32 %v5355_v49, 0.0  ;;  %v288_v8 = vadd.f32 %v6809_v25, %v245_v0  ;;  %v244_v49 = vld [vmem:[%s6801_s21 + $0xc8] sm:$0xff]  ;;  %v289_v9 = vadd.f32 %v6809_v25, %v246_v56 }
 0x211   : > { %4227 = vst [vmem:[%s6830_s25 + $0x78] sm:$0xff] %v4191_v42 }
 0x212   : > { %4225 = vst [vmem:[%s6830_s25 + $0x68] sm:$0xff] %v4189_v40  ;;  %v5290_v53 = vpop.f32.mrb[16].mxu0 }
 0x213   : > { %v4061_v15 = vpop.f32.mrb[17].mxu0 }
 0x214   : > { %v5291_v14 = vpop.f32.mrb[18].mxu0 }
 0x215   : > { %v4064_v32 = vpop.f32.mrb[19].mxu0 }
 0x219   : > { %v5082_v19 = vpop.f32.mrb[16].mxu1 }
 0x21a   : > { %v5356_v39 = vadd.f32 %v5082_v19, %v280_v38  ;;  %v5294_v7 = vpop.f32.mrb[20].mxu0  ;;  %v2451_v22 = vpop.f32.mrb[17].mxu1 }
 0x21b   : > { %v5358_v34 = vadd.f32 %v2451_v22, %v278_v54  ;;  %v4077_v17 = vpop.f32.mrb[21].mxu0  ;;  %v5083_v58 = vpop.f32.mrb[18].mxu1 }
 0x21c   : > { %v5357_v35 = vadd.f32 %v5356_v39, %v5290_v53  ;;  %v5360_v1 = vadd.f32 %v5083_v58, %v281_v2  ;;  %v5295_v20 = vpop.f32.mrb[22].mxu0  ;;  %v2454_v63 = vpop.f32.mrb[19].mxu1  ;;  %v286_v53 = vadd.f32 %v6809_v25, %v243_v61 }
 0x21d   : > { %v5359_v30 = vadd.f32 %v5358_v34, %v4061_v15  ;;  %v5362_v33 = vadd.f32 %v2454_v63, %v279_v11  ;;  %v4080_v10 = vpop.f32.mrb[23].mxu0  ;;  %v249_v11 = vld [vmem:[%s6801_s21 + $0xf0] sm:$0xff] }
 0x21e   : > { %v4194_v16 = vmax.f32 %v5357_v35, 0.0  ;;  %v5361_v18 = vadd.f32 %v5360_v1, %v5291_v14  ;;  %v250_v1 = vld [vmem:[%s6801_s21 + $0xf8] sm:$0xff]  ;;  %v292_v48 = vadd.f32 %v6809_v25, %v249_v11 }
 0x21f   : > { %v4192_v6 = vmax.f32 %v5359_v30, 0.0  ;;  %v5363_v31 = vadd.f32 %v5362_v33, %v4064_v32  ;;  %v287_v32 = vadd.f32 %v6809_v25, %v244_v49  ;;  %v248_v30 = vld [vmem:[%s6801_s21 + $0xe8] sm:$0xff] }
 0x220   : > { %4230 = vst [vmem:[%s6830_s25 + $0x90] sm:$0xff] %v4194_v16  ;;  %v4195_v27 = vmax.f32 %v5361_v18, 0.0  ;;  %v293_v18 = vadd.f32 %v6809_v25, %v250_v1 }
 0x221   : > { %4228 = vst [vmem:[%s6830_s25 + $0x80] sm:$0xff] %v4192_v6  ;;  %v4193_v41 = vmax.f32 %v5363_v31, 0.0  ;;  %v5086_v21 = vpop.f32.mrb[20].mxu1  ;;  %v291_v6 = vadd.f32 %v6809_v25, %v248_v30 }
 0x222   : > { %4231 = vst [vmem:[%s6830_s25 + $0x98] sm:$0xff] %v4195_v27  ;;  %v5364_v52 = vadd.f32 %v5086_v21, %v284_v45  ;;  %v5298_v55 = vpop.f32.mrb[24].mxu0  ;;  %v2467_v37 = vpop.f32.mrb[21].mxu1 }
 0x223   : > { %4229 = vst [vmem:[%s6830_s25 + $0x88] sm:$0xff] %v4193_v41  ;;  %v5366_v29 = vadd.f32 %v2467_v37, %v282_v28  ;;  %v4093_v23 = vpop.f32.mrb[25].mxu0  ;;  %v5087_v12 = vpop.f32.mrb[22].mxu1 }
 0x224   : > { %v5365_v60 = vadd.f32 %v5364_v52, %v5294_v7  ;;  %v5368_v24 = vadd.f32 %v5087_v12, %v285_v44  ;;  %v5299_v43 = vpop.f32.mrb[26].mxu0  ;;  %v2470_v4 = vpop.f32.mrb[23].mxu1 }
 0x225   : > { %v5367_v62 = vadd.f32 %v5366_v29, %v4077_v17  ;;  %v5370_v3 = vadd.f32 %v2470_v4, %v283_v26  ;;  %v4096_v5 = vpop.f32.mrb[27].mxu0  ;;  %v247_v17 = vld [vmem:[%s6801_s21 + $0xe0] sm:$0xff]  ;;  %v253_v26 = vld [vmem:[%s6801_s21 + $0x110] sm:$0xff] }
 0x226   : > { %v4198_v36 = vmax.f32 %v5365_v60, 0.0  ;;  %v5369_v13 = vadd.f32 %v5368_v24, %v5295_v20  ;;  %v290_v59 = vadd.f32 %v6809_v25, %v247_v17  ;;  %v254_v24 = vld [vmem:[%s6801_s21 + $0x118] sm:$0xff]  ;;  %v296_v61 = vadd.f32 %v6809_v25, %v253_v26 }
 0x227   : > { %v4196_v42 = vmax.f32 %v5367_v62, 0.0  ;;  %v5371_v40 = vadd.f32 %v5370_v3, %v4080_v10  ;;  %v252_v62 = vld [vmem:[%s6801_s21 + $0x108] sm:$0xff] }
 0x228   : > { %4234 = vst [vmem:[%s6830_s25 + $0xb0] sm:$0xff] %v4198_v36  ;;  %v4199_v15 = vmax.f32 %v5369_v13, 0.0  ;;  %v297_v13 = vadd.f32 %v6809_v25, %v254_v24 }
 0x229   : > { %4232 = vst [vmem:[%s6830_s25 + $0xa0] sm:$0xff] %v4196_v42  ;;  %v4197_v14 = vmax.f32 %v5371_v40, 0.0  ;;  %v5090_v50 = vpop.f32.mrb[24].mxu1  ;;  %v295_v42 = vadd.f32 %v6809_v25, %v252_v62 }
 0x22a   : > { %4235 = vst [vmem:[%s6830_s25 + $0xb8] sm:$0xff] %v4199_v15  ;;  %v5372_v47 = vadd.f32 %v5090_v50, %v288_v8  ;;  %v5302_v38 = vpop.f32.mrb[28].mxu0  ;;  %v2483_v51 = vpop.f32.mrb[25].mxu1 }
 0x22b   : > { %4233 = vst [vmem:[%s6830_s25 + $0xa8] sm:$0xff] %v4197_v14  ;;  %v5374_v54 = vadd.f32 %v2483_v51, %v286_v53  ;;  %v4109_v2 = vpop.f32.mrb[29].mxu0  ;;  %v5091_v19 = vpop.f32.mrb[26].mxu1 }
 0x22c   : > { %v5373_v39 = vadd.f32 %v5372_v47, %v5298_v55  ;;  %v5376_v7 = vadd.f32 %v5091_v19, %v289_v9  ;;  %v5303_v22 = vpop.f32.mrb[30].mxu0  ;;  %v2486_v34 = vpop.f32.mrb[27].mxu1 }
 0x22d   : > { %v5375_v58 = vadd.f32 %v5374_v54, %v4093_v23  ;;  %v5378_v46 = vadd.f32 %v2486_v34, %v287_v32  ;;  %v4112_v35 = vpop.f32.mrb[31].mxu0  ;;  %v251_v23 = vld [vmem:[%s6801_s21 + $0x100] sm:$0xff] }
 0x22e   : > { %v4202_v20 = vmax.f32 %v5373_v39, 0.0  ;;  %v5377_v63 = vadd.f32 %v5376_v7, %v5299_v43  ;;  %v294_v56 = vadd.f32 %v6809_v25, %v251_v23 }
 0x22f   : > { %v4200_v33 = vmax.f32 %v5375_v58, 0.0  ;;  %v5379_v10 = vadd.f32 %v5378_v46, %v4096_v5 }
 0x230   : > { %4238 = vst [vmem:[%s6830_s25 + $0xd0] sm:$0xff] %v4202_v20  ;;  %v4203_v16 = vmax.f32 %v5377_v63, 0.0 }
 0x231   : > { %4236 = vst [vmem:[%s6830_s25 + $0xc0] sm:$0xff] %v4200_v33  ;;  %v4201_v45 = vmax.f32 %v5379_v10, 0.0  ;;  %v5094_v57 = vpop.f32.mrb[28].mxu1 }
 0x232   : > { %4239 = vst [vmem:[%s6830_s25 + $0xd8] sm:$0xff] %v4203_v16  ;;  %v5380_v31 = vadd.f32 %v5094_v57, %v292_v48  ;;  %v5306_v28 = vpop.f32.mrb[32].mxu0  ;;  %v2499_v27 = vpop.f32.mrb[29].mxu1 }
 0x233   : > { %4237 = vst [vmem:[%s6830_s25 + $0xc8] sm:$0xff] %v4201_v45  ;;  %v5382_v44 = vadd.f32 %v2499_v27, %v290_v59  ;;  %v4125_v41 = vpop.f32.mrb[33].mxu0  ;;  %v5095_v21 = vpop.f32.mrb[30].mxu1 }
 0x234   : > { %v5381_v52 = vadd.f32 %v5380_v31, %v5302_v38  ;;  %v5384_v55 = vadd.f32 %v5095_v21, %v293_v18  ;;  %v5307_v37 = vpop.f32.mrb[34].mxu0  ;;  %v2502_v29 = vpop.f32.mrb[31].mxu1 }
 0x235   : > { %v5383_v12 = vadd.f32 %v5382_v44, %v4109_v2  ;;  %v5386_v0 = vadd.f32 %v2502_v29, %v291_v6  ;;  %v4128_v60 = vpop.f32.mrb[35].mxu0 }
 0x236   : > { %v4206_v43 = vmax.f32 %v5381_v52, 0.0  ;;  %v5385_v4 = vadd.f32 %v5384_v55, %v5303_v22 }
 0x237   : > { %v4204_v3 = vmax.f32 %v5383_v12, 0.0  ;;  %v5387_v5 = vadd.f32 %v5386_v0, %v4112_v35 }
 0x238   : > { %4242 = vst [vmem:[%s6830_s25 + $0xf0] sm:$0xff] %v4206_v43  ;;  %v4207_v36 = vmax.f32 %v5385_v4, 0.0 }
 0x239   : > { %4240 = vst [vmem:[%s6830_s25 + $0xe0] sm:$0xff] %v4204_v3  ;;  %v4205_v8 = vmax.f32 %v5387_v5, 0.0  ;;  %v5098_v49 = vpop.f32.mrb[32].mxu1 }
 0x23a   : > { %4243 = vst [vmem:[%s6830_s25 + $0xf8] sm:$0xff] %v4207_v36  ;;  %v5388_v40 = vadd.f32 %v5098_v49, %v296_v61  ;;  %v2515_v53 = vpop.f32.mrb[33].mxu1 }
 0x23b   : > { %4241 = vst [vmem:[%s6830_s25 + $0xe8] sm:$0xff] %v4205_v8  ;;  %v5390_v15 = vadd.f32 %v2515_v53, %v294_v56  ;;  %v5099_v9 = vpop.f32.mrb[34].mxu1 }
 0x23c   : > { %v5389_v14 = vadd.f32 %v5388_v40, %v5306_v28  ;;  %v5392_v50 = vadd.f32 %v5099_v9, %v297_v13  ;;  %v2518_v32 = vpop.f32.mrb[35].mxu1 }
 0x23d   : > { %v5391_v47 = vadd.f32 %v5390_v15, %v4125_v41  ;;  %v5394_v38 = vadd.f32 %v2518_v32, %v295_v42 }
 0x23e   : > { %v4210_v51 = vmax.f32 %v5389_v14, 0.0  ;;  %v5393_v54 = vadd.f32 %v5392_v50, %v5307_v37 }
 0x23f   : > { %v4208_v2 = vmax.f32 %v5391_v47, 0.0  ;;  %v5395_v19 = vadd.f32 %v5394_v38, %v4128_v60 }
 0x240   : > { %4246 = vst [vmem:[%s6830_s25 + $0x110] sm:$0xff] %v4210_v51  ;;  %v4211_v25 = vmax.f32 %v5393_v54, 0.0 }
 0x241   : > { %4244 = vst [vmem:[%s6830_s25 + $0x100] sm:$0xff] %v4208_v2  ;;  %v4209_v11 = vmax.f32 %v5395_v19, 0.0 }
 0x242   : > { %4247 = vst [vmem:[%s6830_s25 + $0x118] sm:$0xff] %v4211_v25 }
 0x243   : > { %4245 = vst [vmem:[%s6830_s25 + $0x108] sm:$0xff] %v4209_v11 }
 0x244 PF: > { %s14_s15 = sadd.s32 1, %s5845_s15  }
 0x245   : > { %p11_p4 = scmp.ge.s32.totalorder %s14_s15, 4  }
 0x247   :  { %13 = sbr.rel (!%p11_p4) target bundleno = 1 (0x1), region = 77 }

</bundles_post_ra>
